<compile_context>
chip_gen: v7x
topology: tpu7x:2x2x1
jax: 0.10.0
libtpu: 0.0.40
codegen_flags: <defaults>
</compile_context>

<pallas_src>
import functools

import jax
import jax.numpy as jnp
import numpy as np
from jax import lax
from jax.experimental import pallas as pl
from jax.experimental.pallas import tpu as pltpu

EPS = 1e-5                 # modules.LayerNorm default eps
MXU_DTYPE = jnp.float32    # set to jnp.bfloat16 for the MXU path on v6e/v7x


# ---------------------------------------------------------------------------
# math helpers (channels-first, time on lanes)
# ---------------------------------------------------------------------------
def _shift_lanes(a, d):
    """b[:, t] = a[:, t + d] if 0 <= t + d < T else 0 (d is a static int)."""
    if d == 0:
        return a
    T = a.shape[-1]
    rolled = jnp.roll(a, -d, axis=-1)
    t_idx = lax.broadcasted_iota(jnp.int32, a.shape, a.ndim - 1)
    valid = (t_idx + d >= 0) & (t_idx + d < T)
    return jnp.where(valid, rolled, jnp.zeros_like(rolled))


def _im2col(x, k):
    """x: (C, T) -> (K*C, T); rows are tap-major: [tap0 chans.., tap1 chans..]."""
    pad = k // 2
    return jnp.concatenate([_shift_lanes(x, j - pad) for j in range(k)], axis=0)


def _conv_same_ct(x_masked, w_flat, b, k):
    """Conv1d('same') in (C, T).  w_flat: (Cout, K*Cin), b: (Cout, 1).

    All K taps fused into one MXU matmul with a lane-dense (Cout, T) result.
    """
    s = _im2col(x_masked, k)
    y = jnp.dot(w_flat.astype(MXU_DTYPE), s.astype(MXU_DTYPE),
                preferred_element_type=jnp.float32)
    return y + b


def _layer_norm_ct(x, gamma, beta):
    """modules.LayerNorm (normalize over channels) with single-pass stats."""
    c = x.shape[0]
    s1 = jnp.sum(x, axis=0, keepdims=True)
    s2 = jnp.sum(x * x, axis=0, keepdims=True)
    mean = s1 / c
    var = jnp.maximum(s2 / c - mean * mean, 0.0)
    return (x - mean) * lax.rsqrt(var + EPS) * gamma + beta


def _body_opt(x, mask, dur_r, dur_hat, w, kernel_size):
    """Full forward for ONE batch element, channels-first.  Returns 2 probs."""
    (w1f, b1, g1, be1,
     w2f, b2, g2, be2,
     wp1hf, wp1A, wp1C, bp1, gp1, bep1,
     wp2f, bp2, gp2, bep2,
     wl, bl) = w
    K = kernel_size
    pad = K // 2

    # backbone: conv_1 -> relu -> LN -> drop(id) -> conv_2 -> relu -> LN -> drop(id)
    h = _conv_same_ct(x * mask, w1f, b1, K)
    h = jnp.maximum(h, 0.0)
    h = _layer_norm_ct(h, g1, be1)
    h = _conv_same_ct(h * mask, w2f, b2, K)
    h = jnp.maximum(h, 0.0)
    h = _layer_norm_ct(h, g2, be2)                       # (F, T)

    # --- pre_out_conv_1: shared h-half + shared mask-term, hoisted out of
    #     both probability branches (conv is linear in its input) -------------
    y_shared = _conv_same_ct(h * mask, wp1hf, bp1, K)    # includes bias once
    mask_taps = [_shift_lanes(mask, j - pad) for j in range(K)]
    for j in range(K):                                   # dur_proj bias term
        y_shared = y_shared + wp1C[j] * mask_taps[j]     # (F,1)*(1,T) on VPU

    def branch(dur):
        dm = dur * mask                                  # (1, T)
        y = y_shared
        for j in range(K):                               # rank-1 dur term, VPU
            y = y + wp1A[j] * _shift_lanes(dm, j - pad)
        y = jnp.maximum(y, 0.0)
        y = _layer_norm_ct(y, gp1, bep1)
        y = _conv_same_ct(y * mask, wp2f, bp2, K)
        y = jnp.maximum(y, 0.0)
        y = _layer_norm_ct(y, gp2, bep2)
        y = y * mask
        # output Linear(F, 1) as a sublane reduction -> lane-dense (1, T) row
        logit = jnp.sum(y * wl, axis=0, keepdims=True) + bl
        return jax.nn.sigmoid(logit)

    return branch(dur_r), branch(dur_hat)


# ---------------------------------------------------------------------------
# Pallas kernel (one grid step = one batch element; everything fused in VMEM)
# ---------------------------------------------------------------------------
def dur_disc_kernel(x_ref, mask_ref, dr_ref, dh_ref,
                    w1f, b1, g1, be1,
                    w2f, b2, g2, be2,
                    wp1hf, wp1A, wp1C, bp1, gp1, bep1,
                    wp2f, bp2, gp2, bep2,
                    wl, bl,
                    out_ref, *, kernel_size):
    x = x_ref[0].astype(jnp.float32)        # (Cin, T)
    mask = mask_ref[0].astype(jnp.float32)  # (1, T)
    dur_r = dr_ref[0].astype(jnp.float32)   # (1, T)
    dur_hat = dh_ref[0].astype(jnp.float32)

    weights = (w1f[...], b1[...], g1[...], be1[...],
               w2f[...], b2[...], g2[...], be2[...],
               wp1hf[...], wp1A[...], wp1C[...], bp1[...], gp1[...], bep1[...],
               wp2f[...], bp2[...], gp2[...], bep2[...],
               wl[...], bl[...])

    p_r, p_hat = _body_opt(x, mask, dur_r, dur_hat, weights, kernel_size)
    # single lane-dense store: row 0 = prob(dur_r), row 1 = prob(dur_hat)
    out_ref[0] = jnp.concatenate([p_r, p_hat], axis=0).astype(out_ref.dtype)


def duration_discriminator(x, x_mask, dur_r, dur_hat, kparams, kernel_size):
    """x: (B, Cin, T), x_mask/dur_r/dur_hat: (B, 1, T) (PyTorch NCT layout).

    Returns (prob_r, prob_hat), each (B, 1, T) (lane-dense; PyTorch would be
    the (B, T, 1) transpose).
    """
    B, Cin, T = x.shape
    F_ = kparams[1].shape[0]
    K = kernel_size

    def batched_spec(c):
        return pl.BlockSpec((1, c, T), lambda b: (b, 0, 0))

    def full_spec(shape):
        nd = len(shape)
        return pl.BlockSpec(shape, lambda b, _nd=nd: (0,) * _nd)

    in_specs = ([batched_spec(Cin), batched_spec(1), batched_spec(1),
                 batched_spec(1)]
                + [full_spec(p.shape) for p in kparams])

    out_shape = jax.ShapeDtypeStruct((B, 2, T), jnp.float32)
    out_specs = pl.BlockSpec((1, 2, T), lambda b: (b, 0, 0))

    # advisory cost estimate for the XLA scheduler
    mxu_flops = 2 * T * F_ * K * (Cin + 4 * F_) + 40 * T * F_
    transcendentals = 8 * T
    weight_bytes = sum(int(p.size) for p in kparams) * 4
    bytes_accessed = (int(x.size) + 3 * B * T + 2 * B * T) * 4 + weight_bytes
    cost = pl.CostEstimate(flops=int(B * mxu_flops),
                           transcendentals=int(B * transcendentals),
                           bytes_accessed=int(bytes_accessed))

    out = pl.pallas_call(
        functools.partial(dur_disc_kernel, kernel_size=K),
        out_shape=out_shape,
        grid_spec=pltpu.PrefetchScalarGridSpec(
            num_scalar_prefetch=0,
            grid=(B,),
            in_specs=in_specs,
            out_specs=out_specs,
        ),
        compiler_params=pltpu.CompilerParams(
            dimension_semantics=("parallel",)),
        cost_estimate=cost,
    )(x, x_mask, dur_r, dur_hat, *kparams)

    return out[:, 0:1, :], out[:, 1:2, :]


# ---------------------------------------------------------------------------
# parameter construction (PyTorch-layout synthetic weights) + kernel packing
# ---------------------------------------------------------------------------
def make_params(key, in_channels, filter_channels, kernel_size):
    """Synthetic weights in native PyTorch layouts."""
    F_, K = filter_channels, kernel_size
    ks = jax.random.split(key, 12)

    def w(k, shape, scale=0.1):
        return (scale * jax.random.normal(k, shape)).astype(jnp.float32)

    return (
        w(ks[0], (F_, in_channels, K)),     # conv_1.weight         (Cout,Cin,K)
        w(ks[1], (F_,)),                    # conv_1.bias
        jnp.ones((F_,), jnp.float32),       # norm_1.gamma
        jnp.zeros((F_,), jnp.float32),      # norm_1.beta
        w(ks[2], (F_, F_, K)),              # conv_2.weight
        w(ks[3], (F_,)),                    # conv_2.bias
        jnp.ones((F_,), jnp.float32),       # norm_2.gamma
        jnp.zeros((F_,), jnp.float32),      # norm_2.beta
        w(ks[4], (F_, 1, 1)),               # dur_proj.weight
        w(ks[5], (F_,)),                    # dur_proj.bias
        w(ks[6], (F_, 2 * F_, K)),          # pre_out_conv_1.weight
        w(ks[7], (F_,)),                    # pre_out_conv_1.bias
        jnp.ones((F_,), jnp.float32),       # pre_out_norm_1.gamma
        jnp.zeros((F_,), jnp.float32),      # pre_out_norm_1.beta
        w(ks[8], (F_, F_, K)),              # pre_out_conv_2.weight
        w(ks[9], (F_,)),                    # pre_out_conv_2.bias
        jnp.ones((F_,), jnp.float32),       # pre_out_norm_2.gamma
        jnp.zeros((F_,), jnp.float32),      # pre_out_norm_2.beta
        w(ks[10], (1, F_)),                 # output_layer[0].weight (Linear)
        w(ks[11], (1,)),                    # output_layer[0].bias
    )


def prepare_params(pt):
    """Repack PyTorch-layout weights into the kernel's (C,T) im2col layout.

    Also pre-folds dur_proj into pre_out_conv_1's dur-half (rank-1 collapse).
    """
    (w1, b1, g1, be1, w2, b2, g2, be2,
     wd, bd, wp1, bp1, gp1, bep1, wp2, bp2, gp2, bep2, wl, bl) = pt
    F_ = w1.shape[0]

    def flat(w_):                       # (Cout, Cin, K) -> (Cout, K*Cin), tap-major
        co, ci, k = w_.shape
        return jnp.transpose(w_, (0, 2, 1)).reshape(co, k * ci)

    def col(v):
        return v.reshape(-1, 1)

    wp1_h = wp1[:, :F_, :]              # half acting on the backbone features
    wp1_d = wp1[:, F_:, :]              # half acting on dur_proj(dur)
    wd_vec = wd[:, 0, 0]                # (F,)
    # A[j, f] = sum_c wp1_d[f, c, j] * wd_vec[c];  C[j, f] = sum_c wp1_d[f,c,j]*bd[c]
    wp1A = jnp.einsum('fcj,c->jf', wp1_d, wd_vec)[:, :, None]   # (K, F, 1)
    wp1C = jnp.einsum('fcj,c->jf', wp1_d, bd)[:, :, None]       # (K, F, 1)

    return (
        flat(w1), col(b1), col(g1), col(be1),
        flat(w2), col(b2), col(g2), col(be2),
        flat(wp1_h), wp1A, wp1C, col(bp1), col(gp1), col(bep1),
        flat(wp2), col(bp2), col(gp2), col(bep2),
        col(wl[0]), bl.reshape(1, 1),
    )


# ---------------------------------------------------------------------------
# independent pure-JAX reference (literal port of the PyTorch forward)
# ---------------------------------------------------------------------------
def reference(x, x_mask, dur_r, dur_hat, pt):
    (w1, b1, g1, be1, w2, b2, g2, be2,
     wd, bd, wp1, bp1, gp1, bep1, wp2, bp2, gp2, bep2, wl, bl) = pt
    K = w1.shape[2]
    pad = K // 2

    def conv1d(xb, w, b):               # xb (C, T), w (Cout, Cin, K)
        T = xb.shape[1]
        xp = jnp.pad(xb, ((0, 0), (pad, pad)))
        y = jnp.zeros((w.shape[0], T), jnp.float32)
        for j in range(K):
            y = y + jnp.dot(w[:, :, j], xp[:, j:j + T])
        return y + b[:, None]

    def ln(xb, g, be):                  # normalize over channels
        m = jnp.mean(xb, axis=0, keepdims=True)
        v = jnp.mean((xb - m) ** 2, axis=0, keepdims=True)
        return (xb - m) / jnp.sqrt(v + EPS) * g[:, None] + be[:, None]

    def one(xb, mb, drb, dhb):
        h = conv1d(xb * mb, w1, b1)
        h = jnp.maximum(h, 0.0)
        h = ln(h, g1, be1)
        h = conv1d(h * mb, w2, b2)
        h = jnp.maximum(h, 0.0)
        h = ln(h, g2, be2)

        def prob(dur):
            dp = jnp.dot(wd[:, :, 0], dur) + bd[:, None]        # dur_proj
            xc = jnp.concatenate([h, dp], axis=0)
            y = conv1d(xc * mb, wp1, bp1)
            y = jnp.maximum(y, 0.0)
            y = ln(y, gp1, bep1)
            y = conv1d(y * mb, wp2, bp2)
            y = jnp.maximum(y, 0.0)
            y = ln(y, gp2, bep2)
            y = y * mb
            logit = jnp.dot(wl, y) + bl[:, None]                # (1, T)
            return jax.nn.sigmoid(logit)

        return prob(drb), prob(dhb)

    return jax.vmap(one)(x.astype(jnp.float32), x_mask.astype(jnp.float32),
                         dur_r.astype(jnp.float32), dur_hat.astype(jnp.float32))


if __name__ == "__main__":
    B, C_IN, F_CH, K, T = 2, 4, 32, 3, 16

    key = jax.random.PRNGKey(0)
    k_x, k_d1, k_d2, k_w = jax.random.split(key, 4)

    x = jax.random.normal(k_x, (B, C_IN, T), jnp.float32)
    # mask out the tail of the second sequence
    lengths = jnp.array([T, 12], jnp.int32)
    t_idx = jnp.arange(T)[None, None, :]
    x_mask = (t_idx < lengths[:, None, None]).astype(jnp.float32)    # (B,1,T)
    dur_r = jnp.abs(jax.random.normal(k_d1, (B, 1, T), jnp.float32))
    dur_hat = jnp.abs(jax.random.normal(k_d2, (B, 1, T), jnp.float32))

    pt_params = make_params(k_w, C_IN, F_CH, K)
    kparams = prepare_params(pt_params)

    out_r, out_hat = duration_discriminator(x, x_mask, dur_r, dur_hat,
                                            kparams, K)
    jax.block_until_ready((out_r, out_hat))

    ref_r, ref_hat = reference(x, x_mask, dur_r, dur_hat, pt_params)
    np.testing.assert_allclose(np.asarray(out_r), np.asarray(ref_r),
                               rtol=1e-4, atol=1e-4)
    np.testing.assert_allclose(np.asarray(out_hat), np.asarray(ref_hat),
                               rtol=1e-4, atol=1e-4)
    assert out_r.shape == (B, 1, T) and out_hat.shape == (B, 1, T)

    print("KERNEL_OK")
</pallas_src>

<mosaic_0001>
module attributes {stable_mosaic.version = 11 : i64} {
  func.func @dur_disc_kernel(%arg0: i32, %arg1: memref<1x4x16xf32, #tpu.memory_space<vmem>>, %arg2: memref<1x1x16xf32, #tpu.memory_space<vmem>>, %arg3: memref<1x1x16xf32, #tpu.memory_space<vmem>>, %arg4: memref<1x1x16xf32, #tpu.memory_space<vmem>>, %arg5: memref<32x12xf32, #tpu.memory_space<vmem>>, %arg6: memref<32x1xf32, #tpu.memory_space<vmem>>, %arg7: memref<32x1xf32, #tpu.memory_space<vmem>>, %arg8: memref<32x1xf32, #tpu.memory_space<vmem>>, %arg9: memref<32x96xf32, #tpu.memory_space<vmem>>, %arg10: memref<32x1xf32, #tpu.memory_space<vmem>>, %arg11: memref<32x1xf32, #tpu.memory_space<vmem>>, %arg12: memref<32x1xf32, #tpu.memory_space<vmem>>, %arg13: memref<32x96xf32, #tpu.memory_space<vmem>>, %arg14: memref<3x32x1xf32, #tpu.memory_space<vmem>>, %arg15: memref<3x32x1xf32, #tpu.memory_space<vmem>>, %arg16: memref<32x1xf32, #tpu.memory_space<vmem>>, %arg17: memref<32x1xf32, #tpu.memory_space<vmem>>, %arg18: memref<32x1xf32, #tpu.memory_space<vmem>>, %arg19: memref<32x96xf32, #tpu.memory_space<vmem>>, %arg20: memref<32x1xf32, #tpu.memory_space<vmem>>, %arg21: memref<32x1xf32, #tpu.memory_space<vmem>>, %arg22: memref<32x1xf32, #tpu.memory_space<vmem>>, %arg23: memref<32x1xf32, #tpu.memory_space<vmem>>, %arg24: memref<1x1xf32, #tpu.memory_space<vmem>>, %arg25: memref<1x2x16xf32, #tpu.memory_space<vmem>>) attributes {dimension_semantics = [#tpu.dimension_semantics<parallel>], iteration_bounds = array<i64: 2>, scalar_prefetch = 0 : i64, scratch_operands = 0 : i64, tpu.core_type = #tpu.core_type<tc>, window_params = [{transform_indices = @transform_0, window_bounds = array<i64: 1, 4, 16>}, {transform_indices = @transform_1, window_bounds = array<i64: 1, 1, 16>}, {transform_indices = @transform_2, window_bounds = array<i64: 1, 1, 16>}, {transform_indices = @transform_3, window_bounds = array<i64: 1, 1, 16>}, {pipeline_mode = #tpu.pipeline_mode<synchronous>, transform_indices = @transform_4, window_bounds = array<i64: 32, 12>}, {pipeline_mode = #tpu.pipeline_mode<synchronous>, transform_indices = @transform_5, window_bounds = array<i64: 32, 1>}, {pipeline_mode = #tpu.pipeline_mode<synchronous>, transform_indices = @transform_6, window_bounds = array<i64: 32, 1>}, {pipeline_mode = #tpu.pipeline_mode<synchronous>, transform_indices = @transform_7, window_bounds = array<i64: 32, 1>}, {pipeline_mode = #tpu.pipeline_mode<synchronous>, transform_indices = @transform_8, window_bounds = array<i64: 32, 96>}, {pipeline_mode = #tpu.pipeline_mode<synchronous>, transform_indices = @transform_9, window_bounds = array<i64: 32, 1>}, {pipeline_mode = #tpu.pipeline_mode<synchronous>, transform_indices = @transform_10, window_bounds = array<i64: 32, 1>}, {pipeline_mode = #tpu.pipeline_mode<synchronous>, transform_indices = @transform_11, window_bounds = array<i64: 32, 1>}, {pipeline_mode = #tpu.pipeline_mode<synchronous>, transform_indices = @transform_12, window_bounds = array<i64: 32, 96>}, {pipeline_mode = #tpu.pipeline_mode<synchronous>, transform_indices = @transform_13, window_bounds = array<i64: 3, 32, 1>}, {pipeline_mode = #tpu.pipeline_mode<synchronous>, transform_indices = @transform_14, window_bounds = array<i64: 3, 32, 1>}, {pipeline_mode = #tpu.pipeline_mode<synchronous>, transform_indices = @transform_15, window_bounds = array<i64: 32, 1>}, {pipeline_mode = #tpu.pipeline_mode<synchronous>, transform_indices = @transform_16, window_bounds = array<i64: 32, 1>}, {pipeline_mode = #tpu.pipeline_mode<synchronous>, transform_indices = @transform_17, window_bounds = array<i64: 32, 1>}, {pipeline_mode = #tpu.pipeline_mode<synchronous>, transform_indices = @transform_18, window_bounds = array<i64: 32, 96>}, {pipeline_mode = #tpu.pipeline_mode<synchronous>, transform_indices = @transform_19, window_bounds = array<i64: 32, 1>}, {pipeline_mode = #tpu.pipeline_mode<synchronous>, transform_indices = @transform_20, window_bounds = array<i64: 32, 1>}, {pipeline_mode = #tpu.pipeline_mode<synchronous>, transform_indices = @transform_21, window_bounds = array<i64: 32, 1>}, {pipeline_mode = #tpu.pipeline_mode<synchronous>, transform_indices = @transform_22, window_bounds = array<i64: 32, 1>}, {pipeline_mode = #tpu.pipeline_mode<synchronous>, transform_indices = @transform_23, window_bounds = array<i64: 1, 1>}, {transform_indices = @transform_24, window_bounds = array<i64: 1, 2, 16>}]} {
    %c0 = arith.constant 0 : index
    %c0_0 = arith.constant 0 : index
    %c0_1 = arith.constant 0 : index
    %0 = vector.load %arg1[%c0, %c0_0, %c0_1] : memref<1x4x16xf32, #tpu.memory_space<vmem>>, vector<1x4x16xf32>
    %1 = vector.shape_cast %0 : vector<1x4x16xf32> to vector<4x16xf32>
    %c0_2 = arith.constant 0 : index
    %c0_3 = arith.constant 0 : index
    %c0_4 = arith.constant 0 : index
    %2 = vector.load %arg2[%c0_2, %c0_3, %c0_4] : memref<1x1x16xf32, #tpu.memory_space<vmem>>, vector<1x1x16xf32>
    %3 = vector.shape_cast %2 : vector<1x1x16xf32> to vector<1x16xf32>
    %c0_5 = arith.constant 0 : index
    %c0_6 = arith.constant 0 : index
    %c0_7 = arith.constant 0 : index
    %4 = vector.load %arg3[%c0_5, %c0_6, %c0_7] : memref<1x1x16xf32, #tpu.memory_space<vmem>>, vector<1x1x16xf32>
    %5 = vector.shape_cast %4 : vector<1x1x16xf32> to vector<1x16xf32>
    %c0_8 = arith.constant 0 : index
    %c0_9 = arith.constant 0 : index
    %c0_10 = arith.constant 0 : index
    %6 = vector.load %arg4[%c0_8, %c0_9, %c0_10] : memref<1x1x16xf32, #tpu.memory_space<vmem>>, vector<1x1x16xf32>
    %7 = vector.shape_cast %6 : vector<1x1x16xf32> to vector<1x16xf32>
    %c0_11 = arith.constant 0 : index
    %c0_12 = arith.constant 0 : index
    %8 = vector.load %arg5[%c0_11, %c0_12] : memref<32x12xf32, #tpu.memory_space<vmem>>, vector<32x12xf32>
    %c0_13 = arith.constant 0 : index
    %c0_14 = arith.constant 0 : index
    %9 = vector.load %arg6[%c0_13, %c0_14] : memref<32x1xf32, #tpu.memory_space<vmem>>, vector<32x1xf32>
    %c0_15 = arith.constant 0 : index
    %c0_16 = arith.constant 0 : index
    %10 = vector.load %arg7[%c0_15, %c0_16] : memref<32x1xf32, #tpu.memory_space<vmem>>, vector<32x1xf32>
    %c0_17 = arith.constant 0 : index
    %c0_18 = arith.constant 0 : index
    %11 = vector.load %arg8[%c0_17, %c0_18] : memref<32x1xf32, #tpu.memory_space<vmem>>, vector<32x1xf32>
    %c0_19 = arith.constant 0 : index
    %c0_20 = arith.constant 0 : index
    %12 = vector.load %arg9[%c0_19, %c0_20] : memref<32x96xf32, #tpu.memory_space<vmem>>, vector<32x96xf32>
    %c0_21 = arith.constant 0 : index
    %c0_22 = arith.constant 0 : index
    %13 = vector.load %arg10[%c0_21, %c0_22] : memref<32x1xf32, #tpu.memory_space<vmem>>, vector<32x1xf32>
    %c0_23 = arith.constant 0 : index
    %c0_24 = arith.constant 0 : index
    %14 = vector.load %arg11[%c0_23, %c0_24] : memref<32x1xf32, #tpu.memory_space<vmem>>, vector<32x1xf32>
    %c0_25 = arith.constant 0 : index
    %c0_26 = arith.constant 0 : index
    %15 = vector.load %arg12[%c0_25, %c0_26] : memref<32x1xf32, #tpu.memory_space<vmem>>, vector<32x1xf32>
    %c0_27 = arith.constant 0 : index
    %c0_28 = arith.constant 0 : index
    %16 = vector.load %arg13[%c0_27, %c0_28] : memref<32x96xf32, #tpu.memory_space<vmem>>, vector<32x96xf32>
    %c0_29 = arith.constant 0 : index
    %c0_30 = arith.constant 0 : index
    %c0_31 = arith.constant 0 : index
    %17 = vector.load %arg14[%c0_29, %c0_30, %c0_31] : memref<3x32x1xf32, #tpu.memory_space<vmem>>, vector<3x32x1xf32>
    %c0_32 = arith.constant 0 : index
    %c0_33 = arith.constant 0 : index
    %c0_34 = arith.constant 0 : index
    %18 = vector.load %arg15[%c0_32, %c0_33, %c0_34] : memref<3x32x1xf32, #tpu.memory_space<vmem>>, vector<3x32x1xf32>
    %c0_35 = arith.constant 0 : index
    %c0_36 = arith.constant 0 : index
    %19 = vector.load %arg16[%c0_35, %c0_36] : memref<32x1xf32, #tpu.memory_space<vmem>>, vector<32x1xf32>
    %c0_37 = arith.constant 0 : index
    %c0_38 = arith.constant 0 : index
    %20 = vector.load %arg17[%c0_37, %c0_38] : memref<32x1xf32, #tpu.memory_space<vmem>>, vector<32x1xf32>
    %c0_39 = arith.constant 0 : index
    %c0_40 = arith.constant 0 : index
    %21 = vector.load %arg18[%c0_39, %c0_40] : memref<32x1xf32, #tpu.memory_space<vmem>>, vector<32x1xf32>
    %c0_41 = arith.constant 0 : index
    %c0_42 = arith.constant 0 : index
    %22 = vector.load %arg19[%c0_41, %c0_42] : memref<32x96xf32, #tpu.memory_space<vmem>>, vector<32x96xf32>
    %c0_43 = arith.constant 0 : index
    %c0_44 = arith.constant 0 : index
    %23 = vector.load %arg20[%c0_43, %c0_44] : memref<32x1xf32, #tpu.memory_space<vmem>>, vector<32x1xf32>
    %c0_45 = arith.constant 0 : index
    %c0_46 = arith.constant 0 : index
    %24 = vector.load %arg21[%c0_45, %c0_46] : memref<32x1xf32, #tpu.memory_space<vmem>>, vector<32x1xf32>
    %c0_47 = arith.constant 0 : index
    %c0_48 = arith.constant 0 : index
    %25 = vector.load %arg22[%c0_47, %c0_48] : memref<32x1xf32, #tpu.memory_space<vmem>>, vector<32x1xf32>
    %c0_49 = arith.constant 0 : index
    %c0_50 = arith.constant 0 : index
    %26 = vector.load %arg23[%c0_49, %c0_50] : memref<32x1xf32, #tpu.memory_space<vmem>>, vector<32x1xf32>
    %c0_51 = arith.constant 0 : index
    %c0_52 = arith.constant 0 : index
    %27 = vector.load %arg24[%c0_51, %c0_52] : memref<1x1xf32, #tpu.memory_space<vmem>>, vector<1x1xf32>
    %28 = vector.broadcast %3 : vector<1x16xf32> to vector<4x16xf32>
    %29 = arith.mulf %1, %28 : vector<4x16xf32>
    %30 = vector.extract_strided_slice %29 {offsets = [0, 15], sizes = [4, 1], strides = [1, 1]} : vector<4x16xf32> to vector<4x1xf32>
    %31 = vector.extract_strided_slice %29 {offsets = [0, 0], sizes = [4, 15], strides = [1, 1]} : vector<4x16xf32> to vector<4x15xf32>
    %32 = tpu.concatenate %30, %31 in 1 : vector<4x1xf32>, vector<4x15xf32> -> vector<4x16xf32>
    %33 = tpu.iota {dimensions = array<i32: 1>} : vector<4x16xi32>
    %c-1_i32 = arith.constant -1 : i32
    %34 = vector.broadcast %c-1_i32 : i32 to vector<4x16xi32>
    %35 = arith.addi %33, %34 : vector<4x16xi32>
    %c0_i32 = arith.constant 0 : i32
    %36 = vector.broadcast %c0_i32 : i32 to vector<4x16xi32>
    %37 = arith.cmpi sge, %35, %36 : vector<4x16xi32>
    %c-1_i32_53 = arith.constant -1 : i32
    %38 = vector.broadcast %c-1_i32_53 : i32 to vector<4x16xi32>
    %39 = arith.addi %33, %38 : vector<4x16xi32>
    %c16_i32 = arith.constant 16 : i32
    %40 = vector.broadcast %c16_i32 : i32 to vector<4x16xi32>
    %41 = arith.cmpi slt, %39, %40 : vector<4x16xi32>
    %42 = arith.andi %37, %41 : vector<4x16xi1>
    %cst = arith.constant 0.000000e+00 : f32
    %43 = vector.broadcast %cst : f32 to vector<4x16xf32>
    %44 = arith.select %42, %32, %43 : vector<4x16xi1>, vector<4x16xf32>
    %45 = vector.extract_strided_slice %29 {offsets = [0, 1], sizes = [4, 15], strides = [1, 1]} : vector<4x16xf32> to vector<4x15xf32>
    %46 = vector.extract_strided_slice %29 {offsets = [0, 0], sizes = [4, 1], strides = [1, 1]} : vector<4x16xf32> to vector<4x1xf32>
    %47 = tpu.concatenate %45, %46 in 1 : vector<4x15xf32>, vector<4x1xf32> -> vector<4x16xf32>
    %48 = tpu.iota {dimensions = array<i32: 1>} : vector<4x16xi32>
    %c1_i32 = arith.constant 1 : i32
    %49 = vector.broadcast %c1_i32 : i32 to vector<4x16xi32>
    %50 = arith.addi %48, %49 : vector<4x16xi32>
    %c0_i32_54 = arith.constant 0 : i32
    %51 = vector.broadcast %c0_i32_54 : i32 to vector<4x16xi32>
    %52 = arith.cmpi sge, %50, %51 : vector<4x16xi32>
    %c1_i32_55 = arith.constant 1 : i32
    %53 = vector.broadcast %c1_i32_55 : i32 to vector<4x16xi32>
    %54 = arith.addi %48, %53 : vector<4x16xi32>
    %c16_i32_56 = arith.constant 16 : i32
    %55 = vector.broadcast %c16_i32_56 : i32 to vector<4x16xi32>
    %56 = arith.cmpi slt, %54, %55 : vector<4x16xi32>
    %57 = arith.andi %52, %56 : vector<4x16xi1>
    %cst_57 = arith.constant 0.000000e+00 : f32
    %58 = vector.broadcast %cst_57 : f32 to vector<4x16xf32>
    %59 = arith.select %57, %47, %58 : vector<4x16xi1>, vector<4x16xf32>
    %60 = tpu.concatenate %44, %29, %59 in 0 : vector<4x16xf32>, vector<4x16xf32>, vector<4x16xf32> -> vector<12x16xf32>
    %cst_58 = arith.constant dense<0.000000e+00> : vector<32x16xf32>
    %61 = tpu.matmul %8, %60, %cst_58 {dimension_numbers = #tpu.dot_dimension_numbers<[1], [0], [0], [1], [0, 0, 1, 1], [], []>} : vector<32x12xf32>, vector<12x16xf32>, vector<32x16xf32> -> vector<32x16xf32>
    %62 = vector.broadcast %9 : vector<32x1xf32> to vector<32x16xf32>
    %63 = arith.addf %61, %62 : vector<32x16xf32>
    %cst_59 = arith.constant 0.000000e+00 : f32
    %64 = vector.broadcast %cst_59 : f32 to vector<32x16xf32>
    %65 = arith.maximumf %63, %64 : vector<32x16xf32>
    %cst_60 = arith.constant dense<0.000000e+00> : vector<16xf32>
    %66 = vector.multi_reduction <add>, %65, %cst_60 [0] : vector<32x16xf32> to vector<16xf32>
    %67 = vector.shape_cast %66 : vector<16xf32> to vector<1x16xf32>
    %68 = arith.mulf %65, %65 : vector<32x16xf32>
    %cst_61 = arith.constant dense<0.000000e+00> : vector<16xf32>
    %69 = vector.multi_reduction <add>, %68, %cst_61 [0] : vector<32x16xf32> to vector<16xf32>
    %70 = vector.shape_cast %69 : vector<16xf32> to vector<1x16xf32>
    %cst_62 = arith.constant 3.200000e+01 : f32
    %71 = vector.broadcast %cst_62 : f32 to vector<1x16xf32>
    %72 = arith.divf %67, %71 : vector<1x16xf32>
    %cst_63 = arith.constant 3.200000e+01 : f32
    %73 = vector.broadcast %cst_63 : f32 to vector<1x16xf32>
    %74 = arith.divf %70, %73 : vector<1x16xf32>
    %75 = arith.mulf %72, %72 : vector<1x16xf32>
    %76 = arith.subf %74, %75 : vector<1x16xf32>
    %cst_64 = arith.constant 0.000000e+00 : f32
    %77 = vector.broadcast %cst_64 : f32 to vector<1x16xf32>
    %78 = arith.maximumf %76, %77 : vector<1x16xf32>
    %79 = vector.broadcast %72 : vector<1x16xf32> to vector<32x16xf32>
    %80 = arith.subf %65, %79 : vector<32x16xf32>
    %cst_65 = arith.constant 9.99999974E-6 : f32
    %81 = vector.broadcast %cst_65 : f32 to vector<1x16xf32>
    %82 = arith.addf %78, %81 : vector<1x16xf32>
    %83 = math.rsqrt %82 : vector<1x16xf32>
    %84 = vector.broadcast %83 : vector<1x16xf32> to vector<32x16xf32>
    %85 = arith.mulf %80, %84 : vector<32x16xf32>
    %86 = vector.broadcast %10 : vector<32x1xf32> to vector<32x16xf32>
    %87 = arith.mulf %85, %86 : vector<32x16xf32>
    %88 = vector.broadcast %11 : vector<32x1xf32> to vector<32x16xf32>
    %89 = arith.addf %87, %88 : vector<32x16xf32>
    %90 = vector.broadcast %3 : vector<1x16xf32> to vector<32x16xf32>
    %91 = arith.mulf %89, %90 : vector<32x16xf32>
    %92 = vector.extract_strided_slice %91 {offsets = [0, 15], sizes = [32, 1], strides = [1, 1]} : vector<32x16xf32> to vector<32x1xf32>
    %93 = vector.extract_strided_slice %91 {offsets = [0, 0], sizes = [32, 15], strides = [1, 1]} : vector<32x16xf32> to vector<32x15xf32>
    %94 = tpu.concatenate %92, %93 in 1 : vector<32x1xf32>, vector<32x15xf32> -> vector<32x16xf32>
    %95 = tpu.iota {dimensions = array<i32: 1>} : vector<32x16xi32>
    %c-1_i32_66 = arith.constant -1 : i32
    %96 = vector.broadcast %c-1_i32_66 : i32 to vector<32x16xi32>
    %97 = arith.addi %95, %96 : vector<32x16xi32>
    %c0_i32_67 = arith.constant 0 : i32
    %98 = vector.broadcast %c0_i32_67 : i32 to vector<32x16xi32>
    %99 = arith.cmpi sge, %97, %98 : vector<32x16xi32>
    %c-1_i32_68 = arith.constant -1 : i32
    %100 = vector.broadcast %c-1_i32_68 : i32 to vector<32x16xi32>
    %101 = arith.addi %95, %100 : vector<32x16xi32>
    %c16_i32_69 = arith.constant 16 : i32
    %102 = vector.broadcast %c16_i32_69 : i32 to vector<32x16xi32>
    %103 = arith.cmpi slt, %101, %102 : vector<32x16xi32>
    %104 = arith.andi %99, %103 : vector<32x16xi1>
    %cst_70 = arith.constant 0.000000e+00 : f32
    %105 = vector.broadcast %cst_70 : f32 to vector<32x16xf32>
    %106 = arith.select %104, %94, %105 : vector<32x16xi1>, vector<32x16xf32>
    %107 = vector.extract_strided_slice %91 {offsets = [0, 1], sizes = [32, 15], strides = [1, 1]} : vector<32x16xf32> to vector<32x15xf32>
    %108 = vector.extract_strided_slice %91 {offsets = [0, 0], sizes = [32, 1], strides = [1, 1]} : vector<32x16xf32> to vector<32x1xf32>
    %109 = tpu.concatenate %107, %108 in 1 : vector<32x15xf32>, vector<32x1xf32> -> vector<32x16xf32>
    %110 = tpu.iota {dimensions = array<i32: 1>} : vector<32x16xi32>
    %c1_i32_71 = arith.constant 1 : i32
    %111 = vector.broadcast %c1_i32_71 : i32 to vector<32x16xi32>
    %112 = arith.addi %110, %111 : vector<32x16xi32>
    %c0_i32_72 = arith.constant 0 : i32
    %113 = vector.broadcast %c0_i32_72 : i32 to vector<32x16xi32>
    %114 = arith.cmpi sge, %112, %113 : vector<32x16xi32>
    %c1_i32_73 = arith.constant 1 : i32
    %115 = vector.broadcast %c1_i32_73 : i32 to vector<32x16xi32>
    %116 = arith.addi %110, %115 : vector<32x16xi32>
    %c16_i32_74 = arith.constant 16 : i32
    %117 = vector.broadcast %c16_i32_74 : i32 to vector<32x16xi32>
    %118 = arith.cmpi slt, %116, %117 : vector<32x16xi32>
    %119 = arith.andi %114, %118 : vector<32x16xi1>
    %cst_75 = arith.constant 0.000000e+00 : f32
    %120 = vector.broadcast %cst_75 : f32 to vector<32x16xf32>
    %121 = arith.select %119, %109, %120 : vector<32x16xi1>, vector<32x16xf32>
    %122 = tpu.concatenate %106, %91, %121 in 0 : vector<32x16xf32>, vector<32x16xf32>, vector<32x16xf32> -> vector<96x16xf32>
    %cst_76 = arith.constant dense<0.000000e+00> : vector<32x16xf32>
    %123 = tpu.matmul %12, %122, %cst_76 {dimension_numbers = #tpu.dot_dimension_numbers<[1], [0], [0], [1], [0, 0, 1, 1], [], []>} : vector<32x96xf32>, vector<96x16xf32>, vector<32x16xf32> -> vector<32x16xf32>
    %124 = vector.broadcast %13 : vector<32x1xf32> to vector<32x16xf32>
    %125 = arith.addf %123, %124 : vector<32x16xf32>
    %cst_77 = arith.constant 0.000000e+00 : f32
    %126 = vector.broadcast %cst_77 : f32 to vector<32x16xf32>
    %127 = arith.maximumf %125, %126 : vector<32x16xf32>
    %cst_78 = arith.constant dense<0.000000e+00> : vector<16xf32>
    %128 = vector.multi_reduction <add>, %127, %cst_78 [0] : vector<32x16xf32> to vector<16xf32>
    %129 = vector.shape_cast %128 : vector<16xf32> to vector<1x16xf32>
    %130 = arith.mulf %127, %127 : vector<32x16xf32>
    %cst_79 = arith.constant dense<0.000000e+00> : vector<16xf32>
    %131 = vector.multi_reduction <add>, %130, %cst_79 [0] : vector<32x16xf32> to vector<16xf32>
    %132 = vector.shape_cast %131 : vector<16xf32> to vector<1x16xf32>
    %cst_80 = arith.constant 3.200000e+01 : f32
    %133 = vector.broadcast %cst_80 : f32 to vector<1x16xf32>
    %134 = arith.divf %129, %133 : vector<1x16xf32>
    %cst_81 = arith.constant 3.200000e+01 : f32
    %135 = vector.broadcast %cst_81 : f32 to vector<1x16xf32>
    %136 = arith.divf %132, %135 : vector<1x16xf32>
    %137 = arith.mulf %134, %134 : vector<1x16xf32>
    %138 = arith.subf %136, %137 : vector<1x16xf32>
    %cst_82 = arith.constant 0.000000e+00 : f32
    %139 = vector.broadcast %cst_82 : f32 to vector<1x16xf32>
    %140 = arith.maximumf %138, %139 : vector<1x16xf32>
    %141 = vector.broadcast %134 : vector<1x16xf32> to vector<32x16xf32>
    %142 = arith.subf %127, %141 : vector<32x16xf32>
    %cst_83 = arith.constant 9.99999974E-6 : f32
    %143 = vector.broadcast %cst_83 : f32 to vector<1x16xf32>
    %144 = arith.addf %140, %143 : vector<1x16xf32>
    %145 = math.rsqrt %144 : vector<1x16xf32>
    %146 = vector.broadcast %145 : vector<1x16xf32> to vector<32x16xf32>
    %147 = arith.mulf %142, %146 : vector<32x16xf32>
    %148 = vector.broadcast %14 : vector<32x1xf32> to vector<32x16xf32>
    %149 = arith.mulf %147, %148 : vector<32x16xf32>
    %150 = vector.broadcast %15 : vector<32x1xf32> to vector<32x16xf32>
    %151 = arith.addf %149, %150 : vector<32x16xf32>
    %152 = vector.broadcast %3 : vector<1x16xf32> to vector<32x16xf32>
    %153 = arith.mulf %151, %152 : vector<32x16xf32>
    %154 = vector.extract_strided_slice %153 {offsets = [0, 15], sizes = [32, 1], strides = [1, 1]} : vector<32x16xf32> to vector<32x1xf32>
    %155 = vector.extract_strided_slice %153 {offsets = [0, 0], sizes = [32, 15], strides = [1, 1]} : vector<32x16xf32> to vector<32x15xf32>
    %156 = tpu.concatenate %154, %155 in 1 : vector<32x1xf32>, vector<32x15xf32> -> vector<32x16xf32>
    %157 = tpu.iota {dimensions = array<i32: 1>} : vector<32x16xi32>
    %c-1_i32_84 = arith.constant -1 : i32
    %158 = vector.broadcast %c-1_i32_84 : i32 to vector<32x16xi32>
    %159 = arith.addi %157, %158 : vector<32x16xi32>
    %c0_i32_85 = arith.constant 0 : i32
    %160 = vector.broadcast %c0_i32_85 : i32 to vector<32x16xi32>
    %161 = arith.cmpi sge, %159, %160 : vector<32x16xi32>
    %c-1_i32_86 = arith.constant -1 : i32
    %162 = vector.broadcast %c-1_i32_86 : i32 to vector<32x16xi32>
    %163 = arith.addi %157, %162 : vector<32x16xi32>
    %c16_i32_87 = arith.constant 16 : i32
    %164 = vector.broadcast %c16_i32_87 : i32 to vector<32x16xi32>
    %165 = arith.cmpi slt, %163, %164 : vector<32x16xi32>
    %166 = arith.andi %161, %165 : vector<32x16xi1>
    %cst_88 = arith.constant 0.000000e+00 : f32
    %167 = vector.broadcast %cst_88 : f32 to vector<32x16xf32>
    %168 = arith.select %166, %156, %167 : vector<32x16xi1>, vector<32x16xf32>
    %169 = vector.extract_strided_slice %153 {offsets = [0, 1], sizes = [32, 15], strides = [1, 1]} : vector<32x16xf32> to vector<32x15xf32>
    %170 = vector.extract_strided_slice %153 {offsets = [0, 0], sizes = [32, 1], strides = [1, 1]} : vector<32x16xf32> to vector<32x1xf32>
    %171 = tpu.concatenate %169, %170 in 1 : vector<32x15xf32>, vector<32x1xf32> -> vector<32x16xf32>
    %172 = tpu.iota {dimensions = array<i32: 1>} : vector<32x16xi32>
    %c1_i32_89 = arith.constant 1 : i32
    %173 = vector.broadcast %c1_i32_89 : i32 to vector<32x16xi32>
    %174 = arith.addi %172, %173 : vector<32x16xi32>
    %c0_i32_90 = arith.constant 0 : i32
    %175 = vector.broadcast %c0_i32_90 : i32 to vector<32x16xi32>
    %176 = arith.cmpi sge, %174, %175 : vector<32x16xi32>
    %c1_i32_91 = arith.constant 1 : i32
    %177 = vector.broadcast %c1_i32_91 : i32 to vector<32x16xi32>
    %178 = arith.addi %172, %177 : vector<32x16xi32>
    %c16_i32_92 = arith.constant 16 : i32
    %179 = vector.broadcast %c16_i32_92 : i32 to vector<32x16xi32>
    %180 = arith.cmpi slt, %178, %179 : vector<32x16xi32>
    %181 = arith.andi %176, %180 : vector<32x16xi1>
    %cst_93 = arith.constant 0.000000e+00 : f32
    %182 = vector.broadcast %cst_93 : f32 to vector<32x16xf32>
    %183 = arith.select %181, %171, %182 : vector<32x16xi1>, vector<32x16xf32>
    %184 = tpu.concatenate %168, %153, %183 in 0 : vector<32x16xf32>, vector<32x16xf32>, vector<32x16xf32> -> vector<96x16xf32>
    %cst_94 = arith.constant dense<0.000000e+00> : vector<32x16xf32>
    %185 = tpu.matmul %16, %184, %cst_94 {dimension_numbers = #tpu.dot_dimension_numbers<[1], [0], [0], [1], [0, 0, 1, 1], [], []>} : vector<32x96xf32>, vector<96x16xf32>, vector<32x16xf32> -> vector<32x16xf32>
    %186 = vector.broadcast %19 : vector<32x1xf32> to vector<32x16xf32>
    %187 = arith.addf %185, %186 : vector<32x16xf32>
    %188 = vector.extract_strided_slice %3 {offsets = [0, 15], sizes = [1, 1], strides = [1, 1]} : vector<1x16xf32> to vector<1x1xf32>
    %189 = vector.extract_strided_slice %3 {offsets = [0, 0], sizes = [1, 15], strides = [1, 1]} : vector<1x16xf32> to vector<1x15xf32>
    %190 = tpu.concatenate %188, %189 in 1 : vector<1x1xf32>, vector<1x15xf32> -> vector<1x16xf32>
    %191 = tpu.iota {dimensions = array<i32: 1>} : vector<1x16xi32>
    %c-1_i32_95 = arith.constant -1 : i32
    %192 = vector.broadcast %c-1_i32_95 : i32 to vector<1x16xi32>
    %193 = arith.addi %191, %192 : vector<1x16xi32>
    %c0_i32_96 = arith.constant 0 : i32
    %194 = vector.broadcast %c0_i32_96 : i32 to vector<1x16xi32>
    %195 = arith.cmpi sge, %193, %194 : vector<1x16xi32>
    %c-1_i32_97 = arith.constant -1 : i32
    %196 = vector.broadcast %c-1_i32_97 : i32 to vector<1x16xi32>
    %197 = arith.addi %191, %196 : vector<1x16xi32>
    %c16_i32_98 = arith.constant 16 : i32
    %198 = vector.broadcast %c16_i32_98 : i32 to vector<1x16xi32>
    %199 = arith.cmpi slt, %197, %198 : vector<1x16xi32>
    %200 = arith.andi %195, %199 : vector<1x16xi1>
    %cst_99 = arith.constant 0.000000e+00 : f32
    %201 = vector.broadcast %cst_99 : f32 to vector<1x16xf32>
    %202 = arith.select %200, %190, %201 : vector<1x16xi1>, vector<1x16xf32>
    %203 = vector.extract_strided_slice %3 {offsets = [0, 1], sizes = [1, 15], strides = [1, 1]} : vector<1x16xf32> to vector<1x15xf32>
    %204 = vector.extract_strided_slice %3 {offsets = [0, 0], sizes = [1, 1], strides = [1, 1]} : vector<1x16xf32> to vector<1x1xf32>
    %205 = tpu.concatenate %203, %204 in 1 : vector<1x15xf32>, vector<1x1xf32> -> vector<1x16xf32>
    %206 = tpu.iota {dimensions = array<i32: 1>} : vector<1x16xi32>
    %c1_i32_100 = arith.constant 1 : i32
    %207 = vector.broadcast %c1_i32_100 : i32 to vector<1x16xi32>
    %208 = arith.addi %206, %207 : vector<1x16xi32>
    %c0_i32_101 = arith.constant 0 : i32
    %209 = vector.broadcast %c0_i32_101 : i32 to vector<1x16xi32>
    %210 = arith.cmpi sge, %208, %209 : vector<1x16xi32>
    %c1_i32_102 = arith.constant 1 : i32
    %211 = vector.broadcast %c1_i32_102 : i32 to vector<1x16xi32>
    %212 = arith.addi %206, %211 : vector<1x16xi32>
    %c16_i32_103 = arith.constant 16 : i32
    %213 = vector.broadcast %c16_i32_103 : i32 to vector<1x16xi32>
    %214 = arith.cmpi slt, %212, %213 : vector<1x16xi32>
    %215 = arith.andi %210, %214 : vector<1x16xi1>
    %cst_104 = arith.constant 0.000000e+00 : f32
    %216 = vector.broadcast %cst_104 : f32 to vector<1x16xf32>
    %217 = arith.select %215, %205, %216 : vector<1x16xi1>, vector<1x16xf32>
    %218 = vector.extract_strided_slice %18 {offsets = [0, 0, 0], sizes = [1, 32, 1], strides = [1, 1, 1]} : vector<3x32x1xf32> to vector<1x32x1xf32>
    %219 = vector.shape_cast %218 : vector<1x32x1xf32> to vector<32x1xf32>
    %220 = vector.broadcast %219 : vector<32x1xf32> to vector<32x16xf32>
    %221 = vector.broadcast %202 : vector<1x16xf32> to vector<32x16xf32>
    %222 = arith.mulf %220, %221 : vector<32x16xf32>
    %223 = arith.addf %187, %222 : vector<32x16xf32>
    %224 = vector.extract_strided_slice %18 {offsets = [1, 0, 0], sizes = [1, 32, 1], strides = [1, 1, 1]} : vector<3x32x1xf32> to vector<1x32x1xf32>
    %225 = vector.shape_cast %224 : vector<1x32x1xf32> to vector<32x1xf32>
    %226 = vector.broadcast %225 : vector<32x1xf32> to vector<32x16xf32>
    %227 = vector.broadcast %3 : vector<1x16xf32> to vector<32x16xf32>
    %228 = arith.mulf %226, %227 : vector<32x16xf32>
    %229 = arith.addf %223, %228 : vector<32x16xf32>
    %230 = vector.extract_strided_slice %18 {offsets = [2, 0, 0], sizes = [1, 32, 1], strides = [1, 1, 1]} : vector<3x32x1xf32> to vector<1x32x1xf32>
    %231 = vector.shape_cast %230 : vector<1x32x1xf32> to vector<32x1xf32>
    %232 = vector.broadcast %231 : vector<32x1xf32> to vector<32x16xf32>
    %233 = vector.broadcast %217 : vector<1x16xf32> to vector<32x16xf32>
    %234 = arith.mulf %232, %233 : vector<32x16xf32>
    %235 = arith.addf %229, %234 : vector<32x16xf32>
    %236 = arith.mulf %5, %3 : vector<1x16xf32>
    %237 = vector.extract_strided_slice %17 {offsets = [0, 0, 0], sizes = [1, 32, 1], strides = [1, 1, 1]} : vector<3x32x1xf32> to vector<1x32x1xf32>
    %238 = vector.shape_cast %237 : vector<1x32x1xf32> to vector<32x1xf32>
    %239 = vector.extract_strided_slice %236 {offsets = [0, 15], sizes = [1, 1], strides = [1, 1]} : vector<1x16xf32> to vector<1x1xf32>
    %240 = vector.extract_strided_slice %236 {offsets = [0, 0], sizes = [1, 15], strides = [1, 1]} : vector<1x16xf32> to vector<1x15xf32>
    %241 = tpu.concatenate %239, %240 in 1 : vector<1x1xf32>, vector<1x15xf32> -> vector<1x16xf32>
    %242 = tpu.iota {dimensions = array<i32: 1>} : vector<1x16xi32>
    %c-1_i32_105 = arith.constant -1 : i32
    %243 = vector.broadcast %c-1_i32_105 : i32 to vector<1x16xi32>
    %244 = arith.addi %242, %243 : vector<1x16xi32>
    %c0_i32_106 = arith.constant 0 : i32
    %245 = vector.broadcast %c0_i32_106 : i32 to vector<1x16xi32>
    %246 = arith.cmpi sge, %244, %245 : vector<1x16xi32>
    %c-1_i32_107 = arith.constant -1 : i32
    %247 = vector.broadcast %c-1_i32_107 : i32 to vector<1x16xi32>
    %248 = arith.addi %242, %247 : vector<1x16xi32>
    %c16_i32_108 = arith.constant 16 : i32
    %249 = vector.broadcast %c16_i32_108 : i32 to vector<1x16xi32>
    %250 = arith.cmpi slt, %248, %249 : vector<1x16xi32>
    %251 = arith.andi %246, %250 : vector<1x16xi1>
    %cst_109 = arith.constant 0.000000e+00 : f32
    %252 = vector.broadcast %cst_109 : f32 to vector<1x16xf32>
    %253 = arith.select %251, %241, %252 : vector<1x16xi1>, vector<1x16xf32>
    %254 = vector.broadcast %238 : vector<32x1xf32> to vector<32x16xf32>
    %255 = vector.broadcast %253 : vector<1x16xf32> to vector<32x16xf32>
    %256 = arith.mulf %254, %255 : vector<32x16xf32>
    %257 = arith.addf %235, %256 : vector<32x16xf32>
    %258 = vector.extract_strided_slice %17 {offsets = [1, 0, 0], sizes = [1, 32, 1], strides = [1, 1, 1]} : vector<3x32x1xf32> to vector<1x32x1xf32>
    %259 = vector.shape_cast %258 : vector<1x32x1xf32> to vector<32x1xf32>
    %260 = vector.broadcast %259 : vector<32x1xf32> to vector<32x16xf32>
    %261 = vector.broadcast %236 : vector<1x16xf32> to vector<32x16xf32>
    %262 = arith.mulf %260, %261 : vector<32x16xf32>
    %263 = arith.addf %257, %262 : vector<32x16xf32>
    %264 = vector.extract_strided_slice %17 {offsets = [2, 0, 0], sizes = [1, 32, 1], strides = [1, 1, 1]} : vector<3x32x1xf32> to vector<1x32x1xf32>
    %265 = vector.shape_cast %264 : vector<1x32x1xf32> to vector<32x1xf32>
    %266 = vector.extract_strided_slice %236 {offsets = [0, 1], sizes = [1, 15], strides = [1, 1]} : vector<1x16xf32> to vector<1x15xf32>
    %267 = vector.extract_strided_slice %236 {offsets = [0, 0], sizes = [1, 1], strides = [1, 1]} : vector<1x16xf32> to vector<1x1xf32>
    %268 = tpu.concatenate %266, %267 in 1 : vector<1x15xf32>, vector<1x1xf32> -> vector<1x16xf32>
    %269 = tpu.iota {dimensions = array<i32: 1>} : vector<1x16xi32>
    %c1_i32_110 = arith.constant 1 : i32
    %270 = vector.broadcast %c1_i32_110 : i32 to vector<1x16xi32>
    %271 = arith.addi %269, %270 : vector<1x16xi32>
    %c0_i32_111 = arith.constant 0 : i32
    %272 = vector.broadcast %c0_i32_111 : i32 to vector<1x16xi32>
    %273 = arith.cmpi sge, %271, %272 : vector<1x16xi32>
    %c1_i32_112 = arith.constant 1 : i32
    %274 = vector.broadcast %c1_i32_112 : i32 to vector<1x16xi32>
    %275 = arith.addi %269, %274 : vector<1x16xi32>
    %c16_i32_113 = arith.constant 16 : i32
    %276 = vector.broadcast %c16_i32_113 : i32 to vector<1x16xi32>
    %277 = arith.cmpi slt, %275, %276 : vector<1x16xi32>
    %278 = arith.andi %273, %277 : vector<1x16xi1>
    %cst_114 = arith.constant 0.000000e+00 : f32
    %279 = vector.broadcast %cst_114 : f32 to vector<1x16xf32>
    %280 = arith.select %278, %268, %279 : vector<1x16xi1>, vector<1x16xf32>
    %281 = vector.broadcast %265 : vector<32x1xf32> to vector<32x16xf32>
    %282 = vector.broadcast %280 : vector<1x16xf32> to vector<32x16xf32>
    %283 = arith.mulf %281, %282 : vector<32x16xf32>
    %284 = arith.addf %263, %283 : vector<32x16xf32>
    %cst_115 = arith.constant 0.000000e+00 : f32
    %285 = vector.broadcast %cst_115 : f32 to vector<32x16xf32>
    %286 = arith.maximumf %284, %285 : vector<32x16xf32>
    %cst_116 = arith.constant dense<0.000000e+00> : vector<16xf32>
    %287 = vector.multi_reduction <add>, %286, %cst_116 [0] : vector<32x16xf32> to vector<16xf32>
    %288 = vector.shape_cast %287 : vector<16xf32> to vector<1x16xf32>
    %289 = arith.mulf %286, %286 : vector<32x16xf32>
    %cst_117 = arith.constant dense<0.000000e+00> : vector<16xf32>
    %290 = vector.multi_reduction <add>, %289, %cst_117 [0] : vector<32x16xf32> to vector<16xf32>
    %291 = vector.shape_cast %290 : vector<16xf32> to vector<1x16xf32>
    %cst_118 = arith.constant 3.200000e+01 : f32
    %292 = vector.broadcast %cst_118 : f32 to vector<1x16xf32>
    %293 = arith.divf %288, %292 : vector<1x16xf32>
    %cst_119 = arith.constant 3.200000e+01 : f32
    %294 = vector.broadcast %cst_119 : f32 to vector<1x16xf32>
    %295 = arith.divf %291, %294 : vector<1x16xf32>
    %296 = arith.mulf %293, %293 : vector<1x16xf32>
    %297 = arith.subf %295, %296 : vector<1x16xf32>
    %cst_120 = arith.constant 0.000000e+00 : f32
    %298 = vector.broadcast %cst_120 : f32 to vector<1x16xf32>
    %299 = arith.maximumf %297, %298 : vector<1x16xf32>
    %300 = vector.broadcast %293 : vector<1x16xf32> to vector<32x16xf32>
    %301 = arith.subf %286, %300 : vector<32x16xf32>
    %cst_121 = arith.constant 9.99999974E-6 : f32
    %302 = vector.broadcast %cst_121 : f32 to vector<1x16xf32>
    %303 = arith.addf %299, %302 : vector<1x16xf32>
    %304 = math.rsqrt %303 : vector<1x16xf32>
    %305 = vector.broadcast %304 : vector<1x16xf32> to vector<32x16xf32>
    %306 = arith.mulf %301, %305 : vector<32x16xf32>
    %307 = vector.broadcast %20 : vector<32x1xf32> to vector<32x16xf32>
    %308 = arith.mulf %306, %307 : vector<32x16xf32>
    %309 = vector.broadcast %21 : vector<32x1xf32> to vector<32x16xf32>
    %310 = arith.addf %308, %309 : vector<32x16xf32>
    %311 = vector.broadcast %3 : vector<1x16xf32> to vector<32x16xf32>
    %312 = arith.mulf %310, %311 : vector<32x16xf32>
    %313 = vector.extract_strided_slice %312 {offsets = [0, 15], sizes = [32, 1], strides = [1, 1]} : vector<32x16xf32> to vector<32x1xf32>
    %314 = vector.extract_strided_slice %312 {offsets = [0, 0], sizes = [32, 15], strides = [1, 1]} : vector<32x16xf32> to vector<32x15xf32>
    %315 = tpu.concatenate %313, %314 in 1 : vector<32x1xf32>, vector<32x15xf32> -> vector<32x16xf32>
    %316 = tpu.iota {dimensions = array<i32: 1>} : vector<32x16xi32>
    %c-1_i32_122 = arith.constant -1 : i32
    %317 = vector.broadcast %c-1_i32_122 : i32 to vector<32x16xi32>
    %318 = arith.addi %316, %317 : vector<32x16xi32>
    %c0_i32_123 = arith.constant 0 : i32
    %319 = vector.broadcast %c0_i32_123 : i32 to vector<32x16xi32>
    %320 = arith.cmpi sge, %318, %319 : vector<32x16xi32>
    %c-1_i32_124 = arith.constant -1 : i32
    %321 = vector.broadcast %c-1_i32_124 : i32 to vector<32x16xi32>
    %322 = arith.addi %316, %321 : vector<32x16xi32>
    %c16_i32_125 = arith.constant 16 : i32
    %323 = vector.broadcast %c16_i32_125 : i32 to vector<32x16xi32>
    %324 = arith.cmpi slt, %322, %323 : vector<32x16xi32>
    %325 = arith.andi %320, %324 : vector<32x16xi1>
    %cst_126 = arith.constant 0.000000e+00 : f32
    %326 = vector.broadcast %cst_126 : f32 to vector<32x16xf32>
    %327 = arith.select %325, %315, %326 : vector<32x16xi1>, vector<32x16xf32>
    %328 = vector.extract_strided_slice %312 {offsets = [0, 1], sizes = [32, 15], strides = [1, 1]} : vector<32x16xf32> to vector<32x15xf32>
    %329 = vector.extract_strided_slice %312 {offsets = [0, 0], sizes = [32, 1], strides = [1, 1]} : vector<32x16xf32> to vector<32x1xf32>
    %330 = tpu.concatenate %328, %329 in 1 : vector<32x15xf32>, vector<32x1xf32> -> vector<32x16xf32>
    %331 = tpu.iota {dimensions = array<i32: 1>} : vector<32x16xi32>
    %c1_i32_127 = arith.constant 1 : i32
    %332 = vector.broadcast %c1_i32_127 : i32 to vector<32x16xi32>
    %333 = arith.addi %331, %332 : vector<32x16xi32>
    %c0_i32_128 = arith.constant 0 : i32
    %334 = vector.broadcast %c0_i32_128 : i32 to vector<32x16xi32>
    %335 = arith.cmpi sge, %333, %334 : vector<32x16xi32>
    %c1_i32_129 = arith.constant 1 : i32
    %336 = vector.broadcast %c1_i32_129 : i32 to vector<32x16xi32>
    %337 = arith.addi %331, %336 : vector<32x16xi32>
    %c16_i32_130 = arith.constant 16 : i32
    %338 = vector.broadcast %c16_i32_130 : i32 to vector<32x16xi32>
    %339 = arith.cmpi slt, %337, %338 : vector<32x16xi32>
    %340 = arith.andi %335, %339 : vector<32x16xi1>
    %cst_131 = arith.constant 0.000000e+00 : f32
    %341 = vector.broadcast %cst_131 : f32 to vector<32x16xf32>
    %342 = arith.select %340, %330, %341 : vector<32x16xi1>, vector<32x16xf32>
    %343 = tpu.concatenate %327, %312, %342 in 0 : vector<32x16xf32>, vector<32x16xf32>, vector<32x16xf32> -> vector<96x16xf32>
    %cst_132 = arith.constant dense<0.000000e+00> : vector<32x16xf32>
    %344 = tpu.matmul %22, %343, %cst_132 {dimension_numbers = #tpu.dot_dimension_numbers<[1], [0], [0], [1], [0, 0, 1, 1], [], []>} : vector<32x96xf32>, vector<96x16xf32>, vector<32x16xf32> -> vector<32x16xf32>
    %345 = vector.broadcast %23 : vector<32x1xf32> to vector<32x16xf32>
    %346 = arith.addf %344, %345 : vector<32x16xf32>
    %cst_133 = arith.constant 0.000000e+00 : f32
    %347 = vector.broadcast %cst_133 : f32 to vector<32x16xf32>
    %348 = arith.maximumf %346, %347 : vector<32x16xf32>
    %cst_134 = arith.constant dense<0.000000e+00> : vector<16xf32>
    %349 = vector.multi_reduction <add>, %348, %cst_134 [0] : vector<32x16xf32> to vector<16xf32>
    %350 = vector.shape_cast %349 : vector<16xf32> to vector<1x16xf32>
    %351 = arith.mulf %348, %348 : vector<32x16xf32>
    %cst_135 = arith.constant dense<0.000000e+00> : vector<16xf32>
    %352 = vector.multi_reduction <add>, %351, %cst_135 [0] : vector<32x16xf32> to vector<16xf32>
    %353 = vector.shape_cast %352 : vector<16xf32> to vector<1x16xf32>
    %cst_136 = arith.constant 3.200000e+01 : f32
    %354 = vector.broadcast %cst_136 : f32 to vector<1x16xf32>
    %355 = arith.divf %350, %354 : vector<1x16xf32>
    %cst_137 = arith.constant 3.200000e+01 : f32
    %356 = vector.broadcast %cst_137 : f32 to vector<1x16xf32>
    %357 = arith.divf %353, %356 : vector<1x16xf32>
    %358 = arith.mulf %355, %355 : vector<1x16xf32>
    %359 = arith.subf %357, %358 : vector<1x16xf32>
    %cst_138 = arith.constant 0.000000e+00 : f32
    %360 = vector.broadcast %cst_138 : f32 to vector<1x16xf32>
    %361 = arith.maximumf %359, %360 : vector<1x16xf32>
    %362 = vector.broadcast %355 : vector<1x16xf32> to vector<32x16xf32>
    %363 = arith.subf %348, %362 : vector<32x16xf32>
    %cst_139 = arith.constant 9.99999974E-6 : f32
    %364 = vector.broadcast %cst_139 : f32 to vector<1x16xf32>
    %365 = arith.addf %361, %364 : vector<1x16xf32>
    %366 = math.rsqrt %365 : vector<1x16xf32>
    %367 = vector.broadcast %366 : vector<1x16xf32> to vector<32x16xf32>
    %368 = arith.mulf %363, %367 : vector<32x16xf32>
    %369 = vector.broadcast %24 : vector<32x1xf32> to vector<32x16xf32>
    %370 = arith.mulf %368, %369 : vector<32x16xf32>
    %371 = vector.broadcast %25 : vector<32x1xf32> to vector<32x16xf32>
    %372 = arith.addf %370, %371 : vector<32x16xf32>
    %373 = vector.broadcast %3 : vector<1x16xf32> to vector<32x16xf32>
    %374 = arith.mulf %372, %373 : vector<32x16xf32>
    %375 = vector.broadcast %26 : vector<32x1xf32> to vector<32x16xf32>
    %376 = arith.mulf %374, %375 : vector<32x16xf32>
    %cst_140 = arith.constant dense<0.000000e+00> : vector<16xf32>
    %377 = vector.multi_reduction <add>, %376, %cst_140 [0] : vector<32x16xf32> to vector<16xf32>
    %378 = vector.shape_cast %377 : vector<16xf32> to vector<1x16xf32>
    %379 = vector.broadcast %27 : vector<1x1xf32> to vector<1x16xf32>
    %380 = arith.addf %378, %379 : vector<1x16xf32>
    %381 = arith.negf %380 : vector<1x16xf32>
    %382 = math.exp %381 : vector<1x16xf32>
    %cst_141 = arith.constant 1.000000e+00 : f32
    %383 = vector.broadcast %cst_141 : f32 to vector<1x16xf32>
    %384 = arith.addf %383, %382 : vector<1x16xf32>
    %385 = arith.divf %383, %384 : vector<1x16xf32>
    %386 = arith.mulf %7, %3 : vector<1x16xf32>
    %387 = vector.extract_strided_slice %17 {offsets = [0, 0, 0], sizes = [1, 32, 1], strides = [1, 1, 1]} : vector<3x32x1xf32> to vector<1x32x1xf32>
    %388 = vector.shape_cast %387 : vector<1x32x1xf32> to vector<32x1xf32>
    %389 = vector.extract_strided_slice %386 {offsets = [0, 15], sizes = [1, 1], strides = [1, 1]} : vector<1x16xf32> to vector<1x1xf32>
    %390 = vector.extract_strided_slice %386 {offsets = [0, 0], sizes = [1, 15], strides = [1, 1]} : vector<1x16xf32> to vector<1x15xf32>
    %391 = tpu.concatenate %389, %390 in 1 : vector<1x1xf32>, vector<1x15xf32> -> vector<1x16xf32>
    %392 = tpu.iota {dimensions = array<i32: 1>} : vector<1x16xi32>
    %c-1_i32_142 = arith.constant -1 : i32
    %393 = vector.broadcast %c-1_i32_142 : i32 to vector<1x16xi32>
    %394 = arith.addi %392, %393 : vector<1x16xi32>
    %c0_i32_143 = arith.constant 0 : i32
    %395 = vector.broadcast %c0_i32_143 : i32 to vector<1x16xi32>
    %396 = arith.cmpi sge, %394, %395 : vector<1x16xi32>
    %c-1_i32_144 = arith.constant -1 : i32
    %397 = vector.broadcast %c-1_i32_144 : i32 to vector<1x16xi32>
    %398 = arith.addi %392, %397 : vector<1x16xi32>
    %c16_i32_145 = arith.constant 16 : i32
    %399 = vector.broadcast %c16_i32_145 : i32 to vector<1x16xi32>
    %400 = arith.cmpi slt, %398, %399 : vector<1x16xi32>
    %401 = arith.andi %396, %400 : vector<1x16xi1>
    %cst_146 = arith.constant 0.000000e+00 : f32
    %402 = vector.broadcast %cst_146 : f32 to vector<1x16xf32>
    %403 = arith.select %401, %391, %402 : vector<1x16xi1>, vector<1x16xf32>
    %404 = vector.broadcast %388 : vector<32x1xf32> to vector<32x16xf32>
    %405 = vector.broadcast %403 : vector<1x16xf32> to vector<32x16xf32>
    %406 = arith.mulf %404, %405 : vector<32x16xf32>
    %407 = arith.addf %235, %406 : vector<32x16xf32>
    %408 = vector.extract_strided_slice %17 {offsets = [1, 0, 0], sizes = [1, 32, 1], strides = [1, 1, 1]} : vector<3x32x1xf32> to vector<1x32x1xf32>
    %409 = vector.shape_cast %408 : vector<1x32x1xf32> to vector<32x1xf32>
    %410 = vector.broadcast %409 : vector<32x1xf32> to vector<32x16xf32>
    %411 = vector.broadcast %386 : vector<1x16xf32> to vector<32x16xf32>
    %412 = arith.mulf %410, %411 : vector<32x16xf32>
    %413 = arith.addf %407, %412 : vector<32x16xf32>
    %414 = vector.extract_strided_slice %17 {offsets = [2, 0, 0], sizes = [1, 32, 1], strides = [1, 1, 1]} : vector<3x32x1xf32> to vector<1x32x1xf32>
    %415 = vector.shape_cast %414 : vector<1x32x1xf32> to vector<32x1xf32>
    %416 = vector.extract_strided_slice %386 {offsets = [0, 1], sizes = [1, 15], strides = [1, 1]} : vector<1x16xf32> to vector<1x15xf32>
    %417 = vector.extract_strided_slice %386 {offsets = [0, 0], sizes = [1, 1], strides = [1, 1]} : vector<1x16xf32> to vector<1x1xf32>
    %418 = tpu.concatenate %416, %417 in 1 : vector<1x15xf32>, vector<1x1xf32> -> vector<1x16xf32>
    %419 = tpu.iota {dimensions = array<i32: 1>} : vector<1x16xi32>
    %c1_i32_147 = arith.constant 1 : i32
    %420 = vector.broadcast %c1_i32_147 : i32 to vector<1x16xi32>
    %421 = arith.addi %419, %420 : vector<1x16xi32>
    %c0_i32_148 = arith.constant 0 : i32
    %422 = vector.broadcast %c0_i32_148 : i32 to vector<1x16xi32>
    %423 = arith.cmpi sge, %421, %422 : vector<1x16xi32>
    %c1_i32_149 = arith.constant 1 : i32
    %424 = vector.broadcast %c1_i32_149 : i32 to vector<1x16xi32>
    %425 = arith.addi %419, %424 : vector<1x16xi32>
    %c16_i32_150 = arith.constant 16 : i32
    %426 = vector.broadcast %c16_i32_150 : i32 to vector<1x16xi32>
    %427 = arith.cmpi slt, %425, %426 : vector<1x16xi32>
    %428 = arith.andi %423, %427 : vector<1x16xi1>
    %cst_151 = arith.constant 0.000000e+00 : f32
    %429 = vector.broadcast %cst_151 : f32 to vector<1x16xf32>
    %430 = arith.select %428, %418, %429 : vector<1x16xi1>, vector<1x16xf32>
    %431 = vector.broadcast %415 : vector<32x1xf32> to vector<32x16xf32>
    %432 = vector.broadcast %430 : vector<1x16xf32> to vector<32x16xf32>
    %433 = arith.mulf %431, %432 : vector<32x16xf32>
    %434 = arith.addf %413, %433 : vector<32x16xf32>
    %cst_152 = arith.constant 0.000000e+00 : f32
    %435 = vector.broadcast %cst_152 : f32 to vector<32x16xf32>
    %436 = arith.maximumf %434, %435 : vector<32x16xf32>
    %cst_153 = arith.constant dense<0.000000e+00> : vector<16xf32>
    %437 = vector.multi_reduction <add>, %436, %cst_153 [0] : vector<32x16xf32> to vector<16xf32>
    %438 = vector.shape_cast %437 : vector<16xf32> to vector<1x16xf32>
    %439 = arith.mulf %436, %436 : vector<32x16xf32>
    %cst_154 = arith.constant dense<0.000000e+00> : vector<16xf32>
    %440 = vector.multi_reduction <add>, %439, %cst_154 [0] : vector<32x16xf32> to vector<16xf32>
    %441 = vector.shape_cast %440 : vector<16xf32> to vector<1x16xf32>
    %cst_155 = arith.constant 3.200000e+01 : f32
    %442 = vector.broadcast %cst_155 : f32 to vector<1x16xf32>
    %443 = arith.divf %438, %442 : vector<1x16xf32>
    %cst_156 = arith.constant 3.200000e+01 : f32
    %444 = vector.broadcast %cst_156 : f32 to vector<1x16xf32>
    %445 = arith.divf %441, %444 : vector<1x16xf32>
    %446 = arith.mulf %443, %443 : vector<1x16xf32>
    %447 = arith.subf %445, %446 : vector<1x16xf32>
    %cst_157 = arith.constant 0.000000e+00 : f32
    %448 = vector.broadcast %cst_157 : f32 to vector<1x16xf32>
    %449 = arith.maximumf %447, %448 : vector<1x16xf32>
    %450 = vector.broadcast %443 : vector<1x16xf32> to vector<32x16xf32>
    %451 = arith.subf %436, %450 : vector<32x16xf32>
    %cst_158 = arith.constant 9.99999974E-6 : f32
    %452 = vector.broadcast %cst_158 : f32 to vector<1x16xf32>
    %453 = arith.addf %449, %452 : vector<1x16xf32>
    %454 = math.rsqrt %453 : vector<1x16xf32>
    %455 = vector.broadcast %454 : vector<1x16xf32> to vector<32x16xf32>
    %456 = arith.mulf %451, %455 : vector<32x16xf32>
    %457 = vector.broadcast %20 : vector<32x1xf32> to vector<32x16xf32>
    %458 = arith.mulf %456, %457 : vector<32x16xf32>
    %459 = vector.broadcast %21 : vector<32x1xf32> to vector<32x16xf32>
    %460 = arith.addf %458, %459 : vector<32x16xf32>
    %461 = vector.broadcast %3 : vector<1x16xf32> to vector<32x16xf32>
    %462 = arith.mulf %460, %461 : vector<32x16xf32>
    %463 = vector.extract_strided_slice %462 {offsets = [0, 15], sizes = [32, 1], strides = [1, 1]} : vector<32x16xf32> to vector<32x1xf32>
    %464 = vector.extract_strided_slice %462 {offsets = [0, 0], sizes = [32, 15], strides = [1, 1]} : vector<32x16xf32> to vector<32x15xf32>
    %465 = tpu.concatenate %463, %464 in 1 : vector<32x1xf32>, vector<32x15xf32> -> vector<32x16xf32>
    %466 = tpu.iota {dimensions = array<i32: 1>} : vector<32x16xi32>
    %c-1_i32_159 = arith.constant -1 : i32
    %467 = vector.broadcast %c-1_i32_159 : i32 to vector<32x16xi32>
    %468 = arith.addi %466, %467 : vector<32x16xi32>
    %c0_i32_160 = arith.constant 0 : i32
    %469 = vector.broadcast %c0_i32_160 : i32 to vector<32x16xi32>
    %470 = arith.cmpi sge, %468, %469 : vector<32x16xi32>
    %c-1_i32_161 = arith.constant -1 : i32
    %471 = vector.broadcast %c-1_i32_161 : i32 to vector<32x16xi32>
    %472 = arith.addi %466, %471 : vector<32x16xi32>
    %c16_i32_162 = arith.constant 16 : i32
    %473 = vector.broadcast %c16_i32_162 : i32 to vector<32x16xi32>
    %474 = arith.cmpi slt, %472, %473 : vector<32x16xi32>
    %475 = arith.andi %470, %474 : vector<32x16xi1>
    %cst_163 = arith.constant 0.000000e+00 : f32
    %476 = vector.broadcast %cst_163 : f32 to vector<32x16xf32>
    %477 = arith.select %475, %465, %476 : vector<32x16xi1>, vector<32x16xf32>
    %478 = vector.extract_strided_slice %462 {offsets = [0, 1], sizes = [32, 15], strides = [1, 1]} : vector<32x16xf32> to vector<32x15xf32>
    %479 = vector.extract_strided_slice %462 {offsets = [0, 0], sizes = [32, 1], strides = [1, 1]} : vector<32x16xf32> to vector<32x1xf32>
    %480 = tpu.concatenate %478, %479 in 1 : vector<32x15xf32>, vector<32x1xf32> -> vector<32x16xf32>
    %481 = tpu.iota {dimensions = array<i32: 1>} : vector<32x16xi32>
    %c1_i32_164 = arith.constant 1 : i32
    %482 = vector.broadcast %c1_i32_164 : i32 to vector<32x16xi32>
    %483 = arith.addi %481, %482 : vector<32x16xi32>
    %c0_i32_165 = arith.constant 0 : i32
    %484 = vector.broadcast %c0_i32_165 : i32 to vector<32x16xi32>
    %485 = arith.cmpi sge, %483, %484 : vector<32x16xi32>
    %c1_i32_166 = arith.constant 1 : i32
    %486 = vector.broadcast %c1_i32_166 : i32 to vector<32x16xi32>
    %487 = arith.addi %481, %486 : vector<32x16xi32>
    %c16_i32_167 = arith.constant 16 : i32
    %488 = vector.broadcast %c16_i32_167 : i32 to vector<32x16xi32>
    %489 = arith.cmpi slt, %487, %488 : vector<32x16xi32>
    %490 = arith.andi %485, %489 : vector<32x16xi1>
    %cst_168 = arith.constant 0.000000e+00 : f32
    %491 = vector.broadcast %cst_168 : f32 to vector<32x16xf32>
    %492 = arith.select %490, %480, %491 : vector<32x16xi1>, vector<32x16xf32>
    %493 = tpu.concatenate %477, %462, %492 in 0 : vector<32x16xf32>, vector<32x16xf32>, vector<32x16xf32> -> vector<96x16xf32>
    %cst_169 = arith.constant dense<0.000000e+00> : vector<32x16xf32>
    %494 = tpu.matmul %22, %493, %cst_169 {dimension_numbers = #tpu.dot_dimension_numbers<[1], [0], [0], [1], [0, 0, 1, 1], [], []>} : vector<32x96xf32>, vector<96x16xf32>, vector<32x16xf32> -> vector<32x16xf32>
    %495 = vector.broadcast %23 : vector<32x1xf32> to vector<32x16xf32>
    %496 = arith.addf %494, %495 : vector<32x16xf32>
    %cst_170 = arith.constant 0.000000e+00 : f32
    %497 = vector.broadcast %cst_170 : f32 to vector<32x16xf32>
    %498 = arith.maximumf %496, %497 : vector<32x16xf32>
    %cst_171 = arith.constant dense<0.000000e+00> : vector<16xf32>
    %499 = vector.multi_reduction <add>, %498, %cst_171 [0] : vector<32x16xf32> to vector<16xf32>
    %500 = vector.shape_cast %499 : vector<16xf32> to vector<1x16xf32>
    %501 = arith.mulf %498, %498 : vector<32x16xf32>
    %cst_172 = arith.constant dense<0.000000e+00> : vector<16xf32>
    %502 = vector.multi_reduction <add>, %501, %cst_172 [0] : vector<32x16xf32> to vector<16xf32>
    %503 = vector.shape_cast %502 : vector<16xf32> to vector<1x16xf32>
    %cst_173 = arith.constant 3.200000e+01 : f32
    %504 = vector.broadcast %cst_173 : f32 to vector<1x16xf32>
    %505 = arith.divf %500, %504 : vector<1x16xf32>
    %cst_174 = arith.constant 3.200000e+01 : f32
    %506 = vector.broadcast %cst_174 : f32 to vector<1x16xf32>
    %507 = arith.divf %503, %506 : vector<1x16xf32>
    %508 = arith.mulf %505, %505 : vector<1x16xf32>
    %509 = arith.subf %507, %508 : vector<1x16xf32>
    %cst_175 = arith.constant 0.000000e+00 : f32
    %510 = vector.broadcast %cst_175 : f32 to vector<1x16xf32>
    %511 = arith.maximumf %509, %510 : vector<1x16xf32>
    %512 = vector.broadcast %505 : vector<1x16xf32> to vector<32x16xf32>
    %513 = arith.subf %498, %512 : vector<32x16xf32>
    %cst_176 = arith.constant 9.99999974E-6 : f32
    %514 = vector.broadcast %cst_176 : f32 to vector<1x16xf32>
    %515 = arith.addf %511, %514 : vector<1x16xf32>
    %516 = math.rsqrt %515 : vector<1x16xf32>
    %517 = vector.broadcast %516 : vector<1x16xf32> to vector<32x16xf32>
    %518 = arith.mulf %513, %517 : vector<32x16xf32>
    %519 = vector.broadcast %24 : vector<32x1xf32> to vector<32x16xf32>
    %520 = arith.mulf %518, %519 : vector<32x16xf32>
    %521 = vector.broadcast %25 : vector<32x1xf32> to vector<32x16xf32>
    %522 = arith.addf %520, %521 : vector<32x16xf32>
    %523 = vector.broadcast %3 : vector<1x16xf32> to vector<32x16xf32>
    %524 = arith.mulf %522, %523 : vector<32x16xf32>
    %525 = vector.broadcast %26 : vector<32x1xf32> to vector<32x16xf32>
    %526 = arith.mulf %524, %525 : vector<32x16xf32>
    %cst_177 = arith.constant dense<0.000000e+00> : vector<16xf32>
    %527 = vector.multi_reduction <add>, %526, %cst_177 [0] : vector<32x16xf32> to vector<16xf32>
    %528 = vector.shape_cast %527 : vector<16xf32> to vector<1x16xf32>
    %529 = vector.broadcast %27 : vector<1x1xf32> to vector<1x16xf32>
    %530 = arith.addf %528, %529 : vector<1x16xf32>
    %531 = arith.negf %530 : vector<1x16xf32>
    %532 = math.exp %531 : vector<1x16xf32>
    %cst_178 = arith.constant 1.000000e+00 : f32
    %533 = vector.broadcast %cst_178 : f32 to vector<1x16xf32>
    %534 = arith.addf %533, %532 : vector<1x16xf32>
    %535 = arith.divf %533, %534 : vector<1x16xf32>
    %536 = tpu.concatenate %385, %535 in 0 : vector<1x16xf32>, vector<1x16xf32> -> vector<2x16xf32>
    %c0_179 = arith.constant 0 : index
    %c0_180 = arith.constant 0 : index
    %c0_181 = arith.constant 0 : index
    %537 = vector.load %arg25[%c0_179, %c0_180, %c0_181] : memref<1x2x16xf32, #tpu.memory_space<vmem>>, vector<1x2x16xf32>
    %538 = vector.shape_cast %537 : vector<1x2x16xf32> to vector<2x16xf32>
    %539 = vector.shape_cast %536 : vector<2x16xf32> to vector<1x2x16xf32>
    tpu.vector_store %arg25[%c0_179, %c0_180, %c0_181], %539 {strides = array<i32>} : memref<1x2x16xf32, #tpu.memory_space<vmem>>, vector<1x2x16xf32>,
    return
  }
  func.func @transform_0(%arg0: i32) -> (i32, i32, i32) {
    %c0_i32 = arith.constant 0 : i32
    %c0_i32_0 = arith.constant 0 : i32
    %c0_i32_1 = arith.constant 0 : i32
    return %arg0, %c0_i32, %c0_i32_0 : i32, i32, i32
  }
  func.func @transform_1(%arg0: i32) -> (i32, i32, i32) {
    %c0_i32 = arith.constant 0 : i32
    %c0_i32_0 = arith.constant 0 : i32
    %c0_i32_1 = arith.constant 0 : i32
    return %arg0, %c0_i32, %c0_i32_0 : i32, i32, i32
  }
  func.func @transform_2(%arg0: i32) -> (i32, i32, i32) {
    %c0_i32 = arith.constant 0 : i32
    %c0_i32_0 = arith.constant 0 : i32
    %c0_i32_1 = arith.constant 0 : i32
    return %arg0, %c0_i32, %c0_i32_0 : i32, i32, i32
  }
  func.func @transform_3(%arg0: i32) -> (i32, i32, i32) {
    %c0_i32 = arith.constant 0 : i32
    %c0_i32_0 = arith.constant 0 : i32
    %c0_i32_1 = arith.constant 0 : i32
    return %arg0, %c0_i32, %c0_i32_0 : i32, i32, i32
  }
  func.func @transform_4(%arg0: i32) -> (i32, i32) {
    %c0_i32 = arith.constant 0 : i32
    %c0_i32_0 = arith.constant 0 : i32
    %c0_i32_1 = arith.constant 0 : i32
    return %c0_i32, %c0_i32_0 : i32, i32
  }
  func.func @transform_5(%arg0: i32) -> (i32, i32) {
    %c0_i32 = arith.constant 0 : i32
    %c0_i32_0 = arith.constant 0 : i32
    %c0_i32_1 = arith.constant 0 : i32
    return %c0_i32, %c0_i32_0 : i32, i32
  }
  func.func @transform_6(%arg0: i32) -> (i32, i32) {
    %c0_i32 = arith.constant 0 : i32
    %c0_i32_0 = arith.constant 0 : i32
    %c0_i32_1 = arith.constant 0 : i32
    return %c0_i32, %c0_i32_0 : i32, i32
  }
  func.func @transform_7(%arg0: i32) -> (i32, i32) {
    %c0_i32 = arith.constant 0 : i32
    %c0_i32_0 = arith.constant 0 : i32
    %c0_i32_1 = arith.constant 0 : i32
    return %c0_i32, %c0_i32_0 : i32, i32
  }
  func.func @transform_8(%arg0: i32) -> (i32, i32) {
    %c0_i32 = arith.constant 0 : i32
    %c0_i32_0 = arith.constant 0 : i32
    %c0_i32_1 = arith.constant 0 : i32
    return %c0_i32, %c0_i32_0 : i32, i32
  }
  func.func @transform_9(%arg0: i32) -> (i32, i32) {
    %c0_i32 = arith.constant 0 : i32
    %c0_i32_0 = arith.constant 0 : i32
    %c0_i32_1 = arith.constant 0 : i32
    return %c0_i32, %c0_i32_0 : i32, i32
  }
  func.func @transform_10(%arg0: i32) -> (i32, i32) {
    %c0_i32 = arith.constant 0 : i32
    %c0_i32_0 = arith.constant 0 : i32
    %c0_i32_1 = arith.constant 0 : i32
    return %c0_i32, %c0_i32_0 : i32, i32
  }
  func.func @transform_11(%arg0: i32) -> (i32, i32) {
    %c0_i32 = arith.constant 0 : i32
    %c0_i32_0 = arith.constant 0 : i32
    %c0_i32_1 = arith.constant 0 : i32
    return %c0_i32, %c0_i32_0 : i32, i32
  }
  func.func @transform_12(%arg0: i32) -> (i32, i32) {
    %c0_i32 = arith.constant 0 : i32
    %c0_i32_0 = arith.constant 0 : i32
    %c0_i32_1 = arith.constant 0 : i32
    return %c0_i32, %c0_i32_0 : i32, i32
  }
  func.func @transform_13(%arg0: i32) -> (i32, i32, i32) {
    %c0_i32 = arith.constant 0 : i32
    %c0_i32_0 = arith.constant 0 : i32
    %c0_i32_1 = arith.constant 0 : i32
    %c0_i32_2 = arith.constant 0 : i32
    return %c0_i32, %c0_i32_0, %c0_i32_1 : i32, i32, i32
  }
  func.func @transform_14(%arg0: i32) -> (i32, i32, i32) {
    %c0_i32 = arith.constant 0 : i32
    %c0_i32_0 = arith.constant 0 : i32
    %c0_i32_1 = arith.constant 0 : i32
    %c0_i32_2 = arith.constant 0 : i32
    return %c0_i32, %c0_i32_0, %c0_i32_1 : i32, i32, i32
  }
  func.func @transform_15(%arg0: i32) -> (i32, i32) {
    %c0_i32 = arith.constant 0 : i32
    %c0_i32_0 = arith.constant 0 : i32
    %c0_i32_1 = arith.constant 0 : i32
    return %c0_i32, %c0_i32_0 : i32, i32
  }
  func.func @transform_16(%arg0: i32) -> (i32, i32) {
    %c0_i32 = arith.constant 0 : i32
    %c0_i32_0 = arith.constant 0 : i32
    %c0_i32_1 = arith.constant 0 : i32
    return %c0_i32, %c0_i32_0 : i32, i32
  }
  func.func @transform_17(%arg0: i32) -> (i32, i32) {
    %c0_i32 = arith.constant 0 : i32
    %c0_i32_0 = arith.constant 0 : i32
    %c0_i32_1 = arith.constant 0 : i32
    return %c0_i32, %c0_i32_0 : i32, i32
  }
  func.func @transform_18(%arg0: i32) -> (i32, i32) {
    %c0_i32 = arith.constant 0 : i32
    %c0_i32_0 = arith.constant 0 : i32
    %c0_i32_1 = arith.constant 0 : i32
    return %c0_i32, %c0_i32_0 : i32, i32
  }
  func.func @transform_19(%arg0: i32) -> (i32, i32) {
    %c0_i32 = arith.constant 0 : i32
    %c0_i32_0 = arith.constant 0 : i32
    %c0_i32_1 = arith.constant 0 : i32
    return %c0_i32, %c0_i32_0 : i32, i32
  }
  func.func @transform_20(%arg0: i32) -> (i32, i32) {
    %c0_i32 = arith.constant 0 : i32
    %c0_i32_0 = arith.constant 0 : i32
    %c0_i32_1 = arith.constant 0 : i32
    return %c0_i32, %c0_i32_0 : i32, i32
  }
  func.func @transform_21(%arg0: i32) -> (i32, i32) {
    %c0_i32 = arith.constant 0 : i32
    %c0_i32_0 = arith.constant 0 : i32
    %c0_i32_1 = arith.constant 0 : i32
    return %c0_i32, %c0_i32_0 : i32, i32
  }
  func.func @transform_22(%arg0: i32) -> (i32, i32) {
    %c0_i32 = arith.constant 0 : i32
    %c0_i32_0 = arith.constant 0 : i32
    %c0_i32_1 = arith.constant 0 : i32
    return %c0_i32, %c0_i32_0 : i32, i32
  }
  func.func @transform_23(%arg0: i32) -> (i32, i32) {
    %c0_i32 = arith.constant 0 : i32
    %c0_i32_0 = arith.constant 0 : i32
    %c0_i32_1 = arith.constant 0 : i32
    return %c0_i32, %c0_i32_0 : i32, i32
  }
  func.func @transform_24(%arg0: i32) -> (i32, i32, i32) {
    %c0_i32 = arith.constant 0 : i32
    %c0_i32_0 = arith.constant 0 : i32
    %c0_i32_1 = arith.constant 0 : i32
    return %arg0, %c0_i32, %c0_i32_0 : i32, i32, i32
  }
}

</mosaic_0001>

<bundles_post_ra>
// kernel: tpu_custom_call.1
= control target key start
LH: loop header
LB: loop body
LE: loop exit
PB: predicated region body
PF: predicated region fallthrough
CT: control target
= control target key end

     0   :  { %s4451_s0 = inlined_call_operand.vmem [shape: f32[2,4,16], index: 0, kind: input, shape index: {}]   ;;  %s4452_s1 = inlined_call_operand.vmem [shape: f32[2,1,16], index: 1, kind: input, shape index: {}]   ;;  %s4453_s2 = inlined_call_operand.vmem [shape: f32[2,1,16], index: 2, kind: input, shape index: {}]   ;;  %s4454_s3 = inlined_call_operand.vmem [shape: f32[2,1,16], index: 3, kind: input, shape index: {}]   ;;  %s4455_s4 = inlined_call_operand.vmem [shape: f32[32,12], index: 4, kind: input, shape index: {}]   ;;  %s4456_s5 = inlined_call_operand.vmem [shape: f32[32,1], index: 5, kind: input, shape index: {}]   ;;  %s4457_s6 = inlined_call_operand.vmem [shape: f32[32,1], index: 6, kind: input, shape index: {}]   ;;  %s4458_s7 = inlined_call_operand.vmem [shape: f32[32,1], index: 7, kind: input, shape index: {}]   ;;  %s4459_s8 = inlined_call_operand.vmem [shape: f32[32,96], index: 8, kind: input, shape index: {}]   ;;  %s4460_s9 = inlined_call_operand.vmem [shape: f32[32,1], index: 9, kind: input, shape index: {}]   ;;  %s4461_s10 = inlined_call_operand.vmem [shape: f32[32,1], index: 10, kind: input, shape index: {}]   ;;  %s4462_s11 = inlined_call_operand.vmem [shape: f32[32,1], index: 11, kind: input, shape index: {}]   ;;  %s4463_s12 = inlined_call_operand.vmem [shape: f32[32,96], index: 12, kind: input, shape index: {}]   ;;  %s4464_s13 = inlined_call_operand.vmem [shape: f32[3,32,1], index: 13, kind: input, shape index: {}]   ;;  %s4465_s14 = inlined_call_operand.vmem [shape: f32[3,32,1], index: 14, kind: input, shape index: {}]   ;;  %s4466_s15 = inlined_call_operand.vmem [shape: f32[32,1], index: 15, kind: input, shape index: {}]   ;;  %s4467_s16 = inlined_call_operand.vmem [shape: f32[32,1], index: 16, kind: input, shape index: {}]   ;;  %s4468_s17 = inlined_call_operand.vmem [shape: f32[32,1], index: 17, kind: input, shape index: {}]   ;;  %s4469_s18 = inlined_call_operand.vmem [shape: f32[32,96], index: 18, kind: input, shape index: {}]   ;;  %s4470_s19 = inlined_call_operand.vmem [shape: f32[32,1], index: 19, kind: input, shape index: {}]   ;;  %s4471_s20 = inlined_call_operand.vmem [shape: f32[32,1], index: 20, kind: input, shape index: {}]   ;;  %s4472_s21 = inlined_call_operand.vmem [shape: f32[32,1], index: 21, kind: input, shape index: {}]   ;;  %s4473_s22 = inlined_call_operand.vmem [shape: f32[32,1], index: 22, kind: input, shape index: {}]   ;;  %s4474_s23 = inlined_call_operand.<no memory space> [shape: f32[1,1], index: 23, kind: input, shape index: {}]   ;;  %s4475_s24 = inlined_call_operand.hbm [shape: f32[2,2,16], index: 24, kind: output, shape index: {}]  }
   0x1   :  { %4501 = sst [smem:[#allocation15_spill]] %s4451_s0  ;;  %v29_v0 = vstv %s4474_s23 }
   0x2   :  { %4502 = sst [smem:[#allocation16_spill]] %s4452_s1  ;;  %30 = vst [vmem:[#allocation2] sm:$0x1] %v29_v0 }
   0x3   :  { %4503 = sst [smem:[#allocation17_spill]] %s4453_s2 }
   0x4   :  { %4504 = sst [smem:[#allocation18_spill]] %s4454_s3 }
   0x5   :  { %4505 = sst [smem:[#allocation19_spill]] %s4455_s4 }
   0x6   :  { %4506 = sst [smem:[#allocation20_spill]] %s4456_s5 }
   0x7   :  { %4507 = sst [smem:[#allocation21_spill]] %s4457_s6 }
   0x8   :  { %4508 = sst [smem:[#allocation22_spill]] %s4458_s7 }
   0x9   :  { %4509 = sst [smem:[#allocation23_spill]] %s4459_s8 }
   0xa   :  { %4510 = sst [smem:[#allocation24_spill]] %s4473_s22 }
   0xb   :  { %4511 = sst [smem:[#allocation25_spill]] %s4475_s24 }
   0xc   :  { %31 = vsyncpa [#allocation4], 0 }
   0xd   :  { %33 = vsyncpa [#allocation4 + $0x1], 0  ;;  %s3556_s27 = smov 0   ;;  %s3558_s28 = smov 0  }
   0xe   :  { %s3560_s6 = smov 0   ;;  %s3562_s2 = smov 0  }
   0xf LB: > { %4512 = sst [smem:[#allocation6_spill]] %s3407_s27  ;;  %s3577_s23 = sadd.s32 4294967295, %s3419_s2   ;;  %s3419_s2 = sphi %s3562_s2, %s4551_s2   ;;  %s3415_s6 = sphi %s3560_s6, %s4554_s6   ;;  %s3411_s28 = sphi %s3558_s28, %s4553_s28   ;;  %s3407_s27 = sphi %s3556_s27, %s4552_s27  }
  0x10   : > { %4513 = sst [smem:[#allocation7_spill]] %s3411_s28  ;;  %s2731_s29 = sadd.s32 4294967294, %s3419_s2  }
  0x11   : > { %4514 = sst [smem:[#allocation8_spill]] %s3415_s6  ;;  %s3581_s0 = sadd.s32 1, %s3419_s2  }
  0x12   : > { %4515 = sst [smem:[#allocation9_spill]] %s3419_s2  ;;  %s570_s7 = sadd.s32 1, %s3415_s6 }
  0x13   : > { %4516 = sst [smem:[#allocation10_spill]] %s3577_s23  ;;  %s567_s30 = ssub.s32 %s3419_s2, %s3581_s0 }
  0x14   : > { %4517 = sst [smem:[#allocation11_spill]] %s3581_s0  ;;  %p580_p0 = scmp.ne.s32.totalorder %s3415_s6, %s3411_s28 }
  0x15   : > { %p568_p1 = scmp.eq.s32.totalorder %s567_s30, 0  ;;  %p581_p2 = scmp.eq.s32.totalorder %s3577_s23, 1 }
  0x16   : > { %p586_p3 = scmp.ne.s32.totalorder %s3411_s28, %s3407_s27  ;;  %p587_p4 = scmp.eq.s32.totalorder %s2731_s29, 1 }
  0x17   : > { %s3592_s3 = scalar_select %p568_p1, %s3415_s6, %s570_s7  }
  0x18   : > { %p3594_p5 = por %p581_p2, %p580_p0  ;;  %p3598_p6 = por %p587_p4, %p586_p3 }
  0x19   : > { %4518 = sst [smem:[#allocation12_spill]] %s3592_s3  ;;  %p2734_p7 = scmp.ge.s32.totalorder %s3419_s2, 1 }
  0x1a   : > { %s4519_s25 = scalar_select %p3594_p5, 1, 0 }
  0x1b   : > { %s4521_s8 = scalar_select %p3598_p6, 1, 0 }
  0x1c   : > { %4520 = sst [smem:[#allocation13_spill]] %s4519_s25  ;;  %p690_p8 = scmp.lt.s32.totalorder %s3419_s2, 3 }
  0x1d   : > { %4522 = sst [smem:[#allocation14_spill]] %s4521_s8 }
  0x1e   : > { %p691_p9 = pnand %p2734_p7, %p690_p8 }
  0x1f   : > { %p764_p10 = scmp.lt.s32.totalorder (!%p691_p9), %s3577_s23, 1  ;;  %v875_v1 = vlaneseq (!%p691_p9)  ;;  %s4523_s29 = sld [smem:[#allocation16_spill]] (!%p691_p9)  ;;  %vm934_vm0 = vcmask (!%p691_p9), 97280   ;;  %v3425_v13 = vmov (!%p691_p9), 0   ;;  %vm903_vm3 = vcmask (!%p691_p9), 121856  }
  0x20   : > { %694 = sbr.rel (%p691_p9) target bundleno = 1771 (0x6eb), region = 116  ;;  %s4524_s6 = sld [smem:[#allocation15_spill]] (!%p691_p9)  ;;  %3176 = vset.pattern.permute.xlu1 (!%p691_p9), %v3425_v13  ;;  %3175 = vset.pattern.permute.xlu0 (!%p691_p9), %v3425_v13  ;;  %vm888_vm4 = vcmask (!%p691_p9), 7168   ;;  %vm912_vm7 = vcmask (!%p691_p9), 1043456   ;;  %vm3426_vm8 = vmmov (!%p691_p9), 1   ;;  %vm1039_vm10 = vcmask (!%p691_p9), 130048  }
  0x21   : > { %v876_v2 = vshrl.u32 (!%p691_p9), %v875_v1, 7  ;;  %s4525_s2 = sld [smem:[#allocation17_spill]] (!%p691_p9)  ;;  %s4493_s27 = smov (!%p691_p9), 127   ;;  %v891_v26 = vand.u32 (!%p691_p9), 127, %v875_v1  ;;  %vm2997_vm9 = vmpackc.low (!%p691_p9), %vm912_vm7, %vm3426_vm8  ;;  %vm1226_vm11 = vcmask (!%p691_p9), 785408   ;;  %vm2627_vm14 = vcmask (!%p691_p9), 1040384  }
  0x22   : > { %s3424_s28 = smov (!%p691_p9), 1   ;;  %s4530_s3 = sld [smem:[#allocation21_spill]] (!%p691_p9)  ;;  %vm2629_vm15 = vcmask (!%p691_p9), 123904  }
  0x23   : > { %v3609_v3 = vsub.s32 (!%p691_p9), 0, %v876_v2  ;;  %s4531_s8 = sld [smem:[#allocation22_spill]] (!%p691_p9)  ;;  %v892_v27 = vadd.s32 (!%p691_p9), 4294967295, %v891_v26  ;;  %v3672_v28 = vadd.s32 (!%p691_p9), 1, %v891_v26  ;;  %s4539_s25 = smov (!%p691_p9), 127  }
  0x24   : > { %s4544_s5 = sld [smem:[#allocation7_spill]] (!%p691_p9) }
  0x25   : > { %vm893_vm1 = vcmp.ge.s32.totalorder (!%p691_p9), %v892_v27, 0  ;;  %vm894_vm2 = vcmp.lt.s32.totalorder (!%p691_p9), %v892_v27, 16  ;;  %vm907_vm6 = vcmp.lt.s32.totalorder (!%p691_p9), %v3672_v28, 16 }
  0x26   : > { %vm3674_vm5 = vmand (!%p691_p9), %vm893_vm1, %vm894_vm2 }
  0x27   : > { %s765_s4 = scalar_select %p764_p10, %s3577_s23, 1  ;;  %vm3764_vm12 = vmpackc.low %vm3674_vm5, %vm3674_vm5 }
  0x28   : > { %s4526_s23 = sld [smem:[#allocation18_spill]]  ;;  %v789_v18 = vld [vmem:[%s4530_s3] sm:$0xff]  ;;  %v790_v19 = vld [vmem:[%s4530_s3 + $0x8] sm:$0xff]  ;;  %v791_v22 = vld [vmem:[%s4530_s3 + $0x10] sm:$0xff] }
  0x29   : > { %s2736_s1 = sshll.u32 %s765_s4, 2  ;;  %s770_s7 = scalar_lea.vmem %s4523_s29, %s765_s4  ;;  %v793_v20 = vld [vmem:[%s4531_s8] sm:$0xff]  ;;  %v794_v21 = vld [vmem:[%s4531_s8 + $0x8] sm:$0xff]  ;;  %v792_v23 = vld [vmem:[%s4530_s3 + $0x18] sm:$0xff] }
  0x2a   : > { %s767_s0 = scalar_lea.vmem %s4524_s6, %s2736_s1  ;;  %s773_s24 = scalar_lea.vmem %s4525_s2, %s765_s4  ;;  %v778_v4 = vld [vmem:[%s770_s7] sm:$0x1]  ;;  %v795_v24 = vld [vmem:[%s4531_s8 + $0x10] sm:$0xff]  ;;  %v796_v25 = vld [vmem:[%s4531_s8 + $0x18] sm:$0xff] }
  0x2b   : > { %v777_v5 = vld [vmem:[%s767_s0] sm:$0xf]  ;;  %v3621_v7 = vrot.slane %v778_v4, %v3609_v3  ;;  %s4527_s6 = sld [smem:[#allocation19_spill]]  ;;  %s4529_s0 = sld [smem:[#allocation20_spill]]  ;;  %vm3788_vm13 = vmpackc.low %vm907_vm6, %vm907_vm6 }
  0x2c   : > { %v779_v6 = vld [vmem:[%s773_s24] sm:$0x1]  ;;  %s4497_s24 = smov 113   ;;  %s4534_s29 = sld [smem:[#allocation23_spill]] }
  0x2d   : > { %v3623_v9 = vmul.f32 %v779_v6, %v778_v4  ;;  %v880_v11 = vmul.f32 %v3621_v7, %v777_v5  ;;  %s761_s2 = sand.u32 1, %s4544_s5   ;;  %s4547_s7 = sld [smem:[#allocation25_spill]] }
  0x2e   : > { %s776_s22 = scalar_lea.vmem %s4526_s23, %s765_s4  ;;  %s2632_s5 = scalar_lea.sflag [#allocation4], %s761_s2 }
  0x2f   : > { %v780_v8 = vld [vmem:[%s776_s22] sm:$0x1]  ;;  %897 = vrot.lane.b32.xlu1 %v880_v11, %s4493_s27  ;;  %882 = vrot.lane.b32.xlu0 %v880_v11, %s4497_s24  ;;  %s4495_s22 = smov 15   ;;  %v910_v32 = vrot.slane %v880_v11, 4 }
  0x30   : > { %v3629_v12 = vmul.f32 %v780_v8, %v778_v4 }
  0x31   : > { %s4528_s1 = smov %s4527_s6  ;;  %v781_v10 = vld [vmem:[%s4527_s6] sm:$0xff]  ;;  %v786_v14 = vld [vmem:[%s4529_s0 + $0x8] sm:$0xff]  ;;  %v787_v16 = vld [vmem:[%s4529_s0 + $0x10] sm:$0xff]  ;;  %s4545_s6 = sld [smem:[#allocation10_spill]] }
  0x32   : > { %2870 = vmatprep.mubr.msk.f32.mxu0 %vm934_vm0, %v781_v10  ;;  %v785_v15 = vld [vmem:[%s4529_s0] sm:$0xff]  ;;  %v788_v17 = vld [vmem:[%s4529_s0 + $0x18] sm:$0xff]  ;;  %v782_v41 = vld [vmem:[%s4528_s1 + $0x8] sm:$0xff] }
  0x33   : > { %900 = vrot.lane.b32.xlu1 %v880_v11, %s4495_s22  ;;  %885 = vrot.lane.b32.xlu0 %v880_v11, %s3424_s28  ;;  %v783_v42 = vld [vmem:[%s4528_s1 + $0x10] sm:$0xff]  ;;  %v784_v43 = vld [vmem:[%s4528_s1 + $0x18] sm:$0xff] }
  0x37   : > { %921 = vperm.xlu1 %3176, %v786_v14   ;;  %916 = vperm.xlu0 %3175, %v785_v15   ;;  %s2793_s4 = sshll.u32 %s4545_s6, 5 }
  0x3b   : > { %926 = vperm.xlu1 %3176, %v787_v16   ;;  %931 = vperm.xlu0 %3175, %v788_v17  }
  0x3f   : > { %1088 = vperm.xlu1 %3176, %v789_v18   ;;  %1093 = vperm.xlu0 %3175, %v790_v19  }
  0x43   : > { %1112 = vperm.xlu1 %3176, %v793_v20   ;;  %1117 = vperm.xlu0 %3175, %v794_v21  }
  0x47   : > { %1098 = vperm.xlu1 %3176, %v791_v22   ;;  %1103 = vperm.xlu0 %3175, %v792_v23  }
  0x4b   : > { %1122 = vperm.xlu1 %3176, %v795_v24   ;;  %1127 = vperm.xlu0 %3175, %v796_v25  }
  0xa1   : > { %v898_v29 = vpop.permute.xlu1 %897  ;;  %v883_v30 = vpop.permute.xlu0 %882 }
  0xa5   : > { %v901_v33 = vpop.permute.xlu1 %900  ;;  %v886_v34 = vpop.permute.xlu0 %885 }
  0xa6   : > { %v904_v35 = vsel %vm903_vm3, %v898_v29, %v901_v33  ;;  %v889_v36 = vsel %vm888_vm4, %v883_v30, %v886_v34 }
  0xa7   : > { %v896_v37 = vsel %vm3674_vm5, %v889_v36, 0.0  ;;  %v909_v38 = vsel %vm907_vm6, %v904_v35, 0.0 }
  0xa8   : > { %v913_v39 = vsel %vm912_vm7, %v896_v37, %v910_v32 }
  0xa9   : > { %v2996_v40 = vpack.c.bf16 %v909_v38, %v913_v39 }
  0xab   : > { %2998 = vmatprep.subr.msk.bf16.mxu0 %vm2997_vm9, %v2996_v40 }
  0xac   : > { %3001 = vmatpush3.bf16.msk.msra.mxu0 %vm2997_vm9, %v2996_v40 }
  0xaf   : > { %2871 = vmatmul.mubr.msk.f32.vlgmr.msra.gmra.mrb[0].mxu0 %vm934_vm0, %v782_v41 }
  0xb0   : > { %2873 = vmatprep.mubr.msk.f32.mxu0 %vm934_vm0, %v783_v42 }
  0xb3   : > { %2874 = vmatmul.mubr.msk.f32.gmra.mrb[2].mxu0 %vm934_vm0, %v784_v43 }
  0xb6   : > { %v917_v44 = vpop.permute.xlu0 %916  ;;  %v922_v45 = vpop.permute.xlu1 %921 }
  0xba   : > { %v932_v51 = vpop.permute.xlu0 %931  ;;  %v927_v54 = vpop.permute.xlu1 %926 }
  0xbe   : > { %v1089_v40 = vpop.permute.xlu1 %1088  ;;  %v1094_v41 = vpop.permute.xlu0 %1093 }
 0x182   : > { %v2872_v46 = vpop.f32.mrb[0].mxu0 }
 0x183   : > { %v1022_v47 = vadd.f32 %v2872_v46, %v922_v45  ;;  %v1016_v48 = vpop.f32.mrb[1].mxu0  ;;  %v1118_v45 = vpop.permute.xlu0 %1117 }
 0x184   : > { %v1017_v49 = vadd.f32 %v1016_v48, %v917_v44  ;;  %v1113_v44 = vpop.permute.xlu1 %1112 }
 0x185   : > { %v1036_v50 = vmax.f32 %v1022_v47, 0.0 }
 0x186   : > { %v1035_v52 = vmax.f32 %v1017_v49, 0.0  ;;  %v2875_v53 = vpop.f32.mrb[2].mxu0 }
 0x187   : > { %v1041_v55 = vsel %vm1039_vm10, %v1036_v50, 0.0  ;;  %v1054_v56 = vmul.f32 %v1036_v50, %v1036_v50  ;;  %v1032_v57 = vadd.f32 %v2875_v53, %v932_v51  ;;  %v1026_v58 = vpop.f32.mrb[3].mxu0  ;;  %v1104_v47 = vpop.permute.xlu0 %1103 }
 0x188   : > { %v1040_v59 = vsel %vm1039_vm10, %v1035_v52, 0.0  ;;  %v1053_v60 = vmul.f32 %v1035_v52, %v1035_v52  ;;  %v1027_v61 = vadd.f32 %v1026_v58, %v927_v54  ;;  %v1099_v46 = vpop.permute.xlu1 %1098 }
 0x189   : > { %v1058_v62 = vsel %vm1039_vm10, %v1054_v56, 0.0  ;;  %v1042_v63 = vadd.f32 %v1041_v55, %v1040_v59  ;;  %v1038_v0 = vmax.f32 %v1032_v57, 0.0 }
 0x18a   : > { %v1057_v1 = vsel %vm1039_vm10, %v1053_v60, 0.0  ;;  %v1037_v2 = vmax.f32 %v1027_v61, 0.0 }
 0x18b   : > { %v1059_v4 = vadd.f32 %v1058_v62, %v1057_v1  ;;  %v1056_v5 = vmul.f32 %v1038_v0, %v1038_v0  ;;  %v1045_v11 = vsel %vm1039_vm10, %v1038_v0, 0.0  ;;  %v1128_v58 = vpop.permute.xlu0 %1127 }
 0x18c   : > { %v1043_v6 = vsel %vm1039_vm10, %v1037_v2, 0.0  ;;  %v1055_v8 = vmul.f32 %v1037_v2, %v1037_v2  ;;  %v1123_v57 = vpop.permute.xlu1 %1122 }
 0x18d   : > { %v1044_v10 = vadd.f32 %v1043_v6, %v1042_v63  ;;  %v1062_v16 = vsel %vm1039_vm10, %v1056_v5, 0.0 }
 0x18e   : > { %v1060_v13 = vsel %vm1039_vm10, %v1055_v8, 0.0 }
 0x18f   : > { %v1046_v14 = vadd.f32 %v1045_v11, %v1044_v10  ;;  %v1061_v15 = vadd.f32 %v1060_v13, %v1059_v4  ;;  %v802_v10 = vld [vmem:[%s4460_s9 + $0x8] sm:$0xff]  ;;  %v801_v11 = vld [vmem:[%s4460_s9] sm:$0xff] }
 0x190   : > { %v797_v13 = vld [vmem:[%s4534_s29] sm:$0xff] }
 0x191   : > { %v1047_v17 = vrot.slane %v1046_v14, 4  ;;  %v1063_v18 = vadd.f32 %v1062_v16, %v1061_v15  ;;  %2900 = vmatprep.mubr.msk.f32.mxu1 %vm1226_vm11, %v797_v13  ;;  %v803_v15 = vld [vmem:[%s4460_s9 + $0x10] sm:$0xff]  ;;  %v806_v16 = vld [vmem:[%s4461_s10 + $0x8] sm:$0xff] }
 0x193   : > { %v1048_v19 = vadd.f32 %v1047_v17, %v1046_v14  ;;  %v1064_v20 = vrot.slane %v1063_v18, 4  ;;  %v804_v14 = vld [vmem:[%s4460_s9 + $0x18] sm:$0xff]  ;;  %v805_v17 = vld [vmem:[%s4461_s10] sm:$0xff] }
 0x195   : > { %v1049_v21 = vrot.slane %v1048_v19, 2  ;;  %v1065_v22 = vadd.f32 %v1064_v20, %v1063_v18  ;;  %v810_v18 = vld [vmem:[%s4462_s11 + $0x8] sm:$0xff]  ;;  %v808_v20 = vld [vmem:[%s4461_s10 + $0x18] sm:$0xff] }
 0x197   : > { %v1050_v23 = vadd.f32 %v1049_v21, %v1048_v19  ;;  %v1066_v24 = vrot.slane %v1065_v22, 2  ;;  %v809_v19 = vld [vmem:[%s4462_s11] sm:$0xff]  ;;  %v807_v21 = vld [vmem:[%s4461_s10 + $0x10] sm:$0xff] }
 0x199   : > { %v1051_v25 = vrot.slane %v1050_v23, 1  ;;  %v1067_v26 = vadd.f32 %v1066_v24, %v1065_v22  ;;  %v812_v22 = vld [vmem:[%s4462_s11 + $0x18] sm:$0xff] }
 0x19b   : > { %v1052_v27 = vadd.f32 %v1051_v25, %v1050_v23  ;;  %v1068_v29 = vrot.slane %v1067_v26, 1  ;;  %v811_v23 = vld [vmem:[%s4462_s11 + $0x10] sm:$0xff] }
 0x19d   : > { %v1069_v30 = vadd.f32 %v1068_v29, %v1067_v26  ;;  %v1071_v32 = vmul.f32 0.03125, %v1052_v27 }
 0x19f   : > { %v1072_v33 = vmul.f32 0.03125, %v1069_v30  ;;  %v1073_v34 = vmul.f32 %v1071_v32, %v1071_v32  ;;  %v1078_v35 = vsub.f32 %v1037_v2, %v1071_v32  ;;  %v1076_v36 = vsub.f32 %v1035_v52, %v1071_v32 }
 0x1a0   : > { %v1077_v37 = vsub.f32 %v1036_v50, %v1071_v32  ;;  %v1079_v38 = vsub.f32 %v1038_v0, %v1071_v32 }
 0x1a1   : > { %v1074_v39 = vsub.f32 %v1072_v33, %v1073_v34 }
 0x1a3   : > { %v1075_v42 = vmax.f32 %v1074_v39, 0.0 }
 0x1a5   : > { %v1080_v43 = vadd.f32 1e-05, %v1075_v42 }
 0x1a7   : > { %3337 = vrsqrt.f32 %v1080_v43 }
 0x1b1   : > { %v3338_v48 = vpop.eup %3337 }
 0x1b2   : > { %v1084_v49 = vmul.f32 %v3338_v48, %v1078_v35  ;;  %v1082_v51 = vmul.f32 %v3338_v48, %v1076_v36  ;;  %v1083_v53 = vmul.f32 %v3338_v48, %v1077_v37  ;;  %v1085_v54 = vmul.f32 %v3338_v48, %v1079_v38 }
 0x1b4   : > { %v1108_v55 = vmul.f32 %v1099_v46, %v1084_v49  ;;  %v1106_v56 = vmul.f32 %v1089_v40, %v1082_v51  ;;  %v1107_v52 = vmul.f32 %v1094_v41, %v1083_v53  ;;  %v1109_v50 = vmul.f32 %v1104_v47, %v1085_v54 }
 0x1b6   : > { %v1132_v59 = vadd.f32 %v1123_v57, %v1108_v55  ;;  %v1130_v60 = vadd.f32 %v1113_v44, %v1106_v56  ;;  %v1131_v61 = vadd.f32 %v1118_v45, %v1107_v52  ;;  %v1133_v62 = vadd.f32 %v1128_v58, %v1109_v50 }
 0x1b8   : > { %v1136_v63 = vmul.f32 %v1132_v59, %v3621_v7  ;;  %v1134_v0 = vmul.f32 %v1130_v60, %v3621_v7  ;;  %v1135_v1 = vmul.f32 %v1131_v61, %v3621_v7  ;;  %v1137_v2 = vmul.f32 %v1133_v62, %v3621_v7 }
 0x1ba   : > { %v3182_v4 = vpack.i.bf16 %v1135_v1, %v1134_v0  ;;  %v3192_v5 = vpack.i.bf16 %v1137_v2, %v1136_v63  ;;  %v3711_v6 = vpack.c.bf16 %v1135_v1, %v1134_v0  ;;  %v3713_v8 = vpack.c.bf16 %v1137_v2, %v1136_v63  ;;  %v798_v0 = vld [vmem:[%s4534_s29 + $0x8] sm:$0xff]  ;;  %v799_v1 = vld [vmem:[%s4534_s29 + $0x10] sm:$0xff]  ;;  %v800_v2 = vld [vmem:[%s4534_s29 + $0x18] sm:$0xff] }
 0x1bc   : > { %3183 = vrot.lane.b32.xlu0 %v3182_v4, %s3424_s28  ;;  %3178 = vrot.lane.b32.xlu1 %v3182_v4, %s4497_s24 }
 0x1c0   : > { %3193 = vrot.lane.b32.xlu0 %v3192_v5, %s3424_s28  ;;  %3188 = vrot.lane.b32.xlu1 %v3192_v5, %s4497_s24 }
 0x1c4   : > { %3203 = vrot.lane.b32.xlu0 %v3182_v4, %s4495_s22  ;;  %3198 = vrot.lane.b32.xlu1 %v3182_v4, %s4493_s27 }
 0x1c8   : > { %3213 = vrot.lane.b32.xlu0 %v3192_v5, %s4495_s22  ;;  %3208 = vrot.lane.b32.xlu1 %v3192_v5, %s4493_s27  ;;  %s4541_s27 = smov 113  }
 0x1cc   : > { %1213 = vperm.xlu0 %3175, %v802_v10   ;;  %1208 = vperm.xlu1 %3176, %v801_v11  }
 0x1d0   : > { %1223 = vperm.xlu0 %3175, %v804_v14   ;;  %1218 = vperm.xlu1 %3176, %v803_v15  }
 0x1d4   : > { %1380 = vperm.xlu0 %3175, %v806_v16   ;;  %1375 = vperm.xlu1 %3176, %v805_v17  }
 0x1d8   : > { %1404 = vperm.xlu0 %3175, %v810_v18   ;;  %1399 = vperm.xlu1 %3176, %v809_v19  }
 0x1dc   : > { %1390 = vperm.xlu0 %3175, %v808_v20   ;;  %1385 = vperm.xlu1 %3176, %v807_v21  }
 0x1e0   : > { %1414 = vperm.xlu0 %3175, %v812_v22   ;;  %1409 = vperm.xlu1 %3176, %v811_v23  }
 0x22e   : > { %v3184_v24 = vpop.permute.xlu0 %3183  ;;  %v3179_v25 = vpop.permute.xlu1 %3178 }
 0x22f   : > { %v3186_v26 = vunpack.i.h.bf16 %v3184_v24  ;;  %v3185_v27 = vunpack.i.l.bf16 %v3184_v24  ;;  %v3181_v29 = vunpack.i.h.bf16 %v3179_v25  ;;  %v3180_v30 = vunpack.i.l.bf16 %v3179_v25 }
 0x231   : > { %v1166_v33 = vsel %vm888_vm4, %v3180_v30, %v3185_v27  ;;  %v1167_v34 = vsel %vm888_vm4, %v3181_v29, %v3186_v26 }
 0x232   : > { %v3194_v35 = vpop.permute.xlu0 %3193  ;;  %v3189_v36 = vpop.permute.xlu1 %3188  ;;  %v3002_v37 = vpack.c.bf16 %v1167_v34, %v1166_v33 }
 0x233   : > { %v3196_v38 = vunpack.i.h.bf16 %v3194_v35  ;;  %v3195_v39 = vunpack.i.l.bf16 %v3194_v35  ;;  %v3191_v40 = vunpack.i.h.bf16 %v3189_v36  ;;  %v3190_v41 = vunpack.i.l.bf16 %v3189_v36 }
 0x234   : > { %3004 = vmatprep.subr.msk.bf16.mxu1 %vm3764_vm12, %v3002_v37 }
 0x235   : > { %v1169_v42 = vsel %vm888_vm4, %v3191_v40, %v3196_v38  ;;  %v1168_v43 = vsel %vm888_vm4, %v3190_v41, %v3195_v39  ;;  %3007 = vmatpush3.bf16.msk.msra.mxu1 %vm3764_vm12, %v3002_v37 }
 0x236   : > { %v3204_v44 = vpop.permute.xlu0 %3203  ;;  %v3199_v45 = vpop.permute.xlu1 %3198  ;;  %v3008_v46 = vpack.c.bf16 %v1169_v42, %v1168_v43 }
 0x237   : > { %v3206_v47 = vunpack.i.h.bf16 %v3204_v44  ;;  %v3205_v48 = vunpack.i.l.bf16 %v3204_v44  ;;  %v3201_v49 = vunpack.i.h.bf16 %v3199_v45  ;;  %v3200_v51 = vunpack.i.l.bf16 %v3199_v45 }
 0x238   : > { %3010 = vmatprep.subr.msk.bf16.mxu1 %vm3764_vm12, %v3008_v46 }
 0x239   : > { %3013 = vmatpush3.bf16.msk.msra.mxu1 %vm3764_vm12, %v3008_v46  ;;  %v1199_v55 = vsel %vm903_vm3, %v3201_v49, %v3206_v47  ;;  %v1198_v56 = vsel %vm903_vm3, %v3200_v51, %v3205_v48 }
 0x23a   : > { %v3214_v53 = vpop.permute.xlu0 %3213  ;;  %v3209_v54 = vpop.permute.xlu1 %3208  ;;  %3015 = vmatprep.subr.bf16.mxu1 %v3711_v6  ;;  %v3022_v60 = vpack.c.bf16 %v1199_v55, %v1198_v56 }
 0x23b   : > { %v3216_v52 = vunpack.i.h.bf16 %v3214_v53  ;;  %v3215_v50 = vunpack.i.l.bf16 %v3214_v53  ;;  %v3211_v57 = vunpack.i.h.bf16 %v3209_v54  ;;  %v3210_v58 = vunpack.i.l.bf16 %v3209_v54 }
 0x23d   : > { %3017 = vmatpush3.bf16.msra.mxu1 %v3711_v6  ;;  %v1201_v61 = vsel %vm903_vm3, %v3211_v57, %v3216_v52  ;;  %v1200_v62 = vsel %vm903_vm3, %v3210_v58, %v3215_v50 }
 0x23e   : > { %3019 = vmatprep.subr.bf16.mxu1 %v3713_v8  ;;  %v3028_v63 = vpack.c.bf16 %v1201_v61, %v1200_v62 }
 0x241   : > { %3021 = vmatpush3.bf16.msra.mxu1 %v3713_v8 }
 0x242   : > { %3024 = vmatprep.subr.msk.bf16.mxu1 %vm3788_vm13, %v3022_v60 }
 0x245   : > { %3027 = vmatpush3.bf16.msk.msra.mxu1 %vm3788_vm13, %v3022_v60 }
 0x246   : > { %3030 = vmatprep.subr.msk.bf16.mxu1 %vm3788_vm13, %v3028_v63 }
 0x249   : > { %3033 = vmatpush3.bf16.msk.msra.mxu1 %vm3788_vm13, %v3028_v63 }
 0x24b   : > { %v1214_v4 = vpop.permute.xlu0 %1213  ;;  %v1209_v5 = vpop.permute.xlu1 %1208 }
 0x24c   : > { %2901 = vmatmul.mubr.msk.f32.vlgmr.msra.gmra.mrb[0].mxu1 %vm1226_vm11, %v798_v0 }
 0x24d   : > { %2903 = vmatprep.mubr.msk.f32.mxu1 %vm1226_vm11, %v799_v1 }
 0x24f   : > { %v1224_v14 = vpop.permute.xlu0 %1223  ;;  %v1219_v17 = vpop.permute.xlu1 %1218 }
 0x250   : > { %2904 = vmatmul.mubr.msk.f32.gmra.mrb[2].mxu1 %vm1226_vm11, %v800_v2 }
 0x253   : > { %v1381_v1 = vpop.permute.xlu0 %1380  ;;  %v1376_v2 = vpop.permute.xlu1 %1375 }
 0x31f   : > { %v2902_v6 = vpop.f32.mrb[0].mxu1 }
 0x320   : > { %v1311_v8 = vadd.f32 %v2902_v6, %v1214_v4  ;;  %v1305_v10 = vpop.f32.mrb[1].mxu1  ;;  %v1405_v6 = vpop.permute.xlu0 %1404 }
 0x321   : > { %v1306_v11 = vadd.f32 %v1305_v10, %v1209_v5 }
 0x322   : > { %v1325_v13 = vmax.f32 %v1311_v8, 0.0  ;;  %v1400_v8 = vpop.permute.xlu1 %1399 }
 0x323   : > { %v1324_v15 = vmax.f32 %v1306_v11, 0.0  ;;  %v2905_v16 = vpop.f32.mrb[2].mxu1 }
 0x324   : > { %v1329_v18 = vsel %vm1039_vm10, %v1325_v13, 0.0  ;;  %v1342_v19 = vmul.f32 %v1325_v13, %v1325_v13  ;;  %v1321_v20 = vadd.f32 %v2905_v16, %v1224_v14  ;;  %v1315_v21 = vpop.f32.mrb[3].mxu1  ;;  %v1391_v10 = vpop.permute.xlu0 %1390 }
 0x325   : > { %v1328_v22 = vsel %vm1039_vm10, %v1324_v15, 0.0  ;;  %v1341_v23 = vmul.f32 %v1324_v15, %v1324_v15  ;;  %v1316_v24 = vadd.f32 %v1315_v21, %v1219_v17 }
 0x326   : > { %v1346_v25 = vsel %vm1039_vm10, %v1342_v19, 0.0  ;;  %v1330_v26 = vadd.f32 %v1329_v18, %v1328_v22  ;;  %v1327_v27 = vmax.f32 %v1321_v20, 0.0  ;;  %v1386_v11 = vpop.permute.xlu1 %1385 }
 0x327   : > { %v1345_v29 = vsel %vm1039_vm10, %v1341_v23, 0.0  ;;  %v1326_v30 = vmax.f32 %v1316_v24, 0.0 }
 0x328   : > { %v1347_v33 = vadd.f32 %v1346_v25, %v1345_v29  ;;  %v1344_v34 = vmul.f32 %v1327_v27, %v1327_v27  ;;  %v1333_v38 = vsel %vm1039_vm10, %v1327_v27, 0.0  ;;  %v1415_v22 = vpop.permute.xlu0 %1414 }
 0x329   : > { %v1331_v35 = vsel %vm1039_vm10, %v1326_v30, 0.0  ;;  %v1343_v36 = vmul.f32 %v1326_v30, %v1326_v30 }
 0x32a   : > { %v1332_v37 = vadd.f32 %v1331_v35, %v1330_v26  ;;  %v1350_v42 = vsel %vm1039_vm10, %v1344_v34, 0.0  ;;  %v1410_v23 = vpop.permute.xlu1 %1409 }
 0x32b   : > { %v1348_v39 = vsel %vm1039_vm10, %v1343_v36, 0.0 }
 0x32c   : > { %v1334_v40 = vadd.f32 %v1333_v38, %v1332_v37  ;;  %v1349_v41 = vadd.f32 %v1348_v39, %v1347_v33  ;;  %v842_v39 = vld [vmem:[%s4466_s15 + $0x8] sm:$0xff] }
 0x32e   : > { %v1335_v43 = vrot.slane %v1334_v40, 4  ;;  %v1351_v44 = vadd.f32 %v1350_v42, %v1349_v41  ;;  %v813_v41 = vld [vmem:[%s4463_s12] sm:$0xff]  ;;  %v830_v42 = vld [vmem:[%s4465_s14 + $0x8] sm:$0xff] }
 0x32f   : > { %2930 = vmatprep.mubr.msk.f32.mxu0 %vm1226_vm11, %v813_v41 }
 0x330   : > { %v1336_v45 = vadd.f32 %v1335_v43, %v1334_v40  ;;  %v1352_v46 = vrot.slane %v1351_v44, 4  ;;  %v841_v40 = vld [vmem:[%s4466_s15] sm:$0xff] }
 0x331   : > { %v829_v43 = vld [vmem:[%s4465_s14] sm:$0xff] }
 0x332   : > { %v1337_v47 = vrot.slane %v1336_v45, 2  ;;  %v1353_v48 = vadd.f32 %v1352_v46, %v1351_v44  ;;  %v831_v44 = vld [vmem:[%s4465_s14 + $0x10] sm:$0xff]  ;;  %v834_v46 = vld [vmem:[%s4465_s14 + $0x28] sm:$0xff] }
 0x334   : > { %v1338_v49 = vadd.f32 %v1337_v47, %v1336_v45  ;;  %v1354_v51 = vrot.slane %v1353_v48, 2  ;;  %v843_v45 = vld [vmem:[%s4466_s15 + $0x10] sm:$0xff]  ;;  %v833_v47 = vld [vmem:[%s4465_s14 + $0x20] sm:$0xff] }
 0x336   : > { %v1339_v53 = vrot.slane %v1338_v49, 1  ;;  %v1355_v54 = vadd.f32 %v1354_v51, %v1353_v48  ;;  %v832_v48 = vld [vmem:[%s4465_s14 + $0x18] sm:$0xff]  ;;  %v837_v51 = vld [vmem:[%s4465_s14 + $0x40] sm:$0xff] }
 0x338   : > { %v1340_v55 = vadd.f32 %v1339_v53, %v1338_v49  ;;  %v1356_v56 = vrot.slane %v1355_v54, 1  ;;  %v844_v49 = vld [vmem:[%s4466_s15 + $0x18] sm:$0xff]  ;;  %v835_v53 = vld [vmem:[%s4465_s14 + $0x30] sm:$0xff] }
 0x33a   : > { %v1357_v52 = vadd.f32 %v1356_v56, %v1355_v54  ;;  %v1358_v50 = vmul.f32 0.03125, %v1340_v55  ;;  %v836_v54 = vld [vmem:[%s4465_s14 + $0x38] sm:$0xff]  ;;  %v838_v55 = vld [vmem:[%s4465_s14 + $0x48] sm:$0xff]  ;;  %v817_v56 = vld [vmem:[%s4464_s13] sm:$0xff] }
 0x33c   : > { %v1359_v57 = vmul.f32 0.03125, %v1357_v52  ;;  %v1360_v58 = vmul.f32 %v1358_v50, %v1358_v50  ;;  %v1365_v60 = vsub.f32 %v1326_v30, %v1358_v50  ;;  %v1363_v61 = vsub.f32 %v1324_v15, %v1358_v50  ;;  %v839_v52 = vld [vmem:[%s4465_s14 + $0x50] sm:$0xff] }
 0x33d   : > { %v1364_v62 = vsub.f32 %v1325_v13, %v1358_v50  ;;  %v1366_v63 = vsub.f32 %v1327_v27, %v1358_v50  ;;  %v818_v50 = vld [vmem:[%s4464_s13 + $0x8] sm:$0xff] }
 0x33e   : > { %v1361_v0 = vsub.f32 %v1359_v57, %v1360_v58  ;;  %v840_v57 = vld [vmem:[%s4465_s14 + $0x58] sm:$0xff]  ;;  %v821_v58 = vld [vmem:[%s4464_s13 + $0x20] sm:$0xff] }
 0x340   : > { %v1362_v4 = vmax.f32 %v1361_v0, 0.0  ;;  %v825_v0 = vld [vmem:[%s4464_s13 + $0x40] sm:$0xff] }
 0x342   : > { %v1367_v5 = vadd.f32 1e-05, %v1362_v4  ;;  %v827_v4 = vld [vmem:[%s4464_s13 + $0x50] sm:$0xff] }
 0x344   : > { %3339 = vrsqrt.f32 %v1367_v5  ;;  %v828_v5 = vld [vmem:[%s4464_s13 + $0x58] sm:$0xff] }
 0x34e   : > { %v3340_v14 = vpop.eup %3339 }
 0x34f   : > { %v1371_v16 = vmul.f32 %v3340_v14, %v1365_v60  ;;  %v1369_v17 = vmul.f32 %v3340_v14, %v1363_v61  ;;  %v1370_v18 = vmul.f32 %v3340_v14, %v1364_v62  ;;  %v1372_v19 = vmul.f32 %v3340_v14, %v1366_v63  ;;  %v819_v60 = vld [vmem:[%s4464_s13 + $0x10] sm:$0xff]  ;;  %v822_v62 = vld [vmem:[%s4464_s13 + $0x28] sm:$0xff]  ;;  %v848_v14 = vld [vmem:[%s4467_s16 + $0x18] sm:$0xff] }
 0x350   : > { %v3913_v61 = vrot.slane %v3623_v9, %v3609_v3  ;;  %v3922_v63 = vrot.slane %v3629_v12, %v3609_v3  ;;  %v820_v9 = vld [vmem:[%s4464_s13 + $0x18] sm:$0xff]  ;;  %v823_v12 = vld [vmem:[%s4464_s13 + $0x30] sm:$0xff] }
 0x351   : > { %v1395_v20 = vmul.f32 %v1386_v11, %v1371_v16  ;;  %v1393_v21 = vmul.f32 %v1376_v2, %v1369_v17  ;;  %v1394_v15 = vmul.f32 %v1381_v1, %v1370_v18  ;;  %v1396_v13 = vmul.f32 %v1391_v10, %v1372_v19  ;;  %v824_v1 = vld [vmem:[%s4464_s13 + $0x38] sm:$0xff]  ;;  %v826_v2 = vld [vmem:[%s4464_s13 + $0x48] sm:$0xff]  ;;  %v849_v11 = vld [vmem:[%s4468_s17] sm:$0xff] }
 0x352   : > { %v850_v10 = vld [vmem:[%s4468_s17 + $0x8] sm:$0xff]  ;;  %v847_v16 = vld [vmem:[%s4467_s16 + $0x10] sm:$0xff]  ;;  %v852_v17 = vld [vmem:[%s4468_s17 + $0x18] sm:$0xff] }
 0x353   : > { %v1419_v24 = vadd.f32 %v1410_v23, %v1395_v20  ;;  %v1417_v25 = vadd.f32 %v1400_v8, %v1393_v21  ;;  %v1418_v26 = vadd.f32 %v1405_v6, %v1394_v15  ;;  %v1420_v27 = vadd.f32 %v1415_v22, %v1396_v13  ;;  %v846_v6 = vld [vmem:[%s4467_s16 + $0x8] sm:$0xff]  ;;  %v845_v8 = vld [vmem:[%s4467_s16] sm:$0xff]  ;;  %v851_v18 = vld [vmem:[%s4468_s17 + $0x10] sm:$0xff] }
 0x355   : > { %v1423_v29 = vmul.f32 %v1419_v24, %v3621_v7  ;;  %v1421_v30 = vmul.f32 %v1417_v25, %v3621_v7  ;;  %v1422_v33 = vmul.f32 %v1418_v26, %v3621_v7  ;;  %v1424_v34 = vmul.f32 %v1420_v27, %v3621_v7 }
 0x357   : > { %v3222_v35 = vpack.i.bf16 %v1422_v33, %v1421_v30  ;;  %v3232_v36 = vpack.i.bf16 %v1424_v34, %v1423_v29  ;;  %v3829_v37 = vpack.c.bf16 %v1422_v33, %v1421_v30  ;;  %v3831_v38 = vpack.c.bf16 %v1424_v34, %v1423_v29 }
 0x359   : > { %3223 = vrot.lane.b32.xlu0 %v3222_v35, %s3424_s28  ;;  %3218 = vrot.lane.b32.xlu1 %v3222_v35, %s4497_s24 }
 0x35d   : > { %3233 = vrot.lane.b32.xlu0 %v3232_v36, %s3424_s28  ;;  %3228 = vrot.lane.b32.xlu1 %v3232_v36, %s4497_s24 }
 0x361   : > { %3243 = vrot.lane.b32.xlu0 %v3222_v35, %s4495_s22  ;;  %3238 = vrot.lane.b32.xlu1 %v3222_v35, %s4539_s25 }
 0x365   : > { %3253 = vrot.lane.b32.xlu0 %v3232_v36, %s4495_s22  ;;  %3248 = vrot.lane.b32.xlu1 %v3232_v36, %s4539_s25  ;;  %s4540_s22 = smov 15  }
 0x369   : > { %1500 = vperm.xlu0 %3175, %v842_v39   ;;  %1495 = vperm.xlu1 %3176, %v841_v40  }
 0x36d   : > { %1633 = vperm.xlu0 %3175, %v830_v42   ;;  %1628 = vperm.xlu1 %3176, %v829_v43  }
 0x371   : > { %1638 = vperm.xlu0 %3175, %v831_v44   ;;  %1505 = vperm.xlu1 %3176, %v843_v45  }
 0x375   : > { %1665 = vperm.xlu0 %3175, %v834_v46   ;;  %1660 = vperm.xlu1 %3176, %v833_v47  }
 0x379   : > { %1613 = vrot.lane.b32.xlu0 %v3621_v7, %s3424_s28  ;;  %1610 = vrot.lane.b32.xlu1 %v3621_v7, %s4497_s24 }
 0x37d   : > { %1643 = vperm.xlu0 %3175, %v832_v48   ;;  %1510 = vperm.xlu1 %3176, %v844_v49  }
 0x381   : > { %1688 = vperm.xlu0 %3175, %v837_v51   ;;  %1670 = vperm.xlu1 %3176, %v835_v53  }
 0x385   : > { %1675 = vperm.xlu0 %3175, %v836_v54   ;;  %1693 = vperm.xlu1 %3176, %v838_v55  }
 0x389   : > { %1734 = vperm.xlu0 %3175, %v817_v56   ;;  %1698 = vperm.xlu1 %3176, %v839_v52  }
 0x38d   : > { %1618 = vrot.lane.b32.xlu0 %v3621_v7, %s4539_s25  ;;  %1739 = vperm.xlu1 %3176, %v818_v50  }
 0x391   : > { %1703 = vperm.xlu0 %3175, %v840_v57   ;;  %1621 = vrot.lane.b32.xlu1 %v3621_v7, %s4540_s22 }
 0x395   : > { %1766 = vperm.xlu0 %3175, %v821_v58   ;;  %1744 = vperm.xlu1 %3176, %v819_v60   ;;  %v816_v58 = vld [vmem:[%s4463_s12 + $0x18] sm:$0xff] }
 0x399   : > { %1724 = vrot.lane.b32.xlu0 %v3913_v61, %s4497_s24  ;;  %1771 = vperm.xlu1 %3176, %v822_v62  }
 0x39d   : > { %2279 = vrot.lane.b32.xlu0 %v3922_v63, %s4497_s24  ;;  %1727 = vrot.lane.b32.xlu1 %v3913_v61, %s3424_s28  ;;  %s2735_s24 = sshll.u32 %s761_s2, 1 }
 0x3a1   : > { %1749 = vperm.xlu0 %3175, %v820_v9   ;;  %2282 = vrot.lane.b32.xlu1 %v3922_v63, %s3424_s28 }
 0x3a5   : > { %1803 = vperm.xlu0 %3175, %v825_v0   ;;  %1776 = vperm.xlu1 %3176, %v823_v12  }
 0x3a9   : > { %1781 = vperm.xlu0 %3175, %v824_v1   ;;  %1808 = vperm.xlu1 %3176, %v826_v2  }
 0x3ad   : > { %1793 = vrot.lane.b32.xlu0 %v3913_v61, %s4539_s25  ;;  %1813 = vperm.xlu1 %3176, %v827_v4  }
 0x3b1   : > { %2308 = vrot.lane.b32.xlu0 %v3922_v63, %s4539_s25  ;;  %1796 = vrot.lane.b32.xlu1 %v3913_v61, %s4540_s22 }
 0x3b5   : > { %1818 = vperm.xlu0 %3175, %v828_v5   ;;  %2311 = vrot.lane.b32.xlu1 %v3922_v63, %s4540_s22 }
 0x3b9   : > { %1889 = vperm.xlu0 %3175, %v846_v6   ;;  %1884 = vperm.xlu1 %3176, %v845_v8  }
 0x3bd   : > { %1913 = vperm.xlu0 %3175, %v850_v10   ;;  %1908 = vperm.xlu1 %3176, %v849_v11  }
 0x3c1   : > { %1899 = vperm.xlu0 %3175, %v848_v14   ;;  %1894 = vperm.xlu1 %3176, %v847_v16  }
 0x3c5   : > { %1923 = vperm.xlu0 %3175, %v852_v17   ;;  %1918 = vperm.xlu1 %3176, %v851_v18  }
 0x3cb   : > { %v3224_v19 = vpop.permute.xlu0 %3223  ;;  %v3219_v20 = vpop.permute.xlu1 %3218 }
 0x3cc   : > { %v3226_v21 = vunpack.i.h.bf16 %v3224_v19  ;;  %v3225_v15 = vunpack.i.l.bf16 %v3224_v19  ;;  %v3221_v13 = vunpack.i.h.bf16 %v3219_v20  ;;  %v3220_v22 = vunpack.i.l.bf16 %v3219_v20 }
 0x3ce   : > { %v1454_v23 = vsel %vm888_vm4, %v3221_v13, %v3226_v21  ;;  %v1453_v24 = vsel %vm888_vm4, %v3220_v22, %v3225_v15 }
 0x3cf   : > { %v3034_v25 = vpack.c.bf16 %v1454_v23, %v1453_v24  ;;  %v3234_v26 = vpop.permute.xlu0 %3233  ;;  %v3229_v27 = vpop.permute.xlu1 %3228 }
 0x3d0   : > { %v3236_v29 = vunpack.i.h.bf16 %v3234_v26  ;;  %v3235_v30 = vunpack.i.l.bf16 %v3234_v26  ;;  %v3231_v33 = vunpack.i.h.bf16 %v3229_v27  ;;  %v3230_v34 = vunpack.i.l.bf16 %v3229_v27 }
 0x3d1   : > { %3036 = vmatprep.subr.msk.bf16.mxu0 %vm3764_vm12, %v3034_v25 }
 0x3d2   : > { %v1456_v35 = vsel %vm888_vm4, %v3231_v33, %v3236_v29  ;;  %v1455_v36 = vsel %vm888_vm4, %v3230_v34, %v3235_v30  ;;  %3039 = vmatpush3.bf16.msk.msra.mxu0 %vm3764_vm12, %v3034_v25 }
 0x3d3   : > { %v3040_v39 = vpack.c.bf16 %v1456_v35, %v1455_v36  ;;  %v3244_v40 = vpop.permute.xlu0 %3243  ;;  %v3239_v41 = vpop.permute.xlu1 %3238 }
 0x3d4   : > { %v3246_v42 = vunpack.i.h.bf16 %v3244_v40  ;;  %v3245_v43 = vunpack.i.l.bf16 %v3244_v40  ;;  %v3241_v44 = vunpack.i.h.bf16 %v3239_v41  ;;  %v3240_v45 = vunpack.i.l.bf16 %v3239_v41 }
 0x3d5   : > { %3042 = vmatprep.subr.msk.bf16.mxu0 %vm3764_vm12, %v3040_v39 }
 0x3d6   : > { %3045 = vmatpush3.bf16.msk.msra.mxu0 %vm3764_vm12, %v3040_v39  ;;  %v1486_v48 = vsel %vm903_vm3, %v3241_v44, %v3246_v42  ;;  %v1485_v49 = vsel %vm903_vm3, %v3240_v45, %v3245_v43 }
 0x3d7   : > { %v3254_v46 = vpop.permute.xlu0 %3253  ;;  %v3249_v47 = vpop.permute.xlu1 %3248  ;;  %3047 = vmatprep.subr.bf16.mxu0 %v3829_v37  ;;  %v3054_v56 = vpack.c.bf16 %v1486_v48, %v1485_v49 }
 0x3d8   : > { %v3256_v51 = vunpack.i.h.bf16 %v3254_v46  ;;  %v3255_v53 = vunpack.i.l.bf16 %v3254_v46  ;;  %v3251_v54 = vunpack.i.h.bf16 %v3249_v47  ;;  %v3250_v55 = vunpack.i.l.bf16 %v3249_v47 }
 0x3da   : > { %3049 = vmatpush3.bf16.msra.mxu0 %v3829_v37  ;;  %v1488_v52 = vsel %vm903_vm3, %v3251_v54, %v3256_v51  ;;  %v1487_v50 = vsel %vm903_vm3, %v3250_v55, %v3255_v53  ;;  %v814_v37 = vld [vmem:[%s4463_s12 + $0x8] sm:$0xff] }
 0x3db   : > { %3051 = vmatprep.subr.bf16.mxu0 %v3831_v38  ;;  %v3060_v57 = vpack.c.bf16 %v1488_v52, %v1487_v50 }
 0x3de   : > { %3053 = vmatpush3.bf16.msra.mxu0 %v3831_v38  ;;  %v815_v38 = vld [vmem:[%s4463_s12 + $0x10] sm:$0xff] }
 0x3df   : > { %3056 = vmatprep.subr.msk.bf16.mxu0 %vm3788_vm13, %v3054_v56 }
 0x3e2   : > { %3059 = vmatpush3.bf16.msk.msra.mxu0 %vm3788_vm13, %v3054_v56 }
 0x3e3   : > { %3062 = vmatprep.subr.msk.bf16.mxu0 %vm3788_vm13, %v3060_v57 }
 0x3e6   : > { %3065 = vmatpush3.bf16.msk.msra.mxu0 %vm3788_vm13, %v3060_v57 }
 0x3e8   : > { %v4023_v60 = vpop.permute.xlu1 %1495  ;;  %v4025_v9 = vpop.permute.xlu0 %1500 }
 0x3e9   : > { %2931 = vmatmul.mubr.msk.f32.vlgmr.msra.gmra.mrb[4].mxu0 %vm1226_vm11, %v814_v37 }
 0x3ea   : > { %2933 = vmatprep.mubr.msk.f32.mxu0 %vm1226_vm11, %v815_v38 }
 0x3ec   : > { %v1629_v62 = vpop.permute.xlu1 %1628  ;;  %v1634_v12 = vpop.permute.xlu0 %1633 }
 0x3ed   : > { %2934 = vmatmul.mubr.msk.f32.gmra.mrb[6].mxu0 %vm1226_vm11, %v816_v58 }
 0x3f0   : > { %v4027_v0 = vpop.permute.xlu1 %1505  ;;  %v1639_v2 = vpop.permute.xlu0 %1638 }
 0x3f4   : > { %v1661_v1 = vpop.permute.xlu1 %1660  ;;  %v1666_v5 = vpop.permute.xlu0 %1665 }
 0x3f5   : > { %v1679_v51 = vmul.f32 %v1666_v5, %v3621_v7  ;;  %v1678_v54 = vmul.f32 %v1661_v1, %v3621_v7 }
 0x3f8   : > { %v1611_v4 = vpop.permute.xlu1 %1610  ;;  %v1614_v8 = vpop.permute.xlu0 %1613 }
 0x3f9   : > { %v1616_v39 = vsel %vm888_vm4, %v1611_v4, %v1614_v8 }
 0x3fa   : > { %v1617_v41 = vsel %vm3674_vm5, %v1616_v39, 0.0 }
 0x3fb   : > { %v1649_v45 = vrot.slane %v1617_v41, %v3609_v3 }
 0x3fc   : > { %v4029_v6 = vpop.permute.xlu1 %1510  ;;  %v1644_v11 = vpop.permute.xlu0 %1643 }
 0x3fd   : > { %v1653_v55 = vmul.f32 %v1649_v45, %v1644_v11  ;;  %v1651_v52 = vmul.f32 %v1649_v45, %v1634_v12  ;;  %v1650_v50 = vmul.f32 %v1649_v45, %v1629_v62  ;;  %v1652_v58 = vmul.f32 %v1649_v45, %v1639_v2 }
 0x400   : > { %v1671_v10 = vpop.permute.xlu1 %1670  ;;  %v1689_v16 = vpop.permute.xlu0 %1688 }
 0x401   : > { %v1680_v4 = vmul.f32 %v1671_v10, %v3621_v7 }
 0x404   : > { %v1694_v14 = vpop.permute.xlu1 %1693  ;;  %v1676_v18 = vpop.permute.xlu0 %1675 }
 0x405   : > { %v1681_v5 = vmul.f32 %v1676_v18, %v3621_v7 }
 0x408   : > { %v1699_v17 = vpop.permute.xlu1 %1698  ;;  %v4033_v20 = vpop.permute.xlu0 %1734 }
 0x40c   : > { %v4031_v19 = vpop.permute.xlu1 %1739  ;;  %v1619_v15 = vpop.permute.xlu0 %1618 }
 0x410   : > { %v1622_v21 = vpop.permute.xlu1 %1621  ;;  %v1704_v22 = vpop.permute.xlu0 %1703 }
 0x411   : > { %v1624_v42 = vsel %vm903_vm3, %v1619_v15, %v1622_v21 }
 0x412   : > { %v1625_v46 = vsel %vm907_vm6, %v1624_v42, 0.0 }
 0x413   : > { %v1709_v53 = vrot.slane %v1625_v46, %v3609_v3 }
 0x414   : > { %v4035_v13 = vpop.permute.xlu1 %1744  ;;  %v1767_v24 = vpop.permute.xlu0 %1766 }
 0x415   : > { %v1785_v8 = vmul.f32 %v1767_v24, %v3913_v61  ;;  %v2300_v1 = vmul.f32 %v3922_v63, %v1767_v24  ;;  %v1711_v62 = vmul.f32 %v1709_v53, %v1694_v14  ;;  %v1710_v21 = vmul.f32 %v1709_v53, %v1689_v16 }
 0x416   : > { %v1713_v15 = vmul.f32 %v1709_v53, %v1704_v22 }
 0x418   : > { %v1772_v23 = vpop.permute.xlu1 %1771  ;;  %v1725_v26 = vpop.permute.xlu0 %1724 }
 0x419   : > { %v1786_v31 = vmul.f32 %v1772_v23, %v3913_v61  ;;  %v2301_v18 = vmul.f32 %v3922_v63, %v1772_v23 }
 0x41c   : > { %v1728_v25 = vpop.permute.xlu1 %1727  ;;  %v2280_v29 = vpop.permute.xlu0 %2279 }
 0x41d   : > { %v1730_v44 = vsel %vm888_vm4, %v1725_v26, %v1728_v25  ;;  %v1712_v26 = vmul.f32 %v1709_v53, %v1699_v17 }
 0x41e   : > { %v1731_v48 = vsel %vm3674_vm5, %v1730_v44, 0.0 }
 0x41f   : > { %v1755_v57 = vrot.slane %v1731_v48, %v3609_v3 }
 0x420   : > { %v2283_v27 = vpop.permute.xlu1 %2282  ;;  %v1750_v33 = vpop.permute.xlu0 %1749 }
 0x421   : > { %v2285_v49 = vsel %vm888_vm4, %v2280_v29, %v2283_v27  ;;  %v1759_v27 = vmul.f32 %v1755_v57, %v1750_v33  ;;  %v1757_v29 = vmul.f32 %v1755_v57, %v4031_v19  ;;  %v1756_v22 = vmul.f32 %v1755_v57, %v4033_v20 }
 0x422   : > { %v2286_v37 = vsel %vm3674_vm5, %v2285_v49, 0.0  ;;  %v1758_v41 = vmul.f32 %v1755_v57, %v4035_v13 }
 0x423   : > { %v2290_v25 = vrot.slane %v2286_v37, %v3609_v3 }
 0x424   : > { %v1777_v30 = vpop.permute.xlu1 %1776  ;;  %v4039_v35 = vpop.permute.xlu0 %1803 }
 0x425   : > { %v1787_v42 = vmul.f32 %v1777_v30, %v3913_v61  ;;  %v2302_v17 = vmul.f32 %v3922_v63, %v1777_v30  ;;  %v2291_v45 = vmul.f32 %v2290_v25, %v4033_v20  ;;  %v2294_v46 = vmul.f32 %v2290_v25, %v1750_v33 }
 0x428   : > { %v4037_v34 = vpop.permute.xlu1 %1808  ;;  %v1782_v40 = vpop.permute.xlu0 %1781 }
 0x429   : > { %v1788_v30 = vmul.f32 %v1782_v40, %v3913_v61 }
 0x42c   : > { %v4041_v36 = vpop.permute.xlu1 %1813  ;;  %v1794_v47 = vpop.permute.xlu0 %1793 }
 0x430   : > { %v1797_v43 = vpop.permute.xlu1 %1796  ;;  %v2309_v11 = vpop.permute.xlu0 %2308 }
 0x431   : > { %v1799_v38 = vsel %vm903_vm3, %v1794_v47, %v1797_v43 }
 0x432   : > { %v1800_v2 = vsel %vm907_vm6, %v1799_v38, 0.0 }
 0x433   : > { %v1824_v23 = vrot.slane %v1800_v2, %v3609_v3 }
 0x434   : > { %v2312_v56 = vpop.permute.xlu1 %2311  ;;  %v1819_v47 = vpop.permute.xlu0 %1818 }
 0x435   : > { %v2314_v12 = vsel %vm903_vm3, %v2309_v11, %v2312_v56  ;;  %v2293_v56 = vmul.f32 %v2290_v25, %v4035_v13  ;;  %v1825_v20 = vmul.f32 %v1824_v23, %v4039_v35  ;;  %v1826_v33 = vmul.f32 %v1824_v23, %v4037_v34 }
 0x436   : > { %v2315_v14 = vsel %vm907_vm6, %v2314_v12, 0.0  ;;  %v1828_v38 = vmul.f32 %v1824_v23, %v1819_v47 }
 0x4bc   : > { %v2932_v10 = vpop.f32.mrb[4].mxu0 }
 0x4bd   : > { %v1597_v24 = vadd.f32 %v2932_v10, %v4025_v9  ;;  %v1591_v39 = vpop.f32.mrb[5].mxu0  ;;  %v2292_v9 = vmul.f32 %v2290_v25, %v4031_v19 }
 0x4be   : > { %v1592_v16 = vadd.f32 %v1591_v39, %v4023_v60  ;;  %v2319_v60 = vrot.slane %v2315_v14, %v3609_v3 }
 0x4bf   : > { %v1655_v43 = vadd.f32 %v1651_v52, %v1597_v24  ;;  %v2303_v52 = vmul.f32 %v3922_v63, %v1782_v40 }
 0x4c0   : > { %v1654_v44 = vadd.f32 %v1650_v50, %v1592_v16  ;;  %v2935_v28 = vpop.f32.mrb[6].mxu0  ;;  %v2320_v13 = vmul.f32 %v2319_v60, %v4039_v35  ;;  %v2321_v63 = vmul.f32 %v2319_v60, %v4037_v34  ;;  %v2322_v2 = vmul.f32 %v2319_v60, %v4041_v36 }
 0x4c1   : > { %v1683_v48 = vadd.f32 %v1679_v51, %v1655_v43  ;;  %v1607_v49 = vadd.f32 %v2935_v28, %v4029_v6  ;;  %v1601_v53 = vpop.f32.mrb[7].mxu0  ;;  %v1827_v51 = vmul.f32 %v1824_v23, %v4041_v36  ;;  %v2323_v24 = vmul.f32 %v2319_v60, %v1819_v47 }
 0x4c2   : > { %v1682_v57 = vadd.f32 %v1678_v54, %v1654_v44  ;;  %v1602_v19 = vadd.f32 %v1601_v53, %v4027_v0 }
 0x4c3   : > { %v1715_v50 = vadd.f32 %v1711_v62, %v1683_v48  ;;  %v1657_v37 = vadd.f32 %v1653_v55, %v1607_v49 }
 0x4c4   : > { %v1714_v6 = vadd.f32 %v1710_v21, %v1682_v57  ;;  %v1656_v11 = vadd.f32 %v1652_v58, %v1602_v19 }
 0x4c5   : > { %v1761_v12 = vadd.f32 %v1757_v29, %v1715_v50  ;;  %v2296_v61 = vadd.f32 %v2292_v9, %v1715_v50  ;;  %v1685_v25 = vadd.f32 %v1681_v5, %v1657_v37 }
 0x4c6   : > { %v1760_v40 = vadd.f32 %v1756_v22, %v1714_v6  ;;  %v2295_v0 = vadd.f32 %v2291_v45, %v1714_v6  ;;  %v1684_v54 = vadd.f32 %v1680_v4, %v1656_v11 }
 0x4c7   : > { %v1790_v10 = vadd.f32 %v1786_v31, %v1761_v12  ;;  %v2305_v62 = vadd.f32 %v2301_v18, %v2296_v61  ;;  %v1717_v55 = vadd.f32 %v1713_v15, %v1685_v25 }
 0x4c8   : > { %v1789_v39 = vadd.f32 %v1785_v8, %v1760_v40  ;;  %v2304_v14 = vadd.f32 %v2300_v1, %v2295_v0  ;;  %v1716_v21 = vadd.f32 %v1712_v26, %v1684_v54 }
 0x4c9   : > { %v1830_v58 = vadd.f32 %v1826_v33, %v1790_v10  ;;  %v2325_v16 = vadd.f32 %v2321_v63, %v2305_v62  ;;  %v1763_v35 = vadd.f32 %v1759_v27, %v1717_v55  ;;  %v2298_v29 = vadd.f32 %v2294_v46, %v1717_v55 }
 0x4ca   : > { %v1829_v23 = vadd.f32 %v1825_v20, %v1789_v39  ;;  %v2324_v5 = vadd.f32 %v2320_v13, %v2304_v14  ;;  %v1762_v43 = vadd.f32 %v1758_v41, %v1716_v21  ;;  %v2297_v34 = vadd.f32 %v2293_v56, %v1716_v21 }
 0x4cb   : > { %v4095_v22 = vmax.f32 %v1830_v58, 0.0  ;;  %v4097_v4 = vmax.f32 %v2325_v16, 0.0  ;;  %v1792_v36 = vadd.f32 %v1788_v30, %v1763_v35  ;;  %v2307_v31 = vadd.f32 %v2303_v52, %v2298_v29 }
 0x4cc   : > { %v4099_v18 = vmax.f32 %v1829_v23, 0.0  ;;  %v4101_v15 = vmax.f32 %v2324_v5, 0.0  ;;  %v1791_v8 = vadd.f32 %v1787_v42, %v1762_v43  ;;  %v2306_v1 = vadd.f32 %v2302_v17, %v2297_v34 }
 0x4cd   : > { %v1838_v26 = vsel %vm1039_vm10, %v4095_v22, 0.0  ;;  %v1851_v27 = vmul.f32 %v4095_v22, %v4095_v22  ;;  %v2333_v41 = vsel %vm1039_vm10, %v4097_v4, 0.0  ;;  %v2346_v9 = vmul.f32 %v4097_v4, %v4097_v4 }
 0x4ce   : > { %v1837_v44 = vsel %vm1039_vm10, %v4099_v18, 0.0  ;;  %v1850_v45 = vmul.f32 %v4099_v18, %v4099_v18  ;;  %v2332_v42 = vsel %vm1039_vm10, %v4101_v15, 0.0  ;;  %v2345_v17 = vmul.f32 %v4101_v15, %v4101_v15 }
 0x4cf   : > { %v1855_v28 = vsel %vm1039_vm10, %v1851_v27, 0.0  ;;  %v2350_v46 = vsel %vm1039_vm10, %v2346_v9, 0.0  ;;  %v1839_v47 = vadd.f32 %v1838_v26, %v1837_v44  ;;  %v2334_v60 = vadd.f32 %v2333_v41, %v2332_v42 }
 0x4d0   : > { %v1854_v48 = vsel %vm1039_vm10, %v1850_v45, 0.0  ;;  %v2349_v49 = vsel %vm1039_vm10, %v2345_v17, 0.0  ;;  %v1832_v53 = vadd.f32 %v1828_v38, %v1792_v36  ;;  %v2327_v56 = vadd.f32 %v2323_v24, %v2307_v31 }
 0x4d1   : > { %v1856_v30 = vadd.f32 %v1855_v28, %v1854_v48  ;;  %v2351_v52 = vadd.f32 %v2350_v46, %v2349_v49  ;;  %v1831_v57 = vadd.f32 %v1827_v51, %v1791_v8  ;;  %v2326_v19 = vadd.f32 %v2322_v2, %v2306_v1 }
 0x4d2   : > { %v4123_v20 = vmax.f32 %v1832_v53, 0.0  ;;  %v4125_v33 = vmax.f32 %v2327_v56, 0.0 }
 0x4d3   : > { %v4127_v50 = vmax.f32 %v1831_v57, 0.0  ;;  %v4129_v37 = vmax.f32 %v2326_v19, 0.0 }
 0x4d4   : > { %v1853_v6 = vmul.f32 %v4123_v20, %v4123_v20  ;;  %v2348_v11 = vmul.f32 %v4125_v33, %v4125_v33  ;;  %v1842_v63 = vsel %vm1039_vm10, %v4123_v20, 0.0  ;;  %v2337_v40 = vsel %vm1039_vm10, %v4125_v33, 0.0 }
 0x4d5   : > { %v1840_v38 = vsel %vm1039_vm10, %v4127_v50, 0.0  ;;  %v1852_v51 = vmul.f32 %v4127_v50, %v4127_v50  ;;  %v2335_v13 = vsel %vm1039_vm10, %v4129_v37, 0.0  ;;  %v2347_v12 = vmul.f32 %v4129_v37, %v4129_v37 }
 0x4d6   : > { %v1841_v61 = vadd.f32 %v1840_v38, %v1839_v47  ;;  %v2336_v25 = vadd.f32 %v2335_v13, %v2334_v60  ;;  %v1859_v24 = vsel %vm1039_vm10, %v1853_v6, 0.0  ;;  %v2354_v39 = vsel %vm1039_vm10, %v2348_v11, 0.0 }
 0x4d7   : > { %v1857_v0 = vsel %vm1039_vm10, %v1852_v51, 0.0  ;;  %v2352_v54 = vsel %vm1039_vm10, %v2347_v12, 0.0 }
 0x4d8   : > { %v1843_v2 = vadd.f32 %v1842_v63, %v1841_v61  ;;  %v1858_v10 = vadd.f32 %v1857_v0, %v1856_v30  ;;  %v2338_v62 = vadd.f32 %v2337_v40, %v2336_v25  ;;  %v2353_v55 = vadd.f32 %v2352_v54, %v2351_v52  ;;  %v1890_v63 = vpop.permute.xlu0 %1889 }
 0x4da   : > { %v1844_v14 = vrot.slane %v1843_v2, 4  ;;  %v1860_v21 = vadd.f32 %v1859_v24, %v1858_v10  ;;  %v2339_v58 = vrot.slane %v2338_v62, 4  ;;  %v2355_v16 = vadd.f32 %v2354_v39, %v2353_v55 }
 0x4dc   : > { %v1845_v35 = vadd.f32 %v1844_v14, %v1843_v2  ;;  %v1861_v29 = vrot.slane %v1860_v21, 4  ;;  %v2340_v23 = vadd.f32 %v2339_v58, %v2338_v62  ;;  %v2356_v5 = vrot.slane %v2355_v16, 4 }
 0x4de   : > { %v1846_v43 = vrot.slane %v1845_v35, 2  ;;  %v1862_v34 = vadd.f32 %v1861_v29, %v1860_v21  ;;  %v2341_v36 = vrot.slane %v2340_v23, 2  ;;  %v2357_v31 = vadd.f32 %v2356_v5, %v2355_v16 }
 0x4e0   : > { %v1847_v8 = vadd.f32 %v1846_v43, %v1845_v35  ;;  %v1863_v1 = vrot.slane %v1862_v34, 2  ;;  %v2342_v26 = vadd.f32 %v2341_v36, %v2340_v23  ;;  %v2358_v27 = vrot.slane %v2357_v31, 2 }
 0x4e2   : > { %v1848_v41 = vrot.slane %v1847_v8, 1  ;;  %v1864_v9 = vadd.f32 %v1863_v1, %v1862_v34  ;;  %v2343_v44 = vrot.slane %v2342_v26, 1  ;;  %v2359_v45 = vadd.f32 %v2358_v27, %v2357_v31 }
 0x4e4   : > { %v1849_v42 = vadd.f32 %v1848_v41, %v1847_v8  ;;  %v1865_v17 = vrot.slane %v1864_v9, 1  ;;  %v2344_v28 = vadd.f32 %v2343_v44, %v2342_v26  ;;  %v2360_v46 = vrot.slane %v2359_v45, 1 }
 0x4e6   : > { %v1866_v47 = vadd.f32 %v1865_v17, %v1864_v9  ;;  %v1867_v60 = vmul.f32 0.03125, %v1849_v42  ;;  %v2361_v48 = vadd.f32 %v2360_v46, %v2359_v45  ;;  %v2362_v49 = vmul.f32 0.03125, %v2344_v28 }
 0x4e8   : > { %v1868_v53 = vmul.f32 0.03125, %v1866_v47  ;;  %v1869_v56 = vmul.f32 %v1867_v60, %v1867_v60  ;;  %v1874_v30 = vsub.f32 %v4127_v50, %v1867_v60  ;;  %v2363_v52 = vmul.f32 0.03125, %v2361_v48  ;;  %v1885_v50 = vpop.permute.xlu1 %1884 }
 0x4e9   : > { %v2364_v57 = vmul.f32 %v2362_v49, %v2362_v49  ;;  %v2369_v19 = vsub.f32 %v4129_v37, %v2362_v49  ;;  %v1872_v6 = vsub.f32 %v4099_v18, %v1867_v60  ;;  %v1873_v11 = vsub.f32 %v4095_v22, %v1867_v60  ;;  %v1914_v18 = vpop.permute.xlu0 %1913 }
 0x4ea   : > { %v1870_v38 = vsub.f32 %v1868_v53, %v1869_v56  ;;  %v2367_v51 = vsub.f32 %v4101_v15, %v2362_v49  ;;  %v2368_v13 = vsub.f32 %v4097_v4, %v2362_v49  ;;  %v1875_v12 = vsub.f32 %v4123_v20, %v1867_v60 }
 0x4eb   : > { %v2365_v61 = vsub.f32 %v2363_v52, %v2364_v57  ;;  %v2370_v25 = vsub.f32 %v4125_v33, %v2362_v49 }
 0x4ec   : > { %v1871_v40 = vmax.f32 %v1870_v38, 0.0  ;;  %v1909_v22 = vpop.permute.xlu1 %1908  ;;  %v853_v38 = vld [vmem:[%s4469_s18] sm:$0xff] }
 0x4ed   : > { %v2366_v0 = vmax.f32 %v2365_v61, 0.0  ;;  %v1900_v2 = vpop.permute.xlu0 %1899  ;;  %2960 = vmatprep.mubr.msk.f32.mxu1 %vm1226_vm11, %v853_v38  ;;  %2990 = vmatprep.mubr.msk.f32.mxu0 %vm1226_vm11, %v853_v38  ;;  %v859_v61 = vld [vmem:[%s4470_s19 + $0x10] sm:$0xff] }
 0x4ee   : > { %v1876_v54 = vadd.f32 1e-05, %v1871_v40  ;;  %v863_v40 = vld [vmem:[%s4471_s20 + $0x10] sm:$0xff] }
 0x4ef   : > { %v2371_v37 = vadd.f32 1e-05, %v2366_v0  ;;  %v864_v0 = vld [vmem:[%s4471_s20 + $0x18] sm:$0xff] }
 0x4f0   : > { %3341 = vrsqrt.f32 %v1876_v54  ;;  %v1895_v10 = vpop.permute.xlu1 %1894  ;;  %v866_v54 = vld [vmem:[%s4472_s21 + $0x8] sm:$0xff] }
 0x4f1   : > { %3343 = vrsqrt.f32 %v2371_v37  ;;  %v1924_v23 = vpop.permute.xlu0 %1923  ;;  %v868_v37 = vld [vmem:[%s4472_s21 + $0x18] sm:$0xff] }
 0x4f4   : > { %v1919_v5 = vpop.permute.xlu1 %1918 }
 0x4fa   : > { %v3342_v15 = vpop.eup %3341 }
 0x4fb   : > { %v3344_v62 = vpop.eup %3343  ;;  %v1880_v4 = vmul.f32 %v3342_v15, %v1874_v30  ;;  %v1878_v55 = vmul.f32 %v3342_v15, %v1872_v6  ;;  %v1879_v20 = vmul.f32 %v3342_v15, %v1873_v11  ;;  %v1881_v24 = vmul.f32 %v3342_v15, %v1875_v12  ;;  %v860_v12 = vld [vmem:[%s4470_s19 + $0x18] sm:$0xff] }
 0x4fc   : > { %v2375_v39 = vmul.f32 %v3344_v62, %v2369_v19  ;;  %v2373_v33 = vmul.f32 %v3344_v62, %v2367_v51  ;;  %v2374_v14 = vmul.f32 %v3344_v62, %v2368_v13  ;;  %v2376_v21 = vmul.f32 %v3344_v62, %v2370_v25  ;;  %v858_v51 = vld [vmem:[%s4470_s19 + $0x8] sm:$0xff]  ;;  %v857_v13 = vld [vmem:[%s4470_s19] sm:$0xff] }
 0x4fd   : > { %v1902_v58 = vmul.f32 %v1885_v50, %v1878_v55  ;;  %v1903_v16 = vmul.f32 %v1890_v63, %v1879_v20  ;;  %v1904_v35 = vmul.f32 %v1895_v10, %v1880_v4  ;;  %v1905_v29 = vmul.f32 %v1900_v2, %v1881_v24  ;;  %v862_v25 = vld [vmem:[%s4471_s20 + $0x8] sm:$0xff]  ;;  %v873_v62 = vld [vmem:[#allocation2] sm:$0x1] }
 0x4fe   : > { %v2379_v43 = vmul.f32 %v2375_v39, %v1895_v10  ;;  %v2377_v34 = vmul.f32 %v2373_v33, %v1885_v50  ;;  %v2378_v36 = vmul.f32 %v2374_v14, %v1890_v63  ;;  %v2380_v31 = vmul.f32 %v2376_v21, %v1900_v2  ;;  %v861_v63 = vld [vmem:[%s4471_s20] sm:$0xff] }
 0x4ff   : > { %v1926_v8 = vadd.f32 %v1909_v22, %v1902_v58  ;;  %v1927_v1 = vadd.f32 %v1914_v18, %v1903_v16  ;;  %v1928_v26 = vadd.f32 %v1919_v5, %v1904_v35  ;;  %v1929_v27 = vadd.f32 %v1924_v23, %v1905_v29  ;;  %v865_v50 = vld [vmem:[%s4472_s21] sm:$0xff] }
 0x500   : > { %v2381_v41 = vadd.f32 %v2377_v34, %v1909_v22  ;;  %v2382_v9 = vadd.f32 %v2378_v36, %v1914_v18  ;;  %v2383_v44 = vadd.f32 %v2379_v43, %v1919_v5  ;;  %v2384_v45 = vadd.f32 %v2380_v31, %v1924_v23  ;;  %v867_v18 = vld [vmem:[%s4472_s21 + $0x10] sm:$0xff] }
 0x501   : > { %v1930_v42 = vmul.f32 %v1926_v8, %v3621_v7  ;;  %v1931_v17 = vmul.f32 %v1927_v1, %v3621_v7  ;;  %v1932_v28 = vmul.f32 %v1928_v26, %v3621_v7  ;;  %v1933_v46 = vmul.f32 %v1929_v27, %v3621_v7 }
 0x502   : > { %v2385_v47 = vmul.f32 %v2381_v41, %v3621_v7  ;;  %v2386_v60 = vmul.f32 %v2382_v9, %v3621_v7  ;;  %v2387_v48 = vmul.f32 %v2383_v44, %v3621_v7  ;;  %v2388_v49 = vmul.f32 %v2384_v45, %v3621_v7 }
 0x503   : > { %v3262_v53 = vpack.i.bf16 %v1931_v17, %v1930_v42  ;;  %v3282_v56 = vpack.i.bf16 %v1933_v46, %v1932_v28  ;;  %v4169_v57 = vpack.c.bf16 %v1931_v17, %v1930_v42  ;;  %v4171_v19 = vpack.c.bf16 %v1933_v46, %v1932_v28 }
 0x504   : > { %v3272_v30 = vpack.i.bf16 %v2386_v60, %v2385_v47  ;;  %v3292_v52 = vpack.i.bf16 %v2388_v49, %v2387_v48  ;;  %v4173_v6 = vpack.c.bf16 %v2386_v60, %v2385_v47  ;;  %v4175_v11 = vpack.c.bf16 %v2388_v49, %v2387_v48 }
 0x505   : > { %3263 = vrot.lane.b32.xlu0 %v3262_v53, %s3424_s28  ;;  %3258 = vrot.lane.b32.xlu1 %v3262_v53, %s4541_s27 }
 0x509   : > { %3273 = vrot.lane.b32.xlu0 %v3272_v30, %s3424_s28  ;;  %3268 = vrot.lane.b32.xlu1 %v3272_v30, %s4541_s27 }
 0x50d   : > { %3283 = vrot.lane.b32.xlu0 %v3282_v56, %s3424_s28  ;;  %3278 = vrot.lane.b32.xlu1 %v3282_v56, %s4541_s27 }
 0x511   : > { %3293 = vrot.lane.b32.xlu0 %v3292_v52, %s3424_s28  ;;  %3288 = vrot.lane.b32.xlu1 %v3292_v52, %s4541_s27  ;;  %s4542_s28 = sld [smem:[#allocation24_spill]] }
 0x515   : > { %3303 = vrot.lane.b32.xlu0 %v3262_v53, %s4540_s22  ;;  %3298 = vrot.lane.b32.xlu1 %v3262_v53, %s4539_s25 }
 0x517   : > { %s4543_s30 = smov %s4542_s28  ;;  %v870_v22 = vld [vmem:[%s4542_s28 + $0x8] sm:$0xff]  ;;  %s4409_s28 = scalar_lea.hbm %s4547_s7, %s2793_s4 }
 0x518   : > { %v869_v2 = vld [vmem:[%s4543_s30] sm:$0xff]  ;;  %v872_v10 = vld [vmem:[%s4543_s30 + $0x18] sm:$0xff]  ;;  %v871_v15 = vld [vmem:[%s4543_s30 + $0x10] sm:$0xff] }
 0x519   : > { %3313 = vrot.lane.b32.xlu0 %v3272_v30, %s4540_s22  ;;  %3308 = vrot.lane.b32.xlu1 %v3272_v30, %s4539_s25 }
 0x51d   : > { %3323 = vrot.lane.b32.xlu0 %v3282_v56, %s4540_s22  ;;  %3318 = vrot.lane.b32.xlu1 %v3282_v56, %s4539_s25 }
 0x521   : > { %3333 = vrot.lane.b32.xlu0 %v3292_v52, %s4540_s22  ;;  %3328 = vrot.lane.b32.xlu1 %v3292_v52, %s4539_s25  ;;  %s763_s25 = scalar_lea.vmem [#allocation3], %s2735_s24  ;;  %s3427_s24 = smov [#allocation3]  }
 0x522   : > { %s2645_s22 = sshll.u32 %s763_s25, 4  ;;  %s3361_s0 = sshll.u32 %s3427_s24, 4  ;;  %s4411_s22 = int_to_ptr.vmem [resolvable:$true] %s2645_s22  ;;  %s3362_s0 = int_to_ptr.vmem [resolvable:$false] %s3361_s0 }
 0x523   : > { %s3357_s6 = scalar_lea.vmem %s4411_s22, 32  ;;  %s3363_s1 = scalar_lea.vmem %s3362_s0, 64 }
 0x524   : > { %p3358_p11 = scmp.ne.s32.totalorder %s4411_s22, %s3357_s6  ;;  %p3364_p0 = scmp.lt.s32.totalorder %s4411_s22, %s3362_s0 }
 0x525   : > { %2009 = vperm.xlu0 %3175, %v858_v51   ;;  %2004 = vperm.xlu1 %3176, %v857_v13   ;;  %p3365_p1 = scmp.lt.s32.totalorder %s3363_s1, %s3357_s6 }
 0x526   : > { %p3359_p12 = pnand %p3358_p11, %p3594_p5 }
 0x527   : > { %p3366_p2 = por %p3365_p1, %p3364_p0 }
 0x528   : > { %p3360_p13 = pneg %p3359_p12 }
 0x529   : > { %2019 = vperm.xlu0 %3175, %v860_v12   ;;  %2014 = vperm.xlu1 %3176, %v859_v61  }
 0x52a   : > { %p3367_p3 = pnand %p3366_p2, %p3360_p13 }
 0x52d   : > { %2175 = vperm.xlu0 %3175, %v862_v25   ;;  %2170 = vperm.xlu1 %3176, %v861_v63  }
 0x531   : > { %2194 = vperm.xlu0 %3175, %v865_v50   ;;  %2180 = vperm.xlu1 %3176, %v863_v40  }
 0x535   : > { %2185 = vperm.xlu0 %3175, %v864_v0   ;;  %2199 = vperm.xlu1 %3176, %v866_v54  }
 0x539   : > { %2209 = vperm.xlu0 %3175, %v868_v37   ;;  %2204 = vperm.xlu1 %3176, %v867_v18  }
 0x53d   : > { %2227 = vperm.xlu0 %3175, %v870_v22   ;;  %2222 = vperm.xlu1 %3176, %v869_v2  }
 0x541   : > { %2237 = vperm.xlu0 %3175, %v872_v10   ;;  %2232 = vperm.xlu1 %3176, %v871_v15  }
 0x545   : > { %2259 = vperm.xlu1 %3176, %v873_v62  }
 0x577   : > { %v3264_v4 = vpop.permute.xlu0 %3263  ;;  %v3259_v55 = vpop.permute.xlu1 %3258 }
 0x578   : > { %v3266_v20 = vunpack.i.h.bf16 %v3264_v4  ;;  %v3265_v24 = vunpack.i.l.bf16 %v3264_v4  ;;  %v3261_v39 = vunpack.i.h.bf16 %v3259_v55  ;;  %v3260_v33 = vunpack.i.l.bf16 %v3259_v55 }
 0x57a   : > { %v1963_v14 = vsel %vm888_vm4, %v3261_v39, %v3266_v20  ;;  %v1962_v21 = vsel %vm888_vm4, %v3260_v33, %v3265_v24 }
 0x57b   : > { %v3066_v58 = vpack.c.bf16 %v1963_v14, %v1962_v21  ;;  %v3274_v16 = vpop.permute.xlu0 %3273  ;;  %v3269_v35 = vpop.permute.xlu1 %3268 }
 0x57c   : > { %v3276_v29 = vunpack.i.h.bf16 %v3274_v16  ;;  %v3275_v23 = vunpack.i.l.bf16 %v3274_v16  ;;  %v3271_v5 = vunpack.i.h.bf16 %v3269_v35  ;;  %v3270_v43 = vunpack.i.l.bf16 %v3269_v35 }
 0x57d   : > { %3068 = vmatprep.subr.msk.bf16.mxu1 %vm3764_vm12, %v3066_v58 }
 0x57e   : > { %v2418_v34 = vsel %vm888_vm4, %v3271_v5, %v3276_v29  ;;  %v2417_v36 = vsel %vm888_vm4, %v3270_v43, %v3275_v23  ;;  %3071 = vmatpush3.bf16.msk.msra.mxu1 %vm3764_vm12, %v3066_v58  ;;  %v855_v23 = vld [vmem:[%s4469_s18 + $0x10] sm:$0xff]  ;;  %v856_v5 = vld [vmem:[%s4469_s18 + $0x18] sm:$0xff] }
 0x57f   : > { %v3098_v31 = vpack.c.bf16 %v2418_v34, %v2417_v36  ;;  %v3284_v8 = vpop.permute.xlu0 %3283  ;;  %v3279_v1 = vpop.permute.xlu1 %3278 }
 0x580   : > { %v3286_v26 = vunpack.i.h.bf16 %v3284_v8  ;;  %v3285_v27 = vunpack.i.l.bf16 %v3284_v8  ;;  %v3281_v41 = vunpack.i.h.bf16 %v3279_v1  ;;  %v3280_v9 = vunpack.i.l.bf16 %v3279_v1 }
 0x581   : > { %3100 = vmatprep.subr.msk.bf16.mxu0 %vm3764_vm12, %v3098_v31 }
 0x582   : > { %v1965_v44 = vsel %vm888_vm4, %v3281_v41, %v3286_v26  ;;  %v1964_v45 = vsel %vm888_vm4, %v3280_v9, %v3285_v27  ;;  %3103 = vmatpush3.bf16.msk.msra.mxu0 %vm3764_vm12, %v3098_v31 }
 0x583   : > { %v3072_v42 = vpack.c.bf16 %v1965_v44, %v1964_v45  ;;  %v3294_v17 = vpop.permute.xlu0 %3293  ;;  %v3289_v28 = vpop.permute.xlu1 %3288 }
 0x584   : > { %v3296_v46 = vunpack.i.h.bf16 %v3294_v17  ;;  %v3295_v47 = vunpack.i.l.bf16 %v3294_v17  ;;  %v3291_v60 = vunpack.i.h.bf16 %v3289_v28  ;;  %v3290_v48 = vunpack.i.l.bf16 %v3289_v28 }
 0x585   : > { %3074 = vmatprep.subr.msk.bf16.mxu1 %vm3764_vm12, %v3072_v42 }
 0x586   : > { %v2420_v49 = vsel %vm888_vm4, %v3291_v60, %v3296_v46  ;;  %v2419_v53 = vsel %vm888_vm4, %v3290_v48, %v3295_v47  ;;  %3077 = vmatpush3.bf16.msk.msra.mxu1 %vm3764_vm12, %v3072_v42 }
 0x587   : > { %v3104_v56 = vpack.c.bf16 %v2420_v49, %v2419_v53  ;;  %v3304_v30 = vpop.permute.xlu0 %3303  ;;  %v3299_v52 = vpop.permute.xlu1 %3298  ;;  %3079 = vmatprep.subr.bf16.mxu1 %v4169_v57 }
 0x588   : > { %v3306_v38 = vunpack.i.h.bf16 %v3304_v30  ;;  %v3305_v51 = vunpack.i.l.bf16 %v3304_v30  ;;  %v3301_v13 = vunpack.i.h.bf16 %v3299_v52  ;;  %v3300_v12 = vunpack.i.l.bf16 %v3299_v52 }
 0x589   : > { %3106 = vmatprep.subr.msk.bf16.mxu0 %vm3764_vm12, %v3104_v56 }
 0x58a   : > { %v1995_v61 = vsel %vm903_vm3, %v3301_v13, %v3306_v38  ;;  %v1994_v25 = vsel %vm903_vm3, %v3300_v12, %v3305_v51  ;;  %3081 = vmatpush3.bf16.msra.mxu1 %v4169_v57  ;;  %3109 = vmatpush3.bf16.msk.msra.mxu0 %vm3764_vm12, %v3104_v56 }
 0x58b   : > { %v3314_v63 = vpop.permute.xlu0 %3313  ;;  %v3309_v50 = vpop.permute.xlu1 %3308  ;;  %3083 = vmatprep.subr.bf16.mxu1 %v4171_v19  ;;  %3111 = vmatprep.subr.bf16.mxu0 %v4173_v6  ;;  %v3086_v18 = vpack.c.bf16 %v1995_v61, %v1994_v25 }
 0x58c   : > { %v3316_v40 = vunpack.i.h.bf16 %v3314_v63  ;;  %v3315_v0 = vunpack.i.l.bf16 %v3314_v63  ;;  %v3311_v54 = vunpack.i.h.bf16 %v3309_v50  ;;  %v3310_v37 = vunpack.i.l.bf16 %v3309_v50 }
 0x58e   : > { %v2450_v22 = vsel %vm903_vm3, %v3311_v54, %v3316_v40  ;;  %v2449_v2 = vsel %vm903_vm3, %v3310_v37, %v3315_v0  ;;  %3085 = vmatpush3.bf16.msra.mxu1 %v4171_v19  ;;  %3113 = vmatpush3.bf16.msra.mxu0 %v4173_v6 }
 0x58f   : > { %v3324_v32 = vpop.permute.xlu0 %3323  ;;  %v3319_v57 = vpop.permute.xlu1 %3318  ;;  %3088 = vmatprep.subr.msk.bf16.mxu1 %vm3788_vm13, %v3086_v18  ;;  %3115 = vmatprep.subr.bf16.mxu0 %v4175_v11  ;;  %v3118_v55 = vpack.c.bf16 %v2450_v22, %v2449_v2 }
 0x590   : > { %v3326_v10 = vunpack.i.h.bf16 %v3324_v32  ;;  %v3325_v15 = vunpack.i.l.bf16 %v3324_v32  ;;  %v3321_v62 = vunpack.i.h.bf16 %v3319_v57  ;;  %v3320_v4 = vunpack.i.l.bf16 %v3319_v57 }
 0x592   : > { %v1997_v20 = vsel %vm903_vm3, %v3321_v62, %v3326_v10  ;;  %v1996_v24 = vsel %vm903_vm3, %v3320_v4, %v3325_v15  ;;  %3091 = vmatpush3.bf16.msk.msra.mxu1 %vm3788_vm13, %v3086_v18  ;;  %3117 = vmatpush3.bf16.msra.mxu0 %v4175_v11  ;;  %v854_v11 = vld [vmem:[%s4469_s18 + $0x8] sm:$0xff] }
 0x593   : > { %v3092_v19 = vpack.c.bf16 %v1997_v20, %v1996_v24  ;;  %v3334_v6 = vpop.permute.xlu0 %3333  ;;  %v3329_v39 = vpop.permute.xlu1 %3328  ;;  %3120 = vmatprep.subr.msk.bf16.mxu0 %vm3788_vm13, %v3118_v55 }
 0x594   : > { %v3336_v33 = vunpack.i.h.bf16 %v3334_v6  ;;  %v3335_v14 = vunpack.i.l.bf16 %v3334_v6  ;;  %v3331_v21 = vunpack.i.h.bf16 %v3329_v39  ;;  %v3330_v58 = vunpack.i.l.bf16 %v3329_v39 }
 0x595   : > { %3094 = vmatprep.subr.msk.bf16.mxu1 %vm3788_vm13, %v3092_v19 }
 0x596   : > { %v2452_v16 = vsel %vm903_vm3, %v3331_v21, %v3336_v33  ;;  %v2451_v35 = vsel %vm903_vm3, %v3330_v58, %v3335_v14  ;;  %3097 = vmatpush3.bf16.msk.msra.mxu1 %vm3788_vm13, %v3092_v19  ;;  %3123 = vmatpush3.bf16.msk.msra.mxu0 %vm3788_vm13, %v3118_v55 }
 0x597   : > { %v3124_v29 = vpack.c.bf16 %v2452_v16, %v2451_v35 }
 0x599   : > { %2961 = vmatmul.mubr.msk.f32.vlgmr.msra.gmra.mrb[4].mxu1 %vm1226_vm11, %v854_v11  ;;  %3126 = vmatprep.subr.msk.bf16.mxu0 %vm3788_vm13, %v3124_v29 }
 0x59a   : > { %3129 = vmatpush3.bf16.msk.msra.mxu0 %vm3788_vm13, %v3124_v29  ;;  %2963 = vmatprep.mubr.msk.f32.mxu1 %vm1226_vm11, %v855_v23 }
 0x59d   : > { %2964 = vmatmul.mubr.msk.f32.gmra.mrb[6].mxu1 %vm1226_vm11, %v856_v5  ;;  %2991 = vmatmul.mubr.msk.f32.vlgmr.msra.gmra.mrb[8].mxu0 %vm1226_vm11, %v854_v11 }
 0x59e   : > { %2993 = vmatprep.mubr.msk.f32.mxu0 %vm1226_vm11, %v855_v23 }
 0x5a1   : > { %2994 = vmatmul.mubr.msk.f32.gmra.mrb[10].mxu0 %vm1226_vm11, %v856_v5 }
 0x5a4   : > { %v2010_v43 = vpop.permute.xlu0 %2009  ;;  %v2005_v34 = vpop.permute.xlu1 %2004 }
 0x5a8   : > { %v2020_v1 = vpop.permute.xlu0 %2019  ;;  %v2015_v26 = vpop.permute.xlu1 %2014 }
 0x66c   : > { %v2962_v36 = vpop.f32.mrb[4].mxu1 }
 0x66d   : > { %v2106_v31 = vadd.f32 %v2962_v36, %v2010_v43  ;;  %v2100_v59 = vpop.f32.mrb[5].mxu1 }
 0x66e   : > { %v2101_v8 = vadd.f32 %v2100_v59, %v2005_v34 }
 0x66f   : > { %v4315_v27 = vmax.f32 %v2106_v31, 0.0 }
 0x670   : > { %v4317_v41 = vmax.f32 %v2101_v8, 0.0  ;;  %v2965_v9 = vpop.f32.mrb[6].mxu1  ;;  %v2992_v44 = vpop.f32.mrb[8].mxu0 }
 0x671   : > { %v2124_v45 = vsel %vm1039_vm10, %v4315_v27, 0.0  ;;  %v2137_v42 = vmul.f32 %v4315_v27, %v4315_v27  ;;  %v2116_v17 = vadd.f32 %v2965_v9, %v2020_v1  ;;  %v2529_v28 = vadd.f32 %v2992_v44, %v2010_v43  ;;  %v2110_v46 = vpop.f32.mrb[7].mxu1  ;;  %v2523_v47 = vpop.f32.mrb[9].mxu0 }
 0x672   : > { %v2123_v60 = vsel %vm1039_vm10, %v4317_v41, 0.0  ;;  %v2136_v48 = vmul.f32 %v4317_v41, %v4317_v41  ;;  %v2111_v49 = vadd.f32 %v2110_v46, %v2015_v26  ;;  %v2524_v53 = vadd.f32 %v2523_v47, %v2005_v34  ;;  %v4371_v46 = vpop.permute.xlu1 %2170 }
 0x673   : > { %v2141_v56 = vsel %vm1039_vm10, %v2137_v42, 0.0  ;;  %v2125_v30 = vadd.f32 %v2124_v45, %v2123_v60  ;;  %v4328_v52 = vmax.f32 %v2116_v17, 0.0  ;;  %v4330_v38 = vmax.f32 %v2529_v28, 0.0 }
 0x674   : > { %v2140_v51 = vsel %vm1039_vm10, %v2136_v48, 0.0  ;;  %v4333_v13 = vmax.f32 %v2111_v49, 0.0  ;;  %v4335_v12 = vmax.f32 %v2524_v53, 0.0  ;;  %v2995_v61 = vpop.f32.mrb[10].mxu0  ;;  %v4373_v53 = vpop.permute.xlu0 %2175 }
 0x675   : > { %v2142_v25 = vadd.f32 %v2141_v56, %v2140_v51  ;;  %v2139_v63 = vmul.f32 %v4328_v52, %v4328_v52  ;;  %v2547_v50 = vsel %vm1039_vm10, %v4330_v38, 0.0  ;;  %v2533_v40 = vpop.f32.mrb[11].mxu0  ;;  %v2560_v0 = vmul.f32 %v4330_v38, %v4330_v38 }
 0x676   : > { %v2126_v54 = vsel %vm1039_vm10, %v4333_v13, 0.0  ;;  %v2138_v37 = vmul.f32 %v4333_v13, %v4333_v13  ;;  %v2546_v18 = vsel %vm1039_vm10, %v4335_v12, 0.0  ;;  %v2128_v22 = vsel %vm1039_vm10, %v4328_v52, 0.0 }
 0x677   : > { %v2127_v2 = vadd.f32 %v2126_v54, %v2125_v30  ;;  %v2548_v32 = vadd.f32 %v2547_v50, %v2546_v18  ;;  %v2559_v57 = vmul.f32 %v4335_v12, %v4335_v12  ;;  %v2564_v10 = vsel %vm1039_vm10, %v2560_v0, 0.0 }
 0x678   : > { %v2143_v15 = vsel %vm1039_vm10, %v2138_v37, 0.0  ;;  %v2539_v62 = vadd.f32 %v2995_v61, %v2020_v1  ;;  %v2534_v4 = vadd.f32 %v2533_v40, %v2015_v26  ;;  %v2145_v19 = vsel %vm1039_vm10, %v2139_v63, 0.0 }
 0x679   : > { %v2129_v55 = vadd.f32 %v2128_v22, %v2127_v2  ;;  %v2144_v20 = vadd.f32 %v2143_v15, %v2142_v25  ;;  %v2563_v24 = vsel %vm1039_vm10, %v2559_v57, 0.0  ;;  %v2181_v22 = vpop.permute.xlu1 %2180 }
 0x67a   : > { %v2565_v6 = vadd.f32 %v2564_v10, %v2563_v24  ;;  %v4357_v39 = vmax.f32 %v2539_v62, 0.0  ;;  %v4359_v33 = vmax.f32 %v2534_v4, 0.0  ;;  %v2195_v10 = vpop.permute.xlu0 %2194 }
 0x67b   : > { %v2130_v14 = vrot.slane %v2129_v55, 4  ;;  %v2146_v21 = vadd.f32 %v2145_v19, %v2144_v20 }
 0x67c   : > { %v2562_v58 = vmul.f32 %v4357_v39, %v4357_v39  ;;  %v2549_v16 = vsel %vm1039_vm10, %v4359_v33, 0.0  ;;  %v2561_v35 = vmul.f32 %v4359_v33, %v4359_v33  ;;  %v2551_v5 = vsel %vm1039_vm10, %v4357_v39, 0.0 }
 0x67d   : > { %v2131_v11 = vadd.f32 %v2130_v14, %v2129_v55  ;;  %v2147_v29 = vrot.slane %v2146_v21, 4  ;;  %v2550_v23 = vadd.f32 %v2549_v16, %v2548_v32 }
 0x67e   : > { %v2566_v43 = vsel %vm1039_vm10, %v2561_v35, 0.0  ;;  %v2568_v8 = vsel %vm1039_vm10, %v2562_v58, 0.0  ;;  %v2186_v14 = vpop.permute.xlu0 %2185 }
 0x67f   : > { %v2132_v34 = vrot.slane %v2131_v11, 2  ;;  %v2148_v36 = vadd.f32 %v2147_v29, %v2146_v21  ;;  %v2552_v31 = vadd.f32 %v2551_v5, %v2550_v23  ;;  %v2567_v59 = vadd.f32 %v2566_v43, %v2565_v6 }
 0x681   : > { %v2133_v1 = vadd.f32 %v2132_v34, %v2131_v11  ;;  %v2149_v26 = vrot.slane %v2148_v36, 2  ;;  %v2553_v9 = vrot.slane %v2552_v31, 4  ;;  %v2569_v44 = vadd.f32 %v2568_v8, %v2567_v59 }
 0x682   : > { %v2210_v35 = vpop.permute.xlu0 %2209 }
 0x683   : > { %v2134_v45 = vrot.slane %v2133_v1, 1  ;;  %v2150_v42 = vadd.f32 %v2149_v26, %v2148_v36  ;;  %v2554_v17 = vadd.f32 %v2553_v9, %v2552_v31  ;;  %v2570_v28 = vrot.slane %v2569_v44, 4 }
 0x685   : > { %v2135_v47 = vadd.f32 %v2134_v45, %v2133_v1  ;;  %v2151_v60 = vrot.slane %v2150_v42, 1  ;;  %v2555_v48 = vrot.slane %v2554_v17, 2  ;;  %v2571_v49 = vadd.f32 %v2570_v28, %v2569_v44 }
 0x687   : > { %v2152_v56 = vadd.f32 %v2151_v60, %v2150_v42  ;;  %v2153_v30 = vmul.f32 0.03125, %v2135_v47  ;;  %v2556_v51 = vadd.f32 %v2555_v48, %v2554_v17  ;;  %v2572_v61 = vrot.slane %v2571_v49, 2 }
 0x689   : > { %v2154_v25 = vmul.f32 0.03125, %v2152_v56  ;;  %v2155_v63 = vmul.f32 %v2153_v30, %v2153_v30  ;;  %v2158_v50 = vsub.f32 %v4317_v41, %v2153_v30  ;;  %v2159_v40 = vsub.f32 %v4315_v27, %v2153_v30 }
 0x68a   : > { %v2160_v0 = vsub.f32 %v4333_v13, %v2153_v30  ;;  %v2161_v54 = vsub.f32 %v4328_v52, %v2153_v30  ;;  %v2557_v37 = vrot.slane %v2556_v51, 1  ;;  %v2573_v18 = vadd.f32 %v2572_v61, %v2571_v49  ;;  %v2200_v13 = vpop.permute.xlu1 %2199 }
 0x68b   : > { %v2156_v2 = vsub.f32 %v2154_v25, %v2155_v63 }
 0x68c   : > { %v2558_v32 = vadd.f32 %v2557_v37, %v2556_v51  ;;  %v2574_v57 = vrot.slane %v2573_v18, 1 }
 0x68d   : > { %v2157_v15 = vmax.f32 %v2156_v2, 0.0 }
 0x68e   : > { %v2575_v62 = vadd.f32 %v2574_v57, %v2573_v18  ;;  %v2576_v4 = vmul.f32 0.03125, %v2558_v32  ;;  %v2205_v16 = vpop.permute.xlu1 %2204 }
 0x68f   : > { %v2162_v55 = vadd.f32 1e-05, %v2157_v15 }
 0x690   : > { %v2577_v20 = vmul.f32 0.03125, %v2575_v62  ;;  %v2578_v24 = vmul.f32 %v2576_v4, %v2576_v4  ;;  %v2581_v41 = vsub.f32 %v4335_v12, %v2576_v4  ;;  %v2582_v27 = vsub.f32 %v4330_v38, %v2576_v4 }
 0x691   : > { %3345 = vrsqrt.f32 %v2162_v55  ;;  %v2583_v52 = vsub.f32 %v4359_v33, %v2576_v4  ;;  %v2584_v19 = vsub.f32 %v4357_v39, %v2576_v4  ;;  %v2228_v39 = vpop.permute.xlu0 %2227 }
 0x692   : > { %v2579_v6 = vsub.f32 %v2577_v20, %v2578_v24  ;;  %v2223_v43 = vpop.permute.xlu1 %2222 }
 0x694   : > { %v2580_v21 = vmax.f32 %v2579_v6, 0.0 }
 0x695   : > { %v2238_v51 = vpop.permute.xlu0 %2237 }
 0x696   : > { %v2585_v58 = vadd.f32 1e-05, %v2580_v21  ;;  %v2233_v17 = vpop.permute.xlu1 %2232 }
 0x698   : > { %3347 = vrsqrt.f32 %v2585_v58 }
 0x69b   : > { %v3346_v11 = vpop.eup %3345 }
 0x69c   : > { %v2164_v29 = vmul.f32 %v3346_v11, %v2158_v50  ;;  %v2165_v23 = vmul.f32 %v3346_v11, %v2159_v40  ;;  %v2166_v5 = vmul.f32 %v3346_v11, %v2160_v0  ;;  %v2167_v12 = vmul.f32 %v3346_v11, %v2161_v54 }
 0x69e   : > { %v2188_v38 = vmul.f32 %v4371_v46, %v2164_v29  ;;  %v2189_v34 = vmul.f32 %v4373_v53, %v2165_v23  ;;  %v2190_v33 = vmul.f32 %v2181_v22, %v2166_v5  ;;  %v2191_v36 = vmul.f32 %v2186_v14, %v2167_v12  ;;  %v2260_v29 = vpop.permute.xlu1 %2259 }
 0x6a0   : > { %v2212_v31 = vadd.f32 %v2195_v10, %v2188_v38  ;;  %v2213_v59 = vadd.f32 %v2200_v13, %v2189_v34  ;;  %v2214_v8 = vadd.f32 %v2205_v16, %v2190_v33  ;;  %v2215_v1 = vadd.f32 %v2210_v35, %v2191_v36 }
 0x6a2   : > { %v3348_v26 = vpop.eup %3347  ;;  %v2216_v9 = vmul.f32 %v2212_v31, %v3621_v7  ;;  %v2217_v44 = vmul.f32 %v2213_v59, %v3621_v7  ;;  %v2218_v45 = vmul.f32 %v2214_v8, %v3621_v7  ;;  %v2219_v42 = vmul.f32 %v2215_v1, %v3621_v7 }
 0x6a3   : > { %v2587_v28 = vmul.f32 %v3348_v26, %v2581_v41  ;;  %v2588_v47 = vmul.f32 %v3348_v26, %v2582_v27  ;;  %v2589_v60 = vmul.f32 %v3348_v26, %v2583_v52  ;;  %v2590_v48 = vmul.f32 %v3348_v26, %v2584_v19 }
 0x6a4   : > { %v2240_v49 = vmul.f32 %v2223_v43, %v2216_v9  ;;  %v2241_v56 = vmul.f32 %v2228_v39, %v2217_v44  ;;  %v2242_v30 = vmul.f32 %v2233_v17, %v2218_v45  ;;  %v2243_v40 = vmul.f32 %v2238_v51, %v2219_v42 }
 0x6a5   : > { %v2591_v61 = vmul.f32 %v2587_v28, %v4371_v46  ;;  %v2592_v25 = vmul.f32 %v2588_v47, %v4373_v53  ;;  %v2593_v63 = vmul.f32 %v2589_v60, %v2181_v22  ;;  %v2594_v50 = vmul.f32 %v2590_v48, %v2186_v14 }
 0x6a6   : > { %v2244_v0 = vsel %vm1039_vm10, %v2240_v49, 0.0  ;;  %v2245_v54 = vsel %vm1039_vm10, %v2241_v56, 0.0  ;;  %v2247_v57 = vsel %vm1039_vm10, %v2242_v30, 0.0  ;;  %v2249_v22 = vsel %vm1039_vm10, %v2243_v40, 0.0 }
 0x6a7   : > { %v2246_v37 = vadd.f32 %v2245_v54, %v2244_v0  ;;  %v2595_v18 = vadd.f32 %v2591_v61, %v2195_v10  ;;  %v2596_v2 = vadd.f32 %v2592_v25, %v2200_v13  ;;  %v2597_v32 = vadd.f32 %v2593_v63, %v2205_v16 }
 0x6a8   : > { %v2598_v15 = vadd.f32 %v2594_v50, %v2210_v35 }
 0x6a9   : > { %v2248_v62 = vadd.f32 %v2247_v57, %v2246_v37  ;;  %v2599_v4 = vmul.f32 %v2595_v18, %v3621_v7  ;;  %v2600_v46 = vmul.f32 %v2596_v2, %v3621_v7  ;;  %v2601_v53 = vmul.f32 %v2597_v32, %v3621_v7 }
 0x6aa   : > { %v2602_v55 = vmul.f32 %v2598_v15, %v3621_v7 }
 0x6ab   : > { %v2250_v20 = vadd.f32 %v2249_v22, %v2248_v62  ;;  %v2603_v24 = vmul.f32 %v2599_v4, %v2223_v43  ;;  %v2604_v41 = vmul.f32 %v2600_v46, %v2228_v39  ;;  %v2605_v10 = vmul.f32 %v2601_v53, %v2233_v17 }
 0x6ac   : > { %v2606_v13 = vmul.f32 %v2602_v55, %v2238_v51  ;;  %v2265_v43 = vrot.slane %v2260_v29, %v3609_v3 }
 0x6ad   : > { %v2251_v27 = vrot.slane %v2250_v20, 4  ;;  %v2607_v52 = vsel %vm1039_vm10, %v2603_v24, 0.0  ;;  %v2608_v19 = vsel %vm1039_vm10, %v2604_v41, 0.0  ;;  %v2610_v21 = vsel %vm1039_vm10, %v2605_v10, 0.0 }
 0x6ae   : > { %v2609_v6 = vadd.f32 %v2608_v19, %v2607_v52  ;;  %v2612_v35 = vsel %vm1039_vm10, %v2606_v13, 0.0 }
 0x6af   : > { %v2252_v14 = vadd.f32 %v2251_v27, %v2250_v20 }
 0x6b0   : > { %v2611_v58 = vadd.f32 %v2610_v21, %v2609_v6 }
 0x6b1   : > { %v2253_v16 = vrot.slane %v2252_v14, 2 }
 0x6b2   : > { %v2613_v11 = vadd.f32 %v2612_v35, %v2611_v58 }
 0x6b3   : > { %v2254_v7 = vadd.f32 %v2253_v16, %v2252_v14 }
 0x6b4   : > { %v2614_v23 = vrot.slane %v2613_v11, 4 }
 0x6b5   : > { %v2255_v5 = vrot.slane %v2254_v7, 1 }
 0x6b6   : > { %v2615_v12 = vadd.f32 %v2614_v23, %v2613_v11 }
 0x6b7   : > { %v2256_v38 = vadd.f32 %v2255_v5, %v2254_v7 }
 0x6b8   : > { %v2616_v34 = vrot.slane %v2615_v12, 2 }
 0x6b9   : > { %v2266_v33 = vadd.f32 %v2265_v43, %v2256_v38 }
 0x6ba   : > { %v2617_v36 = vadd.f32 %v2616_v34, %v2615_v12 }
 0x6bb   : > { %v2778_v39 = vmul.f32 -1.442695, %v2266_v33 }
 0x6bc   : > { %v2618_v31 = vrot.slane %v2617_v36, 1 }
 0x6bd   : > { %3349 = vpow2.f32 %v2778_v39 }
 0x6be   : > { %v2619_v59 = vadd.f32 %v2618_v31, %v2617_v36 }
 0x6c0   : > { %v2620_v8 = vadd.f32 %v2619_v59, %v2265_v43 }
 0x6c2   : > { %v2791_v1 = vmul.f32 -1.442695, %v2620_v8 }
 0x6c4   : > { %3351 = vpow2.f32 %v2791_v1 }
 0x6c7   : > { %v3350_v26 = vpop.eup %3349 }
 0x6c8   : > { %v2270_v9 = vadd.f32 1.0, %v3350_v26 }
 0x6ca   : > { %3353 = vrcp.f32 %v2270_v9 }
 0x6ce   : > { %v3352_v44 = vpop.eup %3351 }
 0x6cf   : > { %v2624_v45 = vadd.f32 1.0, %v3352_v44 }
 0x6d1   : > { %3355 = vrcp.f32 %v2624_v45 }
 0x6d4   : > { %v3354_v3 = vpop.eup %3353 }
 0x6db   : > { %v3356_v42 = vpop.eup %3355 }
 0x6dc   : > { %v2628_v17 = vsel %vm2627_vm14, %v3354_v3, %v3356_v42 }
 0x6dd   : > { %2630 = vst.msk [vmem:[%s763_s25] sm:$0x3] %vm2629_vm15, %v2628_v17 }
 0x6de   : > { %3370 = shalt.err (!%p3367_p3)
}
 0x6df   : > { %s3371_s2 = scalar_lea.hbm %s4409_s28, 32  ;;  %s3375_s27 = scalar_lea.hbm %s4547_s7, 64 }
 0x6e0   : > { %p3372_p4 = scmp.ne.s32.totalorder %s4409_s28, %s3371_s2  ;;  %p3376_p9 = scmp.lt.u32.totalorder %s4409_s28, %s4547_s7 }
 0x6e1   : > { %p3377_p10 = scmp.lt.u32.totalorder %s3375_s27, %s3371_s2  ;;  %p3379_p12 = scmp.lt.u32.totalorder %s3371_s2, %s4409_s28 }
 0x6e2   : > { %p3373_p7 = pnand %p3372_p4, %p3594_p5 }
 0x6e3   : > { %p3378_p11 = por %p3377_p10, %p3376_p9 }
 0x6e4   : > { %p3374_p8 = pneg %p3373_p7 }
 0x6e5   : > { %p3380_p13 = por %p3379_p12, %p3378_p11 }
 0x6e7   : > { %p3381_p0 = pnand %p3380_p13, %p3374_p8 }
 0x6e9   : > { %3384 = shalt.err (!%p3381_p0)
}
 0x6ea   : > { %3130 = dma.vmem_to_hbm [thread:$0]  (%p3594_p5), %s4411_s22, 32, %s4409_s28, %s2632_s5  }
 0x6eb PF: > { %s4548_s1 = sld [smem:[#allocation9_spill]]  ;;  %s4549_s6 = sld [smem:[#allocation6_spill]] }
 0x6f1   : > { %p3136_p1 = scmp.ge.s32.totalorder %s4548_s1, 2  ;;  %s2657_s4 = sand.u32 1, %s4549_s6  }
 0x6f2   : > { %s2658_s25 = scalar_lea.sflag [#allocation4], %s2657_s4 }
 0x6f3   : > { %p3133_p2 = pnand %p3136_p1, %p3598_p6 }
 0x6f5   : > { %3402 = dma.done.wait (!%p3133_p2), %s2658_s25, 32  }
 0x6f6   : > { %3404 = vsyncadd (!%p3133_p2), %s2658_s25, 4294967264  ;;  %s4551_s2 = sld [smem:[#allocation11_spill]]  ;;  %s4552_s27 = sld [smem:[#allocation7_spill]] }
 0x6f7   : > { %s4553_s28 = sld [smem:[#allocation8_spill]]  ;;  %s4554_s6 = sld [smem:[#allocation12_spill]] }
 0x6fc   : > { %p36_p3 = scmp.ge.s32.totalorder %s4551_s2, 4  }
 0x6fe   :  { %38 = sbr.rel (!%p36_p3) target bundleno = 15 (0xf), region = 160 }
 0x705   :  { %2663 = vsyncpa [#allocation4], 1 }
 0x706   :  { %2665 = vsyncpa [#allocation4 + $0x1], 1 }

</bundles_post_ra>
